<compile_context>
chip_gen: v7x
topology: tpu7x:2x2x1
jax: 0.10.0
libtpu: 0.0.40
codegen_flags: <defaults>
</compile_context>

<pallas_src>
import jax
import jax.numpy as jnp
from jax import lax
from jax.experimental import pallas as pl
from jax.experimental.pallas import tpu as pltpu


def make_deform_conv(C, H, W, KH, KW, pad, stride, dilation, groups):
    K = KH * KW
    H_out = (H + 2 * pad - dilation * (KH - 1) - 1) // stride + 1
    W_out = (W + 2 * pad - dilation * (KW - 1) - 1) // stride + 1
    HW_out = H_out * W_out

    # Output-pixel tile: largest lane-dense (multiple of 128) divisor, else full.
    T = HW_out
    for cand in (1024, 512, 256, 128):
        if HW_out % cand == 0:
            T = cand
            break
    n_tiles = HW_out // T

    def kernel(x_ref, off_ref, wsel_ref, by_ref, bx_ref, o_ref):
        x2 = x_ref[0].astype(jnp.float32)         # [C*H, W]   rows = c*H + h
        offs = off_ref[0].astype(jnp.float32)     # [2K, T]    (y, x) interleaved per k
        by = by_ref[...]                          # [1, T]     h_out*stride - pad
        bx = bx_ref[...]                          # [1, T]     w_out*stride - pad

        iota_h = lax.broadcasted_iota(jnp.int32, (H, 1), 0)
        iota_w = lax.broadcasted_iota(jnp.int32, (W, 1), 0)

        acc = jnp.zeros((C, T), jnp.float32)
        for k in range(K):                        # static KH*KW loop
            ki, kj = divmod(k, KW)
            py = by + float(ki * dilation) + offs[2 * k:2 * k + 1, :]
            px = bx + float(kj * dilation) + offs[2 * k + 1:2 * k + 2, :]
            y0 = jnp.floor(py)
            x0 = jnp.floor(px)
            ly = py - y0
            lx = px - x0
            y0i = y0.astype(jnp.int32)
            x0i = x0.astype(jnp.int32)

            # Separable 2-tap one-hot interpolation matrices.  Out-of-range taps
            # never match the iota -> exact zero-padded bilinear sampling.
            Ry = ((iota_h == y0i).astype(jnp.float32) * (1.0 - ly)
                  + (iota_h == (y0i + 1)).astype(jnp.float32) * ly)        # [H, T]
            Cx = ((iota_w == x0i).astype(jnp.float32) * (1.0 - lx)
                  + (iota_w == (x0i + 1)).astype(jnp.float32) * lx)        # [W, T]

            # Column (x) gather on the MXU.
            t = jnp.dot(x2, Cx, preferred_element_type=jnp.float32)        # [C*H, T]
            # Row (y) gather fused with the group-conv weights into one matmul.
            tw = t * jnp.tile(Ry, (C, 1))                                  # [C*H, T]
            acc = acc + jnp.dot(wsel_ref[k], tw,
                                preferred_element_type=jnp.float32)        # [C, T]

        o_ref[0] = acc.astype(o_ref.dtype)

    def run(x, woff, boff, wdef):
        B = x.shape[0]
        cpg = C // groups

        # ---- offset-net: standard dense conv -> plain XLA conv (per review) ----
        offsets = lax.conv_general_dilated(
            x, woff, (stride, stride), [(pad, pad), (pad, pad)],
            rhs_dilation=(dilation, dilation),
            dimension_numbers=("NCHW", "OIHW", "NCHW"))
        offsets = offsets + boff[None, :, None, None]
        offsets = offsets.reshape(B, 2 * K, HW_out).astype(jnp.float32)

        # ---- deformable-conv weights: block-diagonal per k, then repeat each
        # input channel H times so the y-interpolation reduce folds into the
        # same MXU matmul:  wsel[k, co, ci*H + h] = Wdef_k[co, ci]. ----
        wdef_dense = jnp.zeros((K, C, C), jnp.float32)
        for k in range(K):
            ki, kj = divmod(k, KW)
            for g in range(groups):
                sl = slice(g * cpg, (g + 1) * cpg)
                wdef_dense = wdef_dense.at[k, sl, sl].set(wdef[sl, :, ki, kj])
        wsel = jnp.repeat(wdef_dense, H, axis=2)             # [K, C, C*H]

        x_rows = x.reshape(B, C * H, W).astype(jnp.float32)  # [B, C*H, W]

        hh = jnp.arange(H_out, dtype=jnp.float32) * stride - pad
        ww = jnp.arange(W_out, dtype=jnp.float32) * stride - pad
        by = jnp.broadcast_to(hh[:, None], (H_out, W_out)).reshape(1, HW_out)
        bx = jnp.broadcast_to(ww[None, :], (H_out, W_out)).reshape(1, HW_out)

        out = pl.pallas_call(
            kernel,
            out_shape=jax.ShapeDtypeStruct((B, C, HW_out), jnp.float32),
            grid_spec=pltpu.PrefetchScalarGridSpec(
                num_scalar_prefetch=0,
                grid=(B, n_tiles),
                in_specs=[
                    pl.BlockSpec((1, C * H, W), lambda b, j: (b, 0, 0)),
                    pl.BlockSpec((1, 2 * K, T), lambda b, j: (b, 0, j)),
                    pl.BlockSpec((K, C, C * H), lambda b, j: (0, 0, 0)),
                    pl.BlockSpec((1, T), lambda b, j: (0, j)),
                    pl.BlockSpec((1, T), lambda b, j: (0, j)),
                ],
                out_specs=pl.BlockSpec((1, C, T), lambda b, j: (b, 0, j)),
            ),
            compiler_params=pltpu.CompilerParams(
                dimension_semantics=("parallel", "parallel"),
                vmem_limit_bytes=32 * 1024 * 1024),
        )(x_rows, offsets, wsel, by, bx)
        return out.reshape(B, C, H_out, W_out)

    return run


def deform_conv_ref(x, woff, boff, wdef, groups, KH, KW, pad, stride, dilation):
    """Independent pure-JAX reference (gather-based bilinear sampling)."""
    B, C, H, W = x.shape
    K = KH * KW
    cpg = C // groups
    offsets = lax.conv_general_dilated(
        x, woff, (stride, stride), [(pad, pad), (pad, pad)],
        rhs_dilation=(dilation, dilation),
        dimension_numbers=("NCHW", "OIHW", "NCHW")) + boff[None, :, None, None]
    hh = jnp.arange(H, dtype=jnp.float32)[None, :, None]
    ww = jnp.arange(W, dtype=jnp.float32)[None, None, :]
    xf = x.reshape(B, C, H * W)
    out = jnp.zeros((B, C, H, W), jnp.float32)
    for k in range(K):
        ki, kj = divmod(k, KW)
        oy = offsets[:, 2 * k]
        ox = offsets[:, 2 * k + 1]
        py = hh * stride - pad + ki * dilation + oy
        px = ww * stride - pad + kj * dilation + ox
        y0 = jnp.floor(py)
        x0 = jnp.floor(px)
        ly = py - y0
        lx = px - x0

        def sample(yc, xc, wt):
            valid = ((yc >= 0) & (yc < H) & (xc >= 0) & (xc < W)).astype(jnp.float32)
            yi = jnp.clip(yc, 0, H - 1).astype(jnp.int32)
            xi = jnp.clip(xc, 0, W - 1).astype(jnp.int32)
            idx = (yi * W + xi).reshape(B, H * W)
            g = jax.vmap(lambda a, b: a[:, b])(xf, idx)          # [B, C, HW]
            return g * (wt * valid).reshape(B, 1, H * W)

        s = (sample(y0, x0, (1 - ly) * (1 - lx))
             + sample(y0, x0 + 1, (1 - ly) * lx)
             + sample(y0 + 1, x0, ly * (1 - lx))
             + sample(y0 + 1, x0 + 1, ly * lx)).reshape(B, C, H, W)
        for g_ in range(groups):
            wk = wdef[g_ * cpg:(g_ + 1) * cpg, :, ki, kj]
            out = out.at[:, g_ * cpg:(g_ + 1) * cpg].add(
                jnp.einsum("oc,bchw->bohw", wk, s[:, g_ * cpg:(g_ + 1) * cpg]))
    return out


if __name__ == "__main__":
    B, C, H, W = 2, 4, 16, 16
    KH, KW = 3, 3
    groups = 2
    pad, stride, dilation = 1, 1, 1
    K = KH * KW
    cpg = C // groups

    key = jax.random.PRNGKey(0)
    k1, k2, k3, k4 = jax.random.split(key, 4)
    x = jax.random.normal(k1, (B, C, H, W), jnp.float32)
    # offset_net: Conv2d(C -> 2*K, 3x3, pad=1, bias=True)
    woff = jax.random.normal(k2, (2 * K, C, KH, KW), jnp.float32) * 0.1
    boff = jax.random.normal(k3, (2 * K,), jnp.float32) * 0.1
    # deform_conv: DeformConv2d(C -> C, 3x3, pad=1, groups=2, bias=False)
    wdef = jax.random.normal(k4, (C, cpg, KH, KW), jnp.float32) * 0.2

    run = make_deform_conv(C, H, W, KH, KW, pad, stride, dilation, groups)
    out = jax.block_until_ready(run(x, woff, boff, wdef))

    ref = deform_conv_ref(x, woff, boff, wdef, groups, KH, KW,
                          pad, stride, dilation)
    assert out.shape == (B, C, H, W)
    assert jnp.allclose(out, ref, atol=2e-3, rtol=2e-3), \
        float(jnp.max(jnp.abs(out - ref)))
    print("KERNEL_OK")
</pallas_src>

<mosaic_0001>
module attributes {stable_mosaic.version = 11 : i64} {
  func.func @kernel(%arg0: i32, %arg1: i32, %arg2: memref<1x64x16xf32, #tpu.memory_space<vmem>>, %arg3: memref<1x18x256xf32, #tpu.memory_space<vmem>>, %arg4: memref<9x4x64xf32, #tpu.memory_space<vmem>>, %arg5: memref<1x256xf32, #tpu.memory_space<vmem>>, %arg6: memref<1x256xf32, #tpu.memory_space<vmem>>, %arg7: memref<1x4x256xf32, #tpu.memory_space<vmem>>) attributes {dimension_semantics = [#tpu.dimension_semantics<parallel>, #tpu.dimension_semantics<parallel>], iteration_bounds = array<i64: 2, 1>, scalar_prefetch = 0 : i64, scratch_operands = 0 : i64, tpu.core_type = #tpu.core_type<tc>, window_params = [{transform_indices = @transform_0, window_bounds = array<i64: 1, 64, 16>}, {transform_indices = @transform_1, window_bounds = array<i64: 1, 18, 256>}, {pipeline_mode = #tpu.pipeline_mode<synchronous>, transform_indices = @transform_2, window_bounds = array<i64: 9, 4, 64>}, {transform_indices = @transform_3, window_bounds = array<i64: 1, 256>}, {transform_indices = @transform_4, window_bounds = array<i64: 1, 256>}, {transform_indices = @transform_5, window_bounds = array<i64: 1, 4, 256>}]} {
    %c0 = arith.constant 0 : index
    %c0_0 = arith.constant 0 : index
    %c0_1 = arith.constant 0 : index
    %0 = vector.load %arg2[%c0, %c0_0, %c0_1] : memref<1x64x16xf32, #tpu.memory_space<vmem>>, vector<1x64x16xf32>
    %1 = vector.shape_cast %0 : vector<1x64x16xf32> to vector<64x16xf32>
    %c0_2 = arith.constant 0 : index
    %c0_3 = arith.constant 0 : index
    %c0_4 = arith.constant 0 : index
    %2 = vector.load %arg3[%c0_2, %c0_3, %c0_4] : memref<1x18x256xf32, #tpu.memory_space<vmem>>, vector<1x18x256xf32>
    %3 = vector.shape_cast %2 : vector<1x18x256xf32> to vector<18x256xf32>
    %c0_5 = arith.constant 0 : index
    %c0_6 = arith.constant 0 : index
    %4 = vector.load %arg5[%c0_5, %c0_6] : memref<1x256xf32, #tpu.memory_space<vmem>>, vector<1x256xf32>
    %c0_7 = arith.constant 0 : index
    %c0_8 = arith.constant 0 : index
    %5 = vector.load %arg6[%c0_7, %c0_8] : memref<1x256xf32, #tpu.memory_space<vmem>>, vector<1x256xf32>
    %6 = tpu.iota {dimensions = array<i32: 0>} : vector<16x1xi32>
    %7 = tpu.iota {dimensions = array<i32: 0>} : vector<16x1xi32>
    %cst = arith.constant 0.000000e+00 : f32
    %8 = vector.broadcast %cst : f32 to vector<4x256xf32>
    %cst_9 = arith.constant 0.000000e+00 : f32
    %9 = vector.broadcast %cst_9 : f32 to vector<1x256xf32>
    %10 = arith.addf %4, %9 : vector<1x256xf32>
    %11 = vector.extract_strided_slice %3 {offsets = [0, 0], sizes = [1, 256], strides = [1, 1]} : vector<18x256xf32> to vector<1x256xf32>
    %12 = arith.addf %10, %11 : vector<1x256xf32>
    %cst_10 = arith.constant 0.000000e+00 : f32
    %13 = vector.broadcast %cst_10 : f32 to vector<1x256xf32>
    %14 = arith.addf %5, %13 : vector<1x256xf32>
    %15 = vector.extract_strided_slice %3 {offsets = [1, 0], sizes = [1, 256], strides = [1, 1]} : vector<18x256xf32> to vector<1x256xf32>
    %16 = arith.addf %14, %15 : vector<1x256xf32>
    %17 = math.floor %12 : vector<1x256xf32>
    %18 = math.floor %16 : vector<1x256xf32>
    %19 = arith.subf %12, %17 : vector<1x256xf32>
    %20 = arith.subf %16, %18 : vector<1x256xf32>
    %21 = arith.fptosi %17 : vector<1x256xf32> to vector<1x256xi32>
    %22 = arith.fptosi %18 : vector<1x256xf32> to vector<1x256xi32>
    %23 = vector.broadcast %6 : vector<16x1xi32> to vector<16x256xi32>
    %24 = vector.broadcast %21 : vector<1x256xi32> to vector<16x256xi32>
    %25 = arith.cmpi eq, %23, %24 : vector<16x256xi32>
    %26 = arith.extui %25 : vector<16x256xi1> to vector<16x256xi32>
    %27 = arith.sitofp %26 : vector<16x256xi32> to vector<16x256xf32>
    %cst_11 = arith.constant 1.000000e+00 : f32
    %28 = vector.broadcast %cst_11 : f32 to vector<1x256xf32>
    %29 = arith.subf %28, %19 : vector<1x256xf32>
    %30 = vector.broadcast %29 : vector<1x256xf32> to vector<16x256xf32>
    %31 = arith.mulf %27, %30 : vector<16x256xf32>
    %c1_i32 = arith.constant 1 : i32
    %32 = vector.broadcast %c1_i32 : i32 to vector<1x256xi32>
    %33 = arith.addi %21, %32 : vector<1x256xi32>
    %34 = vector.broadcast %6 : vector<16x1xi32> to vector<16x256xi32>
    %35 = vector.broadcast %33 : vector<1x256xi32> to vector<16x256xi32>
    %36 = arith.cmpi eq, %34, %35 : vector<16x256xi32>
    %37 = arith.extui %36 : vector<16x256xi1> to vector<16x256xi32>
    %38 = arith.sitofp %37 : vector<16x256xi32> to vector<16x256xf32>
    %39 = vector.broadcast %19 : vector<1x256xf32> to vector<16x256xf32>
    %40 = arith.mulf %38, %39 : vector<16x256xf32>
    %41 = arith.addf %31, %40 : vector<16x256xf32>
    %42 = vector.broadcast %7 : vector<16x1xi32> to vector<16x256xi32>
    %43 = vector.broadcast %22 : vector<1x256xi32> to vector<16x256xi32>
    %44 = arith.cmpi eq, %42, %43 : vector<16x256xi32>
    %45 = arith.extui %44 : vector<16x256xi1> to vector<16x256xi32>
    %46 = arith.sitofp %45 : vector<16x256xi32> to vector<16x256xf32>
    %cst_12 = arith.constant 1.000000e+00 : f32
    %47 = vector.broadcast %cst_12 : f32 to vector<1x256xf32>
    %48 = arith.subf %47, %20 : vector<1x256xf32>
    %49 = vector.broadcast %48 : vector<1x256xf32> to vector<16x256xf32>
    %50 = arith.mulf %46, %49 : vector<16x256xf32>
    %c1_i32_13 = arith.constant 1 : i32
    %51 = vector.broadcast %c1_i32_13 : i32 to vector<1x256xi32>
    %52 = arith.addi %22, %51 : vector<1x256xi32>
    %53 = vector.broadcast %7 : vector<16x1xi32> to vector<16x256xi32>
    %54 = vector.broadcast %52 : vector<1x256xi32> to vector<16x256xi32>
    %55 = arith.cmpi eq, %53, %54 : vector<16x256xi32>
    %56 = arith.extui %55 : vector<16x256xi1> to vector<16x256xi32>
    %57 = arith.sitofp %56 : vector<16x256xi32> to vector<16x256xf32>
    %58 = vector.broadcast %20 : vector<1x256xf32> to vector<16x256xf32>
    %59 = arith.mulf %57, %58 : vector<16x256xf32>
    %60 = arith.addf %50, %59 : vector<16x256xf32>
    %cst_14 = arith.constant dense<0.000000e+00> : vector<64x256xf32>
    %61 = tpu.matmul %1, %60, %cst_14 {dimension_numbers = #tpu.dot_dimension_numbers<[1], [0], [0], [1], [0, 0, 1, 1], [], []>} : vector<64x16xf32>, vector<16x256xf32>, vector<64x256xf32> -> vector<64x256xf32>
    %62 = tpu.concatenate %41, %41, %41, %41 in 0 : vector<16x256xf32>, vector<16x256xf32>, vector<16x256xf32>, vector<16x256xf32> -> vector<64x256xf32>
    %63 = arith.mulf %61, %62 : vector<64x256xf32>
    %c0_15 = arith.constant 0 : index
    %c0_16 = arith.constant 0 : index
    %c0_17 = arith.constant 0 : index
    %64 = vector.load %arg4[%c0_15, %c0_16, %c0_17] : memref<9x4x64xf32, #tpu.memory_space<vmem>>, vector<1x4x64xf32>
    %65 = vector.shape_cast %64 : vector<1x4x64xf32> to vector<4x64xf32>
    %cst_18 = arith.constant dense<0.000000e+00> : vector<4x256xf32>
    %66 = tpu.matmul %65, %63, %cst_18 {dimension_numbers = #tpu.dot_dimension_numbers<[1], [0], [0], [1], [0, 0, 1, 1], [], []>} : vector<4x64xf32>, vector<64x256xf32>, vector<4x256xf32> -> vector<4x256xf32>
    %67 = arith.addf %8, %66 : vector<4x256xf32>
    %cst_19 = arith.constant 0.000000e+00 : f32
    %68 = vector.broadcast %cst_19 : f32 to vector<1x256xf32>
    %69 = arith.addf %4, %68 : vector<1x256xf32>
    %70 = vector.extract_strided_slice %3 {offsets = [2, 0], sizes = [1, 256], strides = [1, 1]} : vector<18x256xf32> to vector<1x256xf32>
    %71 = arith.addf %69, %70 : vector<1x256xf32>
    %cst_20 = arith.constant 1.000000e+00 : f32
    %72 = vector.broadcast %cst_20 : f32 to vector<1x256xf32>
    %73 = arith.addf %5, %72 : vector<1x256xf32>
    %74 = vector.extract_strided_slice %3 {offsets = [3, 0], sizes = [1, 256], strides = [1, 1]} : vector<18x256xf32> to vector<1x256xf32>
    %75 = arith.addf %73, %74 : vector<1x256xf32>
    %76 = math.floor %71 : vector<1x256xf32>
    %77 = math.floor %75 : vector<1x256xf32>
    %78 = arith.subf %71, %76 : vector<1x256xf32>
    %79 = arith.subf %75, %77 : vector<1x256xf32>
    %80 = arith.fptosi %76 : vector<1x256xf32> to vector<1x256xi32>
    %81 = arith.fptosi %77 : vector<1x256xf32> to vector<1x256xi32>
    %82 = vector.broadcast %6 : vector<16x1xi32> to vector<16x256xi32>
    %83 = vector.broadcast %80 : vector<1x256xi32> to vector<16x256xi32>
    %84 = arith.cmpi eq, %82, %83 : vector<16x256xi32>
    %85 = arith.extui %84 : vector<16x256xi1> to vector<16x256xi32>
    %86 = arith.sitofp %85 : vector<16x256xi32> to vector<16x256xf32>
    %cst_21 = arith.constant 1.000000e+00 : f32
    %87 = vector.broadcast %cst_21 : f32 to vector<1x256xf32>
    %88 = arith.subf %87, %78 : vector<1x256xf32>
    %89 = vector.broadcast %88 : vector<1x256xf32> to vector<16x256xf32>
    %90 = arith.mulf %86, %89 : vector<16x256xf32>
    %c1_i32_22 = arith.constant 1 : i32
    %91 = vector.broadcast %c1_i32_22 : i32 to vector<1x256xi32>
    %92 = arith.addi %80, %91 : vector<1x256xi32>
    %93 = vector.broadcast %6 : vector<16x1xi32> to vector<16x256xi32>
    %94 = vector.broadcast %92 : vector<1x256xi32> to vector<16x256xi32>
    %95 = arith.cmpi eq, %93, %94 : vector<16x256xi32>
    %96 = arith.extui %95 : vector<16x256xi1> to vector<16x256xi32>
    %97 = arith.sitofp %96 : vector<16x256xi32> to vector<16x256xf32>
    %98 = vector.broadcast %78 : vector<1x256xf32> to vector<16x256xf32>
    %99 = arith.mulf %97, %98 : vector<16x256xf32>
    %100 = arith.addf %90, %99 : vector<16x256xf32>
    %101 = vector.broadcast %7 : vector<16x1xi32> to vector<16x256xi32>
    %102 = vector.broadcast %81 : vector<1x256xi32> to vector<16x256xi32>
    %103 = arith.cmpi eq, %101, %102 : vector<16x256xi32>
    %104 = arith.extui %103 : vector<16x256xi1> to vector<16x256xi32>
    %105 = arith.sitofp %104 : vector<16x256xi32> to vector<16x256xf32>
    %cst_23 = arith.constant 1.000000e+00 : f32
    %106 = vector.broadcast %cst_23 : f32 to vector<1x256xf32>
    %107 = arith.subf %106, %79 : vector<1x256xf32>
    %108 = vector.broadcast %107 : vector<1x256xf32> to vector<16x256xf32>
    %109 = arith.mulf %105, %108 : vector<16x256xf32>
    %c1_i32_24 = arith.constant 1 : i32
    %110 = vector.broadcast %c1_i32_24 : i32 to vector<1x256xi32>
    %111 = arith.addi %81, %110 : vector<1x256xi32>
    %112 = vector.broadcast %7 : vector<16x1xi32> to vector<16x256xi32>
    %113 = vector.broadcast %111 : vector<1x256xi32> to vector<16x256xi32>
    %114 = arith.cmpi eq, %112, %113 : vector<16x256xi32>
    %115 = arith.extui %114 : vector<16x256xi1> to vector<16x256xi32>
    %116 = arith.sitofp %115 : vector<16x256xi32> to vector<16x256xf32>
    %117 = vector.broadcast %79 : vector<1x256xf32> to vector<16x256xf32>
    %118 = arith.mulf %116, %117 : vector<16x256xf32>
    %119 = arith.addf %109, %118 : vector<16x256xf32>
    %cst_25 = arith.constant dense<0.000000e+00> : vector<64x256xf32>
    %120 = tpu.matmul %1, %119, %cst_25 {dimension_numbers = #tpu.dot_dimension_numbers<[1], [0], [0], [1], [0, 0, 1, 1], [], []>} : vector<64x16xf32>, vector<16x256xf32>, vector<64x256xf32> -> vector<64x256xf32>
    %121 = tpu.concatenate %100, %100, %100, %100 in 0 : vector<16x256xf32>, vector<16x256xf32>, vector<16x256xf32>, vector<16x256xf32> -> vector<64x256xf32>
    %122 = arith.mulf %120, %121 : vector<64x256xf32>
    %c1 = arith.constant 1 : index
    %c0_26 = arith.constant 0 : index
    %c0_27 = arith.constant 0 : index
    %123 = vector.load %arg4[%c1, %c0_26, %c0_27] : memref<9x4x64xf32, #tpu.memory_space<vmem>>, vector<1x4x64xf32>
    %124 = vector.shape_cast %123 : vector<1x4x64xf32> to vector<4x64xf32>
    %cst_28 = arith.constant dense<0.000000e+00> : vector<4x256xf32>
    %125 = tpu.matmul %124, %122, %cst_28 {dimension_numbers = #tpu.dot_dimension_numbers<[1], [0], [0], [1], [0, 0, 1, 1], [], []>} : vector<4x64xf32>, vector<64x256xf32>, vector<4x256xf32> -> vector<4x256xf32>
    %126 = arith.addf %67, %125 : vector<4x256xf32>
    %cst_29 = arith.constant 0.000000e+00 : f32
    %127 = vector.broadcast %cst_29 : f32 to vector<1x256xf32>
    %128 = arith.addf %4, %127 : vector<1x256xf32>
    %129 = vector.extract_strided_slice %3 {offsets = [4, 0], sizes = [1, 256], strides = [1, 1]} : vector<18x256xf32> to vector<1x256xf32>
    %130 = arith.addf %128, %129 : vector<1x256xf32>
    %cst_30 = arith.constant 2.000000e+00 : f32
    %131 = vector.broadcast %cst_30 : f32 to vector<1x256xf32>
    %132 = arith.addf %5, %131 : vector<1x256xf32>
    %133 = vector.extract_strided_slice %3 {offsets = [5, 0], sizes = [1, 256], strides = [1, 1]} : vector<18x256xf32> to vector<1x256xf32>
    %134 = arith.addf %132, %133 : vector<1x256xf32>
    %135 = math.floor %130 : vector<1x256xf32>
    %136 = math.floor %134 : vector<1x256xf32>
    %137 = arith.subf %130, %135 : vector<1x256xf32>
    %138 = arith.subf %134, %136 : vector<1x256xf32>
    %139 = arith.fptosi %135 : vector<1x256xf32> to vector<1x256xi32>
    %140 = arith.fptosi %136 : vector<1x256xf32> to vector<1x256xi32>
    %141 = vector.broadcast %6 : vector<16x1xi32> to vector<16x256xi32>
    %142 = vector.broadcast %139 : vector<1x256xi32> to vector<16x256xi32>
    %143 = arith.cmpi eq, %141, %142 : vector<16x256xi32>
    %144 = arith.extui %143 : vector<16x256xi1> to vector<16x256xi32>
    %145 = arith.sitofp %144 : vector<16x256xi32> to vector<16x256xf32>
    %cst_31 = arith.constant 1.000000e+00 : f32
    %146 = vector.broadcast %cst_31 : f32 to vector<1x256xf32>
    %147 = arith.subf %146, %137 : vector<1x256xf32>
    %148 = vector.broadcast %147 : vector<1x256xf32> to vector<16x256xf32>
    %149 = arith.mulf %145, %148 : vector<16x256xf32>
    %c1_i32_32 = arith.constant 1 : i32
    %150 = vector.broadcast %c1_i32_32 : i32 to vector<1x256xi32>
    %151 = arith.addi %139, %150 : vector<1x256xi32>
    %152 = vector.broadcast %6 : vector<16x1xi32> to vector<16x256xi32>
    %153 = vector.broadcast %151 : vector<1x256xi32> to vector<16x256xi32>
    %154 = arith.cmpi eq, %152, %153 : vector<16x256xi32>
    %155 = arith.extui %154 : vector<16x256xi1> to vector<16x256xi32>
    %156 = arith.sitofp %155 : vector<16x256xi32> to vector<16x256xf32>
    %157 = vector.broadcast %137 : vector<1x256xf32> to vector<16x256xf32>
    %158 = arith.mulf %156, %157 : vector<16x256xf32>
    %159 = arith.addf %149, %158 : vector<16x256xf32>
    %160 = vector.broadcast %7 : vector<16x1xi32> to vector<16x256xi32>
    %161 = vector.broadcast %140 : vector<1x256xi32> to vector<16x256xi32>
    %162 = arith.cmpi eq, %160, %161 : vector<16x256xi32>
    %163 = arith.extui %162 : vector<16x256xi1> to vector<16x256xi32>
    %164 = arith.sitofp %163 : vector<16x256xi32> to vector<16x256xf32>
    %cst_33 = arith.constant 1.000000e+00 : f32
    %165 = vector.broadcast %cst_33 : f32 to vector<1x256xf32>
    %166 = arith.subf %165, %138 : vector<1x256xf32>
    %167 = vector.broadcast %166 : vector<1x256xf32> to vector<16x256xf32>
    %168 = arith.mulf %164, %167 : vector<16x256xf32>
    %c1_i32_34 = arith.constant 1 : i32
    %169 = vector.broadcast %c1_i32_34 : i32 to vector<1x256xi32>
    %170 = arith.addi %140, %169 : vector<1x256xi32>
    %171 = vector.broadcast %7 : vector<16x1xi32> to vector<16x256xi32>
    %172 = vector.broadcast %170 : vector<1x256xi32> to vector<16x256xi32>
    %173 = arith.cmpi eq, %171, %172 : vector<16x256xi32>
    %174 = arith.extui %173 : vector<16x256xi1> to vector<16x256xi32>
    %175 = arith.sitofp %174 : vector<16x256xi32> to vector<16x256xf32>
    %176 = vector.broadcast %138 : vector<1x256xf32> to vector<16x256xf32>
    %177 = arith.mulf %175, %176 : vector<16x256xf32>
    %178 = arith.addf %168, %177 : vector<16x256xf32>
    %cst_35 = arith.constant dense<0.000000e+00> : vector<64x256xf32>
    %179 = tpu.matmul %1, %178, %cst_35 {dimension_numbers = #tpu.dot_dimension_numbers<[1], [0], [0], [1], [0, 0, 1, 1], [], []>} : vector<64x16xf32>, vector<16x256xf32>, vector<64x256xf32> -> vector<64x256xf32>
    %180 = tpu.concatenate %159, %159, %159, %159 in 0 : vector<16x256xf32>, vector<16x256xf32>, vector<16x256xf32>, vector<16x256xf32> -> vector<64x256xf32>
    %181 = arith.mulf %179, %180 : vector<64x256xf32>
    %c2 = arith.constant 2 : index
    %c0_36 = arith.constant 0 : index
    %c0_37 = arith.constant 0 : index
    %182 = vector.load %arg4[%c2, %c0_36, %c0_37] : memref<9x4x64xf32, #tpu.memory_space<vmem>>, vector<1x4x64xf32>
    %183 = vector.shape_cast %182 : vector<1x4x64xf32> to vector<4x64xf32>
    %cst_38 = arith.constant dense<0.000000e+00> : vector<4x256xf32>
    %184 = tpu.matmul %183, %181, %cst_38 {dimension_numbers = #tpu.dot_dimension_numbers<[1], [0], [0], [1], [0, 0, 1, 1], [], []>} : vector<4x64xf32>, vector<64x256xf32>, vector<4x256xf32> -> vector<4x256xf32>
    %185 = arith.addf %126, %184 : vector<4x256xf32>
    %cst_39 = arith.constant 1.000000e+00 : f32
    %186 = vector.broadcast %cst_39 : f32 to vector<1x256xf32>
    %187 = arith.addf %4, %186 : vector<1x256xf32>
    %188 = vector.extract_strided_slice %3 {offsets = [6, 0], sizes = [1, 256], strides = [1, 1]} : vector<18x256xf32> to vector<1x256xf32>
    %189 = arith.addf %187, %188 : vector<1x256xf32>
    %cst_40 = arith.constant 0.000000e+00 : f32
    %190 = vector.broadcast %cst_40 : f32 to vector<1x256xf32>
    %191 = arith.addf %5, %190 : vector<1x256xf32>
    %192 = vector.extract_strided_slice %3 {offsets = [7, 0], sizes = [1, 256], strides = [1, 1]} : vector<18x256xf32> to vector<1x256xf32>
    %193 = arith.addf %191, %192 : vector<1x256xf32>
    %194 = math.floor %189 : vector<1x256xf32>
    %195 = math.floor %193 : vector<1x256xf32>
    %196 = arith.subf %189, %194 : vector<1x256xf32>
    %197 = arith.subf %193, %195 : vector<1x256xf32>
    %198 = arith.fptosi %194 : vector<1x256xf32> to vector<1x256xi32>
    %199 = arith.fptosi %195 : vector<1x256xf32> to vector<1x256xi32>
    %200 = vector.broadcast %6 : vector<16x1xi32> to vector<16x256xi32>
    %201 = vector.broadcast %198 : vector<1x256xi32> to vector<16x256xi32>
    %202 = arith.cmpi eq, %200, %201 : vector<16x256xi32>
    %203 = arith.extui %202 : vector<16x256xi1> to vector<16x256xi32>
    %204 = arith.sitofp %203 : vector<16x256xi32> to vector<16x256xf32>
    %cst_41 = arith.constant 1.000000e+00 : f32
    %205 = vector.broadcast %cst_41 : f32 to vector<1x256xf32>
    %206 = arith.subf %205, %196 : vector<1x256xf32>
    %207 = vector.broadcast %206 : vector<1x256xf32> to vector<16x256xf32>
    %208 = arith.mulf %204, %207 : vector<16x256xf32>
    %c1_i32_42 = arith.constant 1 : i32
    %209 = vector.broadcast %c1_i32_42 : i32 to vector<1x256xi32>
    %210 = arith.addi %198, %209 : vector<1x256xi32>
    %211 = vector.broadcast %6 : vector<16x1xi32> to vector<16x256xi32>
    %212 = vector.broadcast %210 : vector<1x256xi32> to vector<16x256xi32>
    %213 = arith.cmpi eq, %211, %212 : vector<16x256xi32>
    %214 = arith.extui %213 : vector<16x256xi1> to vector<16x256xi32>
    %215 = arith.sitofp %214 : vector<16x256xi32> to vector<16x256xf32>
    %216 = vector.broadcast %196 : vector<1x256xf32> to vector<16x256xf32>
    %217 = arith.mulf %215, %216 : vector<16x256xf32>
    %218 = arith.addf %208, %217 : vector<16x256xf32>
    %219 = vector.broadcast %7 : vector<16x1xi32> to vector<16x256xi32>
    %220 = vector.broadcast %199 : vector<1x256xi32> to vector<16x256xi32>
    %221 = arith.cmpi eq, %219, %220 : vector<16x256xi32>
    %222 = arith.extui %221 : vector<16x256xi1> to vector<16x256xi32>
    %223 = arith.sitofp %222 : vector<16x256xi32> to vector<16x256xf32>
    %cst_43 = arith.constant 1.000000e+00 : f32
    %224 = vector.broadcast %cst_43 : f32 to vector<1x256xf32>
    %225 = arith.subf %224, %197 : vector<1x256xf32>
    %226 = vector.broadcast %225 : vector<1x256xf32> to vector<16x256xf32>
    %227 = arith.mulf %223, %226 : vector<16x256xf32>
    %c1_i32_44 = arith.constant 1 : i32
    %228 = vector.broadcast %c1_i32_44 : i32 to vector<1x256xi32>
    %229 = arith.addi %199, %228 : vector<1x256xi32>
    %230 = vector.broadcast %7 : vector<16x1xi32> to vector<16x256xi32>
    %231 = vector.broadcast %229 : vector<1x256xi32> to vector<16x256xi32>
    %232 = arith.cmpi eq, %230, %231 : vector<16x256xi32>
    %233 = arith.extui %232 : vector<16x256xi1> to vector<16x256xi32>
    %234 = arith.sitofp %233 : vector<16x256xi32> to vector<16x256xf32>
    %235 = vector.broadcast %197 : vector<1x256xf32> to vector<16x256xf32>
    %236 = arith.mulf %234, %235 : vector<16x256xf32>
    %237 = arith.addf %227, %236 : vector<16x256xf32>
    %cst_45 = arith.constant dense<0.000000e+00> : vector<64x256xf32>
    %238 = tpu.matmul %1, %237, %cst_45 {dimension_numbers = #tpu.dot_dimension_numbers<[1], [0], [0], [1], [0, 0, 1, 1], [], []>} : vector<64x16xf32>, vector<16x256xf32>, vector<64x256xf32> -> vector<64x256xf32>
    %239 = tpu.concatenate %218, %218, %218, %218 in 0 : vector<16x256xf32>, vector<16x256xf32>, vector<16x256xf32>, vector<16x256xf32> -> vector<64x256xf32>
    %240 = arith.mulf %238, %239 : vector<64x256xf32>
    %c3 = arith.constant 3 : index
    %c0_46 = arith.constant 0 : index
    %c0_47 = arith.constant 0 : index
    %241 = vector.load %arg4[%c3, %c0_46, %c0_47] : memref<9x4x64xf32, #tpu.memory_space<vmem>>, vector<1x4x64xf32>
    %242 = vector.shape_cast %241 : vector<1x4x64xf32> to vector<4x64xf32>
    %cst_48 = arith.constant dense<0.000000e+00> : vector<4x256xf32>
    %243 = tpu.matmul %242, %240, %cst_48 {dimension_numbers = #tpu.dot_dimension_numbers<[1], [0], [0], [1], [0, 0, 1, 1], [], []>} : vector<4x64xf32>, vector<64x256xf32>, vector<4x256xf32> -> vector<4x256xf32>
    %244 = arith.addf %185, %243 : vector<4x256xf32>
    %cst_49 = arith.constant 1.000000e+00 : f32
    %245 = vector.broadcast %cst_49 : f32 to vector<1x256xf32>
    %246 = arith.addf %4, %245 : vector<1x256xf32>
    %247 = vector.extract_strided_slice %3 {offsets = [8, 0], sizes = [1, 256], strides = [1, 1]} : vector<18x256xf32> to vector<1x256xf32>
    %248 = arith.addf %246, %247 : vector<1x256xf32>
    %cst_50 = arith.constant 1.000000e+00 : f32
    %249 = vector.broadcast %cst_50 : f32 to vector<1x256xf32>
    %250 = arith.addf %5, %249 : vector<1x256xf32>
    %251 = vector.extract_strided_slice %3 {offsets = [9, 0], sizes = [1, 256], strides = [1, 1]} : vector<18x256xf32> to vector<1x256xf32>
    %252 = arith.addf %250, %251 : vector<1x256xf32>
    %253 = math.floor %248 : vector<1x256xf32>
    %254 = math.floor %252 : vector<1x256xf32>
    %255 = arith.subf %248, %253 : vector<1x256xf32>
    %256 = arith.subf %252, %254 : vector<1x256xf32>
    %257 = arith.fptosi %253 : vector<1x256xf32> to vector<1x256xi32>
    %258 = arith.fptosi %254 : vector<1x256xf32> to vector<1x256xi32>
    %259 = vector.broadcast %6 : vector<16x1xi32> to vector<16x256xi32>
    %260 = vector.broadcast %257 : vector<1x256xi32> to vector<16x256xi32>
    %261 = arith.cmpi eq, %259, %260 : vector<16x256xi32>
    %262 = arith.extui %261 : vector<16x256xi1> to vector<16x256xi32>
    %263 = arith.sitofp %262 : vector<16x256xi32> to vector<16x256xf32>
    %cst_51 = arith.constant 1.000000e+00 : f32
    %264 = vector.broadcast %cst_51 : f32 to vector<1x256xf32>
    %265 = arith.subf %264, %255 : vector<1x256xf32>
    %266 = vector.broadcast %265 : vector<1x256xf32> to vector<16x256xf32>
    %267 = arith.mulf %263, %266 : vector<16x256xf32>
    %c1_i32_52 = arith.constant 1 : i32
    %268 = vector.broadcast %c1_i32_52 : i32 to vector<1x256xi32>
    %269 = arith.addi %257, %268 : vector<1x256xi32>
    %270 = vector.broadcast %6 : vector<16x1xi32> to vector<16x256xi32>
    %271 = vector.broadcast %269 : vector<1x256xi32> to vector<16x256xi32>
    %272 = arith.cmpi eq, %270, %271 : vector<16x256xi32>
    %273 = arith.extui %272 : vector<16x256xi1> to vector<16x256xi32>
    %274 = arith.sitofp %273 : vector<16x256xi32> to vector<16x256xf32>
    %275 = vector.broadcast %255 : vector<1x256xf32> to vector<16x256xf32>
    %276 = arith.mulf %274, %275 : vector<16x256xf32>
    %277 = arith.addf %267, %276 : vector<16x256xf32>
    %278 = vector.broadcast %7 : vector<16x1xi32> to vector<16x256xi32>
    %279 = vector.broadcast %258 : vector<1x256xi32> to vector<16x256xi32>
    %280 = arith.cmpi eq, %278, %279 : vector<16x256xi32>
    %281 = arith.extui %280 : vector<16x256xi1> to vector<16x256xi32>
    %282 = arith.sitofp %281 : vector<16x256xi32> to vector<16x256xf32>
    %cst_53 = arith.constant 1.000000e+00 : f32
    %283 = vector.broadcast %cst_53 : f32 to vector<1x256xf32>
    %284 = arith.subf %283, %256 : vector<1x256xf32>
    %285 = vector.broadcast %284 : vector<1x256xf32> to vector<16x256xf32>
    %286 = arith.mulf %282, %285 : vector<16x256xf32>
    %c1_i32_54 = arith.constant 1 : i32
    %287 = vector.broadcast %c1_i32_54 : i32 to vector<1x256xi32>
    %288 = arith.addi %258, %287 : vector<1x256xi32>
    %289 = vector.broadcast %7 : vector<16x1xi32> to vector<16x256xi32>
    %290 = vector.broadcast %288 : vector<1x256xi32> to vector<16x256xi32>
    %291 = arith.cmpi eq, %289, %290 : vector<16x256xi32>
    %292 = arith.extui %291 : vector<16x256xi1> to vector<16x256xi32>
    %293 = arith.sitofp %292 : vector<16x256xi32> to vector<16x256xf32>
    %294 = vector.broadcast %256 : vector<1x256xf32> to vector<16x256xf32>
    %295 = arith.mulf %293, %294 : vector<16x256xf32>
    %296 = arith.addf %286, %295 : vector<16x256xf32>
    %cst_55 = arith.constant dense<0.000000e+00> : vector<64x256xf32>
    %297 = tpu.matmul %1, %296, %cst_55 {dimension_numbers = #tpu.dot_dimension_numbers<[1], [0], [0], [1], [0, 0, 1, 1], [], []>} : vector<64x16xf32>, vector<16x256xf32>, vector<64x256xf32> -> vector<64x256xf32>
    %298 = tpu.concatenate %277, %277, %277, %277 in 0 : vector<16x256xf32>, vector<16x256xf32>, vector<16x256xf32>, vector<16x256xf32> -> vector<64x256xf32>
    %299 = arith.mulf %297, %298 : vector<64x256xf32>
    %c4 = arith.constant 4 : index
    %c0_56 = arith.constant 0 : index
    %c0_57 = arith.constant 0 : index
    %300 = vector.load %arg4[%c4, %c0_56, %c0_57] : memref<9x4x64xf32, #tpu.memory_space<vmem>>, vector<1x4x64xf32>
    %301 = vector.shape_cast %300 : vector<1x4x64xf32> to vector<4x64xf32>
    %cst_58 = arith.constant dense<0.000000e+00> : vector<4x256xf32>
    %302 = tpu.matmul %301, %299, %cst_58 {dimension_numbers = #tpu.dot_dimension_numbers<[1], [0], [0], [1], [0, 0, 1, 1], [], []>} : vector<4x64xf32>, vector<64x256xf32>, vector<4x256xf32> -> vector<4x256xf32>
    %303 = arith.addf %244, %302 : vector<4x256xf32>
    %cst_59 = arith.constant 1.000000e+00 : f32
    %304 = vector.broadcast %cst_59 : f32 to vector<1x256xf32>
    %305 = arith.addf %4, %304 : vector<1x256xf32>
    %306 = vector.extract_strided_slice %3 {offsets = [10, 0], sizes = [1, 256], strides = [1, 1]} : vector<18x256xf32> to vector<1x256xf32>
    %307 = arith.addf %305, %306 : vector<1x256xf32>
    %cst_60 = arith.constant 2.000000e+00 : f32
    %308 = vector.broadcast %cst_60 : f32 to vector<1x256xf32>
    %309 = arith.addf %5, %308 : vector<1x256xf32>
    %310 = vector.extract_strided_slice %3 {offsets = [11, 0], sizes = [1, 256], strides = [1, 1]} : vector<18x256xf32> to vector<1x256xf32>
    %311 = arith.addf %309, %310 : vector<1x256xf32>
    %312 = math.floor %307 : vector<1x256xf32>
    %313 = math.floor %311 : vector<1x256xf32>
    %314 = arith.subf %307, %312 : vector<1x256xf32>
    %315 = arith.subf %311, %313 : vector<1x256xf32>
    %316 = arith.fptosi %312 : vector<1x256xf32> to vector<1x256xi32>
    %317 = arith.fptosi %313 : vector<1x256xf32> to vector<1x256xi32>
    %318 = vector.broadcast %6 : vector<16x1xi32> to vector<16x256xi32>
    %319 = vector.broadcast %316 : vector<1x256xi32> to vector<16x256xi32>
    %320 = arith.cmpi eq, %318, %319 : vector<16x256xi32>
    %321 = arith.extui %320 : vector<16x256xi1> to vector<16x256xi32>
    %322 = arith.sitofp %321 : vector<16x256xi32> to vector<16x256xf32>
    %cst_61 = arith.constant 1.000000e+00 : f32
    %323 = vector.broadcast %cst_61 : f32 to vector<1x256xf32>
    %324 = arith.subf %323, %314 : vector<1x256xf32>
    %325 = vector.broadcast %324 : vector<1x256xf32> to vector<16x256xf32>
    %326 = arith.mulf %322, %325 : vector<16x256xf32>
    %c1_i32_62 = arith.constant 1 : i32
    %327 = vector.broadcast %c1_i32_62 : i32 to vector<1x256xi32>
    %328 = arith.addi %316, %327 : vector<1x256xi32>
    %329 = vector.broadcast %6 : vector<16x1xi32> to vector<16x256xi32>
    %330 = vector.broadcast %328 : vector<1x256xi32> to vector<16x256xi32>
    %331 = arith.cmpi eq, %329, %330 : vector<16x256xi32>
    %332 = arith.extui %331 : vector<16x256xi1> to vector<16x256xi32>
    %333 = arith.sitofp %332 : vector<16x256xi32> to vector<16x256xf32>
    %334 = vector.broadcast %314 : vector<1x256xf32> to vector<16x256xf32>
    %335 = arith.mulf %333, %334 : vector<16x256xf32>
    %336 = arith.addf %326, %335 : vector<16x256xf32>
    %337 = vector.broadcast %7 : vector<16x1xi32> to vector<16x256xi32>
    %338 = vector.broadcast %317 : vector<1x256xi32> to vector<16x256xi32>
    %339 = arith.cmpi eq, %337, %338 : vector<16x256xi32>
    %340 = arith.extui %339 : vector<16x256xi1> to vector<16x256xi32>
    %341 = arith.sitofp %340 : vector<16x256xi32> to vector<16x256xf32>
    %cst_63 = arith.constant 1.000000e+00 : f32
    %342 = vector.broadcast %cst_63 : f32 to vector<1x256xf32>
    %343 = arith.subf %342, %315 : vector<1x256xf32>
    %344 = vector.broadcast %343 : vector<1x256xf32> to vector<16x256xf32>
    %345 = arith.mulf %341, %344 : vector<16x256xf32>
    %c1_i32_64 = arith.constant 1 : i32
    %346 = vector.broadcast %c1_i32_64 : i32 to vector<1x256xi32>
    %347 = arith.addi %317, %346 : vector<1x256xi32>
    %348 = vector.broadcast %7 : vector<16x1xi32> to vector<16x256xi32>
    %349 = vector.broadcast %347 : vector<1x256xi32> to vector<16x256xi32>
    %350 = arith.cmpi eq, %348, %349 : vector<16x256xi32>
    %351 = arith.extui %350 : vector<16x256xi1> to vector<16x256xi32>
    %352 = arith.sitofp %351 : vector<16x256xi32> to vector<16x256xf32>
    %353 = vector.broadcast %315 : vector<1x256xf32> to vector<16x256xf32>
    %354 = arith.mulf %352, %353 : vector<16x256xf32>
    %355 = arith.addf %345, %354 : vector<16x256xf32>
    %cst_65 = arith.constant dense<0.000000e+00> : vector<64x256xf32>
    %356 = tpu.matmul %1, %355, %cst_65 {dimension_numbers = #tpu.dot_dimension_numbers<[1], [0], [0], [1], [0, 0, 1, 1], [], []>} : vector<64x16xf32>, vector<16x256xf32>, vector<64x256xf32> -> vector<64x256xf32>
    %357 = tpu.concatenate %336, %336, %336, %336 in 0 : vector<16x256xf32>, vector<16x256xf32>, vector<16x256xf32>, vector<16x256xf32> -> vector<64x256xf32>
    %358 = arith.mulf %356, %357 : vector<64x256xf32>
    %c5 = arith.constant 5 : index
    %c0_66 = arith.constant 0 : index
    %c0_67 = arith.constant 0 : index
    %359 = vector.load %arg4[%c5, %c0_66, %c0_67] : memref<9x4x64xf32, #tpu.memory_space<vmem>>, vector<1x4x64xf32>
    %360 = vector.shape_cast %359 : vector<1x4x64xf32> to vector<4x64xf32>
    %cst_68 = arith.constant dense<0.000000e+00> : vector<4x256xf32>
    %361 = tpu.matmul %360, %358, %cst_68 {dimension_numbers = #tpu.dot_dimension_numbers<[1], [0], [0], [1], [0, 0, 1, 1], [], []>} : vector<4x64xf32>, vector<64x256xf32>, vector<4x256xf32> -> vector<4x256xf32>
    %362 = arith.addf %303, %361 : vector<4x256xf32>
    %cst_69 = arith.constant 2.000000e+00 : f32
    %363 = vector.broadcast %cst_69 : f32 to vector<1x256xf32>
    %364 = arith.addf %4, %363 : vector<1x256xf32>
    %365 = vector.extract_strided_slice %3 {offsets = [12, 0], sizes = [1, 256], strides = [1, 1]} : vector<18x256xf32> to vector<1x256xf32>
    %366 = arith.addf %364, %365 : vector<1x256xf32>
    %cst_70 = arith.constant 0.000000e+00 : f32
    %367 = vector.broadcast %cst_70 : f32 to vector<1x256xf32>
    %368 = arith.addf %5, %367 : vector<1x256xf32>
    %369 = vector.extract_strided_slice %3 {offsets = [13, 0], sizes = [1, 256], strides = [1, 1]} : vector<18x256xf32> to vector<1x256xf32>
    %370 = arith.addf %368, %369 : vector<1x256xf32>
    %371 = math.floor %366 : vector<1x256xf32>
    %372 = math.floor %370 : vector<1x256xf32>
    %373 = arith.subf %366, %371 : vector<1x256xf32>
    %374 = arith.subf %370, %372 : vector<1x256xf32>
    %375 = arith.fptosi %371 : vector<1x256xf32> to vector<1x256xi32>
    %376 = arith.fptosi %372 : vector<1x256xf32> to vector<1x256xi32>
    %377 = vector.broadcast %6 : vector<16x1xi32> to vector<16x256xi32>
    %378 = vector.broadcast %375 : vector<1x256xi32> to vector<16x256xi32>
    %379 = arith.cmpi eq, %377, %378 : vector<16x256xi32>
    %380 = arith.extui %379 : vector<16x256xi1> to vector<16x256xi32>
    %381 = arith.sitofp %380 : vector<16x256xi32> to vector<16x256xf32>
    %cst_71 = arith.constant 1.000000e+00 : f32
    %382 = vector.broadcast %cst_71 : f32 to vector<1x256xf32>
    %383 = arith.subf %382, %373 : vector<1x256xf32>
    %384 = vector.broadcast %383 : vector<1x256xf32> to vector<16x256xf32>
    %385 = arith.mulf %381, %384 : vector<16x256xf32>
    %c1_i32_72 = arith.constant 1 : i32
    %386 = vector.broadcast %c1_i32_72 : i32 to vector<1x256xi32>
    %387 = arith.addi %375, %386 : vector<1x256xi32>
    %388 = vector.broadcast %6 : vector<16x1xi32> to vector<16x256xi32>
    %389 = vector.broadcast %387 : vector<1x256xi32> to vector<16x256xi32>
    %390 = arith.cmpi eq, %388, %389 : vector<16x256xi32>
    %391 = arith.extui %390 : vector<16x256xi1> to vector<16x256xi32>
    %392 = arith.sitofp %391 : vector<16x256xi32> to vector<16x256xf32>
    %393 = vector.broadcast %373 : vector<1x256xf32> to vector<16x256xf32>
    %394 = arith.mulf %392, %393 : vector<16x256xf32>
    %395 = arith.addf %385, %394 : vector<16x256xf32>
    %396 = vector.broadcast %7 : vector<16x1xi32> to vector<16x256xi32>
    %397 = vector.broadcast %376 : vector<1x256xi32> to vector<16x256xi32>
    %398 = arith.cmpi eq, %396, %397 : vector<16x256xi32>
    %399 = arith.extui %398 : vector<16x256xi1> to vector<16x256xi32>
    %400 = arith.sitofp %399 : vector<16x256xi32> to vector<16x256xf32>
    %cst_73 = arith.constant 1.000000e+00 : f32
    %401 = vector.broadcast %cst_73 : f32 to vector<1x256xf32>
    %402 = arith.subf %401, %374 : vector<1x256xf32>
    %403 = vector.broadcast %402 : vector<1x256xf32> to vector<16x256xf32>
    %404 = arith.mulf %400, %403 : vector<16x256xf32>
    %c1_i32_74 = arith.constant 1 : i32
    %405 = vector.broadcast %c1_i32_74 : i32 to vector<1x256xi32>
    %406 = arith.addi %376, %405 : vector<1x256xi32>
    %407 = vector.broadcast %7 : vector<16x1xi32> to vector<16x256xi32>
    %408 = vector.broadcast %406 : vector<1x256xi32> to vector<16x256xi32>
    %409 = arith.cmpi eq, %407, %408 : vector<16x256xi32>
    %410 = arith.extui %409 : vector<16x256xi1> to vector<16x256xi32>
    %411 = arith.sitofp %410 : vector<16x256xi32> to vector<16x256xf32>
    %412 = vector.broadcast %374 : vector<1x256xf32> to vector<16x256xf32>
    %413 = arith.mulf %411, %412 : vector<16x256xf32>
    %414 = arith.addf %404, %413 : vector<16x256xf32>
    %cst_75 = arith.constant dense<0.000000e+00> : vector<64x256xf32>
    %415 = tpu.matmul %1, %414, %cst_75 {dimension_numbers = #tpu.dot_dimension_numbers<[1], [0], [0], [1], [0, 0, 1, 1], [], []>} : vector<64x16xf32>, vector<16x256xf32>, vector<64x256xf32> -> vector<64x256xf32>
    %416 = tpu.concatenate %395, %395, %395, %395 in 0 : vector<16x256xf32>, vector<16x256xf32>, vector<16x256xf32>, vector<16x256xf32> -> vector<64x256xf32>
    %417 = arith.mulf %415, %416 : vector<64x256xf32>
    %c6 = arith.constant 6 : index
    %c0_76 = arith.constant 0 : index
    %c0_77 = arith.constant 0 : index
    %418 = vector.load %arg4[%c6, %c0_76, %c0_77] : memref<9x4x64xf32, #tpu.memory_space<vmem>>, vector<1x4x64xf32>
    %419 = vector.shape_cast %418 : vector<1x4x64xf32> to vector<4x64xf32>
    %cst_78 = arith.constant dense<0.000000e+00> : vector<4x256xf32>
    %420 = tpu.matmul %419, %417, %cst_78 {dimension_numbers = #tpu.dot_dimension_numbers<[1], [0], [0], [1], [0, 0, 1, 1], [], []>} : vector<4x64xf32>, vector<64x256xf32>, vector<4x256xf32> -> vector<4x256xf32>
    %421 = arith.addf %362, %420 : vector<4x256xf32>
    %cst_79 = arith.constant 2.000000e+00 : f32
    %422 = vector.broadcast %cst_79 : f32 to vector<1x256xf32>
    %423 = arith.addf %4, %422 : vector<1x256xf32>
    %424 = vector.extract_strided_slice %3 {offsets = [14, 0], sizes = [1, 256], strides = [1, 1]} : vector<18x256xf32> to vector<1x256xf32>
    %425 = arith.addf %423, %424 : vector<1x256xf32>
    %cst_80 = arith.constant 1.000000e+00 : f32
    %426 = vector.broadcast %cst_80 : f32 to vector<1x256xf32>
    %427 = arith.addf %5, %426 : vector<1x256xf32>
    %428 = vector.extract_strided_slice %3 {offsets = [15, 0], sizes = [1, 256], strides = [1, 1]} : vector<18x256xf32> to vector<1x256xf32>
    %429 = arith.addf %427, %428 : vector<1x256xf32>
    %430 = math.floor %425 : vector<1x256xf32>
    %431 = math.floor %429 : vector<1x256xf32>
    %432 = arith.subf %425, %430 : vector<1x256xf32>
    %433 = arith.subf %429, %431 : vector<1x256xf32>
    %434 = arith.fptosi %430 : vector<1x256xf32> to vector<1x256xi32>
    %435 = arith.fptosi %431 : vector<1x256xf32> to vector<1x256xi32>
    %436 = vector.broadcast %6 : vector<16x1xi32> to vector<16x256xi32>
    %437 = vector.broadcast %434 : vector<1x256xi32> to vector<16x256xi32>
    %438 = arith.cmpi eq, %436, %437 : vector<16x256xi32>
    %439 = arith.extui %438 : vector<16x256xi1> to vector<16x256xi32>
    %440 = arith.sitofp %439 : vector<16x256xi32> to vector<16x256xf32>
    %cst_81 = arith.constant 1.000000e+00 : f32
    %441 = vector.broadcast %cst_81 : f32 to vector<1x256xf32>
    %442 = arith.subf %441, %432 : vector<1x256xf32>
    %443 = vector.broadcast %442 : vector<1x256xf32> to vector<16x256xf32>
    %444 = arith.mulf %440, %443 : vector<16x256xf32>
    %c1_i32_82 = arith.constant 1 : i32
    %445 = vector.broadcast %c1_i32_82 : i32 to vector<1x256xi32>
    %446 = arith.addi %434, %445 : vector<1x256xi32>
    %447 = vector.broadcast %6 : vector<16x1xi32> to vector<16x256xi32>
    %448 = vector.broadcast %446 : vector<1x256xi32> to vector<16x256xi32>
    %449 = arith.cmpi eq, %447, %448 : vector<16x256xi32>
    %450 = arith.extui %449 : vector<16x256xi1> to vector<16x256xi32>
    %451 = arith.sitofp %450 : vector<16x256xi32> to vector<16x256xf32>
    %452 = vector.broadcast %432 : vector<1x256xf32> to vector<16x256xf32>
    %453 = arith.mulf %451, %452 : vector<16x256xf32>
    %454 = arith.addf %444, %453 : vector<16x256xf32>
    %455 = vector.broadcast %7 : vector<16x1xi32> to vector<16x256xi32>
    %456 = vector.broadcast %435 : vector<1x256xi32> to vector<16x256xi32>
    %457 = arith.cmpi eq, %455, %456 : vector<16x256xi32>
    %458 = arith.extui %457 : vector<16x256xi1> to vector<16x256xi32>
    %459 = arith.sitofp %458 : vector<16x256xi32> to vector<16x256xf32>
    %cst_83 = arith.constant 1.000000e+00 : f32
    %460 = vector.broadcast %cst_83 : f32 to vector<1x256xf32>
    %461 = arith.subf %460, %433 : vector<1x256xf32>
    %462 = vector.broadcast %461 : vector<1x256xf32> to vector<16x256xf32>
    %463 = arith.mulf %459, %462 : vector<16x256xf32>
    %c1_i32_84 = arith.constant 1 : i32
    %464 = vector.broadcast %c1_i32_84 : i32 to vector<1x256xi32>
    %465 = arith.addi %435, %464 : vector<1x256xi32>
    %466 = vector.broadcast %7 : vector<16x1xi32> to vector<16x256xi32>
    %467 = vector.broadcast %465 : vector<1x256xi32> to vector<16x256xi32>
    %468 = arith.cmpi eq, %466, %467 : vector<16x256xi32>
    %469 = arith.extui %468 : vector<16x256xi1> to vector<16x256xi32>
    %470 = arith.sitofp %469 : vector<16x256xi32> to vector<16x256xf32>
    %471 = vector.broadcast %433 : vector<1x256xf32> to vector<16x256xf32>
    %472 = arith.mulf %470, %471 : vector<16x256xf32>
    %473 = arith.addf %463, %472 : vector<16x256xf32>
    %cst_85 = arith.constant dense<0.000000e+00> : vector<64x256xf32>
    %474 = tpu.matmul %1, %473, %cst_85 {dimension_numbers = #tpu.dot_dimension_numbers<[1], [0], [0], [1], [0, 0, 1, 1], [], []>} : vector<64x16xf32>, vector<16x256xf32>, vector<64x256xf32> -> vector<64x256xf32>
    %475 = tpu.concatenate %454, %454, %454, %454 in 0 : vector<16x256xf32>, vector<16x256xf32>, vector<16x256xf32>, vector<16x256xf32> -> vector<64x256xf32>
    %476 = arith.mulf %474, %475 : vector<64x256xf32>
    %c7 = arith.constant 7 : index
    %c0_86 = arith.constant 0 : index
    %c0_87 = arith.constant 0 : index
    %477 = vector.load %arg4[%c7, %c0_86, %c0_87] : memref<9x4x64xf32, #tpu.memory_space<vmem>>, vector<1x4x64xf32>
    %478 = vector.shape_cast %477 : vector<1x4x64xf32> to vector<4x64xf32>
    %cst_88 = arith.constant dense<0.000000e+00> : vector<4x256xf32>
    %479 = tpu.matmul %478, %476, %cst_88 {dimension_numbers = #tpu.dot_dimension_numbers<[1], [0], [0], [1], [0, 0, 1, 1], [], []>} : vector<4x64xf32>, vector<64x256xf32>, vector<4x256xf32> -> vector<4x256xf32>
    %480 = arith.addf %421, %479 : vector<4x256xf32>
    %cst_89 = arith.constant 2.000000e+00 : f32
    %481 = vector.broadcast %cst_89 : f32 to vector<1x256xf32>
    %482 = arith.addf %4, %481 : vector<1x256xf32>
    %483 = vector.extract_strided_slice %3 {offsets = [16, 0], sizes = [1, 256], strides = [1, 1]} : vector<18x256xf32> to vector<1x256xf32>
    %484 = arith.addf %482, %483 : vector<1x256xf32>
    %cst_90 = arith.constant 2.000000e+00 : f32
    %485 = vector.broadcast %cst_90 : f32 to vector<1x256xf32>
    %486 = arith.addf %5, %485 : vector<1x256xf32>
    %487 = vector.extract_strided_slice %3 {offsets = [17, 0], sizes = [1, 256], strides = [1, 1]} : vector<18x256xf32> to vector<1x256xf32>
    %488 = arith.addf %486, %487 : vector<1x256xf32>
    %489 = math.floor %484 : vector<1x256xf32>
    %490 = math.floor %488 : vector<1x256xf32>
    %491 = arith.subf %484, %489 : vector<1x256xf32>
    %492 = arith.subf %488, %490 : vector<1x256xf32>
    %493 = arith.fptosi %489 : vector<1x256xf32> to vector<1x256xi32>
    %494 = arith.fptosi %490 : vector<1x256xf32> to vector<1x256xi32>
    %495 = vector.broadcast %6 : vector<16x1xi32> to vector<16x256xi32>
    %496 = vector.broadcast %493 : vector<1x256xi32> to vector<16x256xi32>
    %497 = arith.cmpi eq, %495, %496 : vector<16x256xi32>
    %498 = arith.extui %497 : vector<16x256xi1> to vector<16x256xi32>
    %499 = arith.sitofp %498 : vector<16x256xi32> to vector<16x256xf32>
    %cst_91 = arith.constant 1.000000e+00 : f32
    %500 = vector.broadcast %cst_91 : f32 to vector<1x256xf32>
    %501 = arith.subf %500, %491 : vector<1x256xf32>
    %502 = vector.broadcast %501 : vector<1x256xf32> to vector<16x256xf32>
    %503 = arith.mulf %499, %502 : vector<16x256xf32>
    %c1_i32_92 = arith.constant 1 : i32
    %504 = vector.broadcast %c1_i32_92 : i32 to vector<1x256xi32>
    %505 = arith.addi %493, %504 : vector<1x256xi32>
    %506 = vector.broadcast %6 : vector<16x1xi32> to vector<16x256xi32>
    %507 = vector.broadcast %505 : vector<1x256xi32> to vector<16x256xi32>
    %508 = arith.cmpi eq, %506, %507 : vector<16x256xi32>
    %509 = arith.extui %508 : vector<16x256xi1> to vector<16x256xi32>
    %510 = arith.sitofp %509 : vector<16x256xi32> to vector<16x256xf32>
    %511 = vector.broadcast %491 : vector<1x256xf32> to vector<16x256xf32>
    %512 = arith.mulf %510, %511 : vector<16x256xf32>
    %513 = arith.addf %503, %512 : vector<16x256xf32>
    %514 = vector.broadcast %7 : vector<16x1xi32> to vector<16x256xi32>
    %515 = vector.broadcast %494 : vector<1x256xi32> to vector<16x256xi32>
    %516 = arith.cmpi eq, %514, %515 : vector<16x256xi32>
    %517 = arith.extui %516 : vector<16x256xi1> to vector<16x256xi32>
    %518 = arith.sitofp %517 : vector<16x256xi32> to vector<16x256xf32>
    %cst_93 = arith.constant 1.000000e+00 : f32
    %519 = vector.broadcast %cst_93 : f32 to vector<1x256xf32>
    %520 = arith.subf %519, %492 : vector<1x256xf32>
    %521 = vector.broadcast %520 : vector<1x256xf32> to vector<16x256xf32>
    %522 = arith.mulf %518, %521 : vector<16x256xf32>
    %c1_i32_94 = arith.constant 1 : i32
    %523 = vector.broadcast %c1_i32_94 : i32 to vector<1x256xi32>
    %524 = arith.addi %494, %523 : vector<1x256xi32>
    %525 = vector.broadcast %7 : vector<16x1xi32> to vector<16x256xi32>
    %526 = vector.broadcast %524 : vector<1x256xi32> to vector<16x256xi32>
    %527 = arith.cmpi eq, %525, %526 : vector<16x256xi32>
    %528 = arith.extui %527 : vector<16x256xi1> to vector<16x256xi32>
    %529 = arith.sitofp %528 : vector<16x256xi32> to vector<16x256xf32>
    %530 = vector.broadcast %492 : vector<1x256xf32> to vector<16x256xf32>
    %531 = arith.mulf %529, %530 : vector<16x256xf32>
    %532 = arith.addf %522, %531 : vector<16x256xf32>
    %cst_95 = arith.constant dense<0.000000e+00> : vector<64x256xf32>
    %533 = tpu.matmul %1, %532, %cst_95 {dimension_numbers = #tpu.dot_dimension_numbers<[1], [0], [0], [1], [0, 0, 1, 1], [], []>} : vector<64x16xf32>, vector<16x256xf32>, vector<64x256xf32> -> vector<64x256xf32>
    %534 = tpu.concatenate %513, %513, %513, %513 in 0 : vector<16x256xf32>, vector<16x256xf32>, vector<16x256xf32>, vector<16x256xf32> -> vector<64x256xf32>
    %535 = arith.mulf %533, %534 : vector<64x256xf32>
    %c8 = arith.constant 8 : index
    %c0_96 = arith.constant 0 : index
    %c0_97 = arith.constant 0 : index
    %536 = vector.load %arg4[%c8, %c0_96, %c0_97] : memref<9x4x64xf32, #tpu.memory_space<vmem>>, vector<1x4x64xf32>
    %537 = vector.shape_cast %536 : vector<1x4x64xf32> to vector<4x64xf32>
    %cst_98 = arith.constant dense<0.000000e+00> : vector<4x256xf32>
    %538 = tpu.matmul %537, %535, %cst_98 {dimension_numbers = #tpu.dot_dimension_numbers<[1], [0], [0], [1], [0, 0, 1, 1], [], []>} : vector<4x64xf32>, vector<64x256xf32>, vector<4x256xf32> -> vector<4x256xf32>
    %539 = arith.addf %480, %538 : vector<4x256xf32>
    %c0_99 = arith.constant 0 : index
    %c0_100 = arith.constant 0 : index
    %c0_101 = arith.constant 0 : index
    %540 = vector.load %arg7[%c0_99, %c0_100, %c0_101] : memref<1x4x256xf32, #tpu.memory_space<vmem>>, vector<1x4x256xf32>
    %541 = vector.shape_cast %540 : vector<1x4x256xf32> to vector<4x256xf32>
    %542 = vector.shape_cast %539 : vector<4x256xf32> to vector<1x4x256xf32>
    tpu.vector_store %arg7[%c0_99, %c0_100, %c0_101], %542 {strides = array<i32>} : memref<1x4x256xf32, #tpu.memory_space<vmem>>, vector<1x4x256xf32>,
    return
  }
  func.func @transform_0(%arg0: i32, %arg1: i32) -> (i32, i32, i32) {
    %c0_i32 = arith.constant 0 : i32
    %c0_i32_0 = arith.constant 0 : i32
    %c0_i32_1 = arith.constant 0 : i32
    return %arg0, %c0_i32, %c0_i32_0 : i32, i32, i32
  }
  func.func @transform_1(%arg0: i32, %arg1: i32) -> (i32, i32, i32) {
    %c0_i32 = arith.constant 0 : i32
    %c0_i32_0 = arith.constant 0 : i32
    return %arg0, %c0_i32, %arg1 : i32, i32, i32
  }
  func.func @transform_2(%arg0: i32, %arg1: i32) -> (i32, i32, i32) {
    %c0_i32 = arith.constant 0 : i32
    %c0_i32_0 = arith.constant 0 : i32
    %c0_i32_1 = arith.constant 0 : i32
    %c0_i32_2 = arith.constant 0 : i32
    return %c0_i32, %c0_i32_0, %c0_i32_1 : i32, i32, i32
  }
  func.func @transform_3(%arg0: i32, %arg1: i32) -> (i32, i32) {
    %c0_i32 = arith.constant 0 : i32
    %c0_i32_0 = arith.constant 0 : i32
    return %c0_i32, %arg1 : i32, i32
  }
  func.func @transform_4(%arg0: i32, %arg1: i32) -> (i32, i32) {
    %c0_i32 = arith.constant 0 : i32
    %c0_i32_0 = arith.constant 0 : i32
    return %c0_i32, %arg1 : i32, i32
  }
  func.func @transform_5(%arg0: i32, %arg1: i32) -> (i32, i32, i32) {
    %c0_i32 = arith.constant 0 : i32
    %c0_i32_0 = arith.constant 0 : i32
    return %arg0, %c0_i32, %arg1 : i32, i32, i32
  }
}

</mosaic_0001>

<bundles_post_ra>
// kernel: tpu_custom_call.1
= control target key start
LH: loop header
LB: loop body
LE: loop exit
PB: predicated region body
PF: predicated region fallthrough
CT: control target
= control target key end

     0   :  { %10 = vsyncpa [#allocation3], 0  ;;  %s5932_s0 = inlined_call_operand.vmem [shape: f32[2,64,16], index: 0, kind: input, shape index: {}]   ;;  %s5933_s1 = inlined_call_operand.vmem [shape: f32[2,18,256], index: 1, kind: input, shape index: {}]   ;;  %s5934_s2 = inlined_call_operand.vmem [shape: f32[9,4,64], index: 2, kind: input, shape index: {}]   ;;  %s5935_s3 = inlined_call_operand.vmem [shape: f32[1,256], index: 3, kind: input, shape index: {}]   ;;  %s5936_s4 = inlined_call_operand.vmem [shape: f32[1,256], index: 4, kind: input, shape index: {}]   ;;  %s5937_s5 = inlined_call_operand.hbm [shape: f32[2,4,256], index: 5, kind: output, shape index: {}]  }
   0x1   :  { %12 = vsyncpa [#allocation3 + $0x1], 0  ;;  %s4621_s18 = smov 0   ;;  %s4623_s19 = smov 0  }
   0x2   :  { %s4625_s20 = smov 0   ;;  %s4627_s21 = smov 0  }
   0x3   :  { %s4629_s22 = smov 0   ;;  %s4631_s23 = smov 0  }
   0x4 LB: > { %s3942_s24 = sadd.s32 4294967295, %s4586_s23   ;;  %s3943_s25 = sadd.s32 4294967294, %s4586_s23   ;;  %s4586_s23 = sphi %s4631_s23, %s18_s23   ;;  %s4582_s22 = sphi %s4629_s22, %s6001_s22   ;;  %s4578_s21 = sphi %s4627_s21, %s6000_s21   ;;  %s4574_s20 = sphi %s4625_s20, %s5999_s20   ;;  %s4570_s19 = sphi %s4623_s19, %s5998_s19   ;;  %s4566_s18 = sphi %s4621_s18, %s5997_s18  }
   0x5   : > { %s30_s26 = sadd.s32 1, %s4582_s22  ;;  %s166_s27 = sadd.s32 1, %s4574_s20 }
   0x6   : > { %p32_p0 = scmp.ge.s32.totalorder %s30_s26, 2  ;;  %p176_p1 = scmp.ne.s32.totalorder %s4574_s20, %s4570_s19 }
   0x7   : > { %p177_p2 = scmp.eq.s32.totalorder %s3942_s24, 1  ;;  %p182_p3 = scmp.ne.s32.totalorder %s4570_s19, %s4566_s18 }
   0x8   : > { %s6003_s26 = smov (%p32_p0, %s30_s26), 0  ;;  %p183_p5 = scmp.eq.s32.totalorder %s3943_s25, 1 }
   0x9   : > { %p4661_p4 = por %p177_p2, %p176_p1  ;;  %s161_s29 = ssub.s32 %s4582_s22, %s6003_s26 }
   0xa   : > { %p3948_p6 = scmp.ge.s32.totalorder %s4586_s23, 1  ;;  %p164_p7 = scmp.eq.s32.totalorder %s161_s29, 0 }
   0xb   : > { %p4668_p8 = por %p183_p5, %p182_p3  ;;  %p241_p9 = scmp.lt.s32.totalorder %s4586_s23, 3 }
   0xc   : > { %s4674_s6 = scalar_select %p164_p7, %s4574_s20, %s166_s27  }
   0xd   : > { %p242_p10 = pnand %p3948_p6, %p241_p9 }
   0xf   : > { %245 = sbr.rel (%p242_p10) target bundleno = 1383 (0x567), region = 40 }
  0x16   : > { %p286_p11 = scmp.lt.s32.totalorder %s4578_s21, 1  ;;  %v328_v0 = vlaneseq  ;;  %v4588_v1 = vmov 1966171168   ;;  %v5938_v3 = vmov 0.0   ;;  %v4697_v8 = vld [vmem:[%s5936_s4] sm:$0x3] }
  0x17   : > { %v336_v2 = vunpack.c.l.s4 %v4588_v1  ;;  %904 = vmatprep.mubr.f32.mxu1 %v5938_v3  ;;  %609 = vmatprep.mubr.f32.mxu0 %v5938_v3  ;;  %v4708_v12 = vadd.f32 1.0, %v4697_v8  ;;  %vm520_vm8 = vcmask 130048   ;;  %s283_s13 = sand.u32 1, %s4570_s19   ;;  %s4192_s15 = sshll.u32 %s4578_s21, 7 }
  0x18   : > { %s4680_s7 = scalar_select %p286_p11, %s4578_s21, 1  ;;  %v4682_v4 = vshrl.u32 %v328_v0, 7 }
  0x19   : > { %v337_v5 = vunpack.c.0.s8 %v336_v2  ;;  %s5885_s27 = scalar_lea.hbm %s5937_s5, %s4192_s15  ;;  %s3814_s29 = scalar_lea.sflag [#allocation3], %s283_s13 }
  0x1a   : > { %s4389_s8 = smul.u32 48, %s4680_s7  ;;  %v4714_v16 = vsub.s32 1, %v4682_v4  ;;  %v4717_v19 = vsub.s32 0, %v4682_v4  ;;  %v4720_v20 = vadd.s32 8, %v4682_v4  ;;  %s4191_s14 = sshll.u32 %s4680_s7, 6 }
  0x1b   : > { %v4686_v6 = vsub.s32 %v337_v5, %v4682_v4  ;;  %s4750_s17 = scalar_lea.vmem %s5932_s0, %s4191_s14  ;;  %s3949_s14 = sshll.u32 %s283_s13, 3 }
  0x1c   : > { %s4691_s11 = scalar_lea.vmem %s5933_s1, %s4389_s8  ;;  %v4753_v54 = vld [vmem:[%s4750_s17] sm:$0xff]  ;;  %v4759_v55 = vld [vmem:[%s4750_s17 + $0x8] sm:$0xff]  ;;  %v4765_v56 = vld [vmem:[%s4750_s17 + $0x10] sm:$0xff]  ;;  %s285_s16 = scalar_lea.vmem [#allocation2], %s3949_s14 }
  0x1d   : > { %5954 = vst [vmem:[#allocation5_spill] sm:$0xff] %v4686_v6  ;;  %v4483_v7 = vld [vmem:[%s4691_s11] ss:$8 sps:$4 sm:$0xff]   ;;  %v4771_v57 = vld [vmem:[%s4750_s17 + $0x18] sm:$0xff]  ;;  %v4789_v60 = vld [vmem:[%s4750_s17 + $0x30] sm:$0xff]  ;;  %s3830_s24 = sshll.u32 %s285_s16, 4  ;;  %s5887_s24 = int_to_ptr.vmem [resolvable:$true] %s3830_s24 }
  0x1e   : > { %v4700_v9 = vrot.slane %v4483_v7, %v4686_v6  ;;  %v4777_v58 = vld [vmem:[%s4750_s17 + $0x20] sm:$0xff]  ;;  %v4783_v59 = vld [vmem:[%s4750_s17 + $0x28] sm:$0xff]  ;;  %v4795_v61 = vld [vmem:[%s4750_s17 + $0x38] sm:$0xff]  ;;  %s4508_s7 = scalar_lea.vmem %s5887_s24, 128  ;;  %s4590_s21 = smov [#allocation2]  }
  0x1f   : > { %p4509_p12 = scmp.ne.s32.totalorder %s5887_s24, %s4508_s7  ;;  %s4512_s8 = sshll.u32 %s4590_s21, 4  ;;  %s4513_s8 = int_to_ptr.vmem [resolvable:$false] %s4512_s8 }
  0x20   : > { %v352_v10 = vcombine.high %v4700_v9, %v4700_v9  ;;  %p4515_p1 = scmp.lt.s32.totalorder %s5887_s24, %s4513_s8 }
  0x21   : > { %p4510_p13 = pnand %p4509_p12, %p4661_p4 }
  0x22   : > { %v4705_v11 = vrot.slane %v352_v10, %v4686_v6 }
  0x23   : > { %p4511_p0 = pneg %p4510_p13 }
  0x24   : > { %v679_v13 = vcombine.high %v4705_v11, %v4705_v11  ;;  %v361_v62 = vadd.f32 %v4705_v11, %v4697_v8 }
  0x26   : > { %v681_v14 = vadd.f32 %v679_v13, %v4708_v12  ;;  %v363_v63 = vfloor.f32 %v361_v62 }
  0x28   : > { %v683_v15 = vfloor.f32 %v681_v14  ;;  %v4392_v0 = vtrunc.f32 %v363_v63  ;;  %v365_v2 = vsub.f32 %v361_v62, %v363_v63 }
  0x2a   : > { %v685_v17 = vsub.f32 %v681_v14, %v683_v15  ;;  %v4396_v18 = vtrunc.f32 %v683_v15  ;;  %v4393_v1 = vcvt.f32.s32 %v4392_v0  ;;  %v464_v10 = vsub.f32 1.0, %v365_v2 }
  0x2b   : > { %v509_v14 = vrot.slane %v365_v2, %v4714_v16 }
  0x2c   : > { %v4397_v21 = vcvt.f32.s32 %v4396_v18  ;;  %v784_v22 = vsub.f32 1.0, %v685_v17  ;;  %v829_v27 = vrot.slane %v685_v17, %v4714_v16  ;;  %v825_v41 = vrot.slane %v685_v17, %v4717_v19 }
  0x2d   : > { %v480_v5 = vadd.s32 1, %v4393_v1  ;;  %v451_v7 = vrot.slane %v4393_v1, %v4714_v16  ;;  %v473_v15 = vrot.slane %v464_v10, %v4714_v16  ;;  %v447_v11 = vrot.slane %v4393_v1, %v4717_v19 }
  0x2e   : > { %v771_v23 = vrot.slane %v4397_v21, %v4714_v16  ;;  %v793_v24 = vrot.slane %v784_v22, %v4714_v16  ;;  %v800_v25 = vadd.s32 1, %v4397_v21  ;;  %v767_v26 = vrot.slane %v4397_v21, %v4717_v19 }
  0x2f   : > { %v789_v28 = vrot.slane %v784_v22, %v4717_v19  ;;  %v488_v13 = vrot.slane %v480_v5, %v4714_v16  ;;  %vm453_vm9 = vcmp.eq.s32.totalorder %v4682_v4, %v451_v7  ;;  %vm455_vm10 = vcmp.eq.s32.totalorder %v4720_v20, %v451_v7 }
  0x30   : > { %vm773_vm0 = vcmp.eq.s32.totalorder %v4682_v4, %v771_v23  ;;  %vm775_vm1 = vcmp.eq.s32.totalorder %v4720_v20, %v771_v23  ;;  %v808_v29 = vrot.slane %v800_v25, %v4714_v16  ;;  %vm772_vm2 = vcmp.eq.s32.totalorder %v4682_v4, %v767_v26 }
  0x31   : > { %v3986_v30 = vsel %vm773_vm0, 1.0, %v5938_v3  ;;  %v3988_v31 = vsel %vm775_vm1, 1.0, %v5938_v3  ;;  %vm774_vm3 = vcmp.eq.s32.totalorder %v4720_v20, %v767_v26  ;;  %v3985_v32 = vsel %vm772_vm2, 1.0, %v5938_v3 }
  0x32   : > { %v797_v33 = vmul.f32 %v3986_v30, %v793_v24  ;;  %v799_v34 = vmul.f32 %v3988_v31, %v793_v24  ;;  %vm810_vm4 = vcmp.eq.s32.totalorder %v4682_v4, %v808_v29  ;;  %vm812_vm5 = vcmp.eq.s32.totalorder %v4720_v20, %v808_v29 }
  0x33   : > { %v3990_v35 = vsel %vm810_vm4, 1.0, %v5938_v3  ;;  %v3992_v36 = vsel %vm812_vm5, 1.0, %v5938_v3  ;;  %v3987_v37 = vsel %vm774_vm3, 1.0, %v5938_v3  ;;  %v804_v40 = vrot.slane %v800_v25, %v4717_v19 }
  0x34   : > { %v833_v38 = vmul.f32 %v3990_v35, %v829_v27  ;;  %v835_v39 = vmul.f32 %v3992_v36, %v829_v27  ;;  %v796_v42 = vmul.f32 %v3985_v32, %v789_v28  ;;  %v798_v43 = vmul.f32 %v3987_v37, %v789_v28 }
  0x35   : > { %vm809_vm6 = vcmp.eq.s32.totalorder %v4682_v4, %v804_v40  ;;  %vm811_vm7 = vcmp.eq.s32.totalorder %v4720_v20, %v804_v40  ;;  %v3962_v17 = vsel %vm453_vm9, 1.0, %v5938_v3  ;;  %v3964_v18 = vsel %vm455_vm10, 1.0, %v5938_v3 }
  0x36   : > { %v837_v44 = vadd.f32 %v833_v38, %v797_v33  ;;  %v839_v45 = vadd.f32 %v835_v39, %v799_v34  ;;  %v3989_v46 = vsel %vm809_vm6, 1.0, %v5938_v3  ;;  %v3991_v47 = vsel %vm811_vm7, 1.0, %v5938_v3 }
  0x37   : > { %v832_v49 = vmul.f32 %v3989_v46, %v825_v41  ;;  %v834_v50 = vmul.f32 %v3991_v47, %v825_v41  ;;  %vm490_vm11 = vcmp.eq.s32.totalorder %v4682_v4, %v488_v13  ;;  %v477_v21 = vmul.f32 %v3962_v17, %v473_v15  ;;  %v4859_v46 = vld [vmem:[%s5935_s3] sm:$0x3] }
  0x38   : > { %v4197_v48 = vpack.c.bf16 %v839_v45, %v837_v44  ;;  %v479_v22 = vmul.f32 %v3964_v18, %v473_v15  ;;  %vm492_vm12 = vcmp.eq.s32.totalorder %v4720_v20, %v488_v13  ;;  %v3966_v23 = vsel %vm490_vm11, 1.0, %v5938_v3 }
  0x39   : > { %v836_v51 = vadd.f32 %v832_v49, %v796_v42  ;;  %v838_v52 = vadd.f32 %v834_v50, %v798_v43  ;;  %v3968_v24 = vsel %vm492_vm12, 1.0, %v5938_v3  ;;  %v513_v25 = vmul.f32 %v3966_v23, %v509_v14 }
  0x3a   : > { %4198 = vmatprep.subr.bf16.mxu1 %v4197_v48  ;;  %vm452_vm13 = vcmp.eq.s32.totalorder %v4682_v4, %v447_v11  ;;  %vm454_vm14 = vcmp.eq.s32.totalorder %v4720_v20, %v447_v11  ;;  %v515_v26 = vmul.f32 %v3968_v24, %v509_v14  ;;  %v469_v29 = vrot.slane %v464_v10, %v4717_v19  ;;  %v4485_v48 = vld [vmem:[%s4691_s11 + $0x4] ss:$8 sps:$4 sm:$0xff]  }
  0x3b   : > { %v4199_v53 = vpack.c.bf16 %v838_v52, %v836_v51  ;;  %v3961_v27 = vsel %vm452_vm13, 1.0, %v5938_v3  ;;  %v3963_v28 = vsel %vm454_vm14, 1.0, %v5938_v3  ;;  %v517_v30 = vadd.f32 %v513_v25, %v477_v21 }
  0x3c   : > { %v484_v31 = vrot.slane %v480_v5, %v4717_v19  ;;  %v505_v32 = vrot.slane %v365_v2, %v4717_v19  ;;  %v519_v33 = vadd.f32 %v515_v26, %v479_v22  ;;  %v476_v34 = vmul.f32 %v3961_v27, %v469_v29 }
  0x3d   : > { %4200 = vmatpush1.bf16.msra.mxu1 %v4199_v53  ;;  %v478_v35 = vmul.f32 %v3963_v28, %v469_v29  ;;  %v4852_v44 = vrot.slane %v4700_v9, %v4686_v6  ;;  %v4864_v50 = vrot.slane %v4485_v48, %v4686_v6  ;;  %v4869_v53 = vadd.f32 2.0, %v4697_v8 }
  0x3e   : > { %vm489_vm15 = vcmp.eq.s32.totalorder %v4682_v4, %v484_v31  ;;  %vm491_vm0 = vcmp.eq.s32.totalorder %v4720_v20, %v484_v31  ;;  %v4193_v36 = vpack.c.bf16 %v519_v33, %v517_v30 }
  0x3f   : > { %v3965_v37 = vsel %vm489_vm15, 1.0, %v5938_v3  ;;  %v3967_v38 = vsel %vm491_vm0, 1.0, %v5938_v3  ;;  %v675_v45 = vcombine.high %v4852_v44, %v4852_v44  ;;  %v1138_v9 = vcombine.high %v4864_v50, %v4864_v50 }
  0x40   : > { %3993 = vmatmul.mubr.msk.f32.vlgmr.msra.gmra.mrb[0].mxu1 %vm520_vm8, %v4753_v54  ;;  %v512_v39 = vmul.f32 %v3965_v37, %v505_v32  ;;  %v514_v40 = vmul.f32 %v3967_v38, %v505_v32  ;;  %4194 = vmatprep.subr.bf16.mxu0 %v4193_v36 }
  0x41   : > { %910 = vmatprep.mubr.f32.mxu1 %v5938_v3  ;;  %v677_v47 = vadd.f32 %v675_v45, %v4859_v46  ;;  %v1145_v62 = vrot.slane %v1138_v9, %v4686_v6 }
  0x42   : > { %v516_v41 = vadd.f32 %v512_v39, %v476_v34  ;;  %v518_v42 = vadd.f32 %v514_v40, %v478_v35 }
  0x43   : > { %v682_v49 = vfloor.f32 %v677_v47  ;;  %v1147_v2 = vadd.f32 %v1145_v62, %v4869_v53  ;;  %v1517_v27 = vcombine.high %v1145_v62, %v1145_v62 }
  0x44   : > { %3994 = vmatmul.mubr.msk.f32.gmra.mrb[2].mxu1 %vm520_vm8, %v4759_v55  ;;  %v4195_v43 = vpack.c.bf16 %v518_v42, %v516_v41 }
  0x45   : > { %916 = vmatprep.mubr.f32.mxu1 %v5938_v3  ;;  %v4394_v51 = vtrunc.f32 %v682_v49  ;;  %v684_v0 = vsub.f32 %v677_v47, %v682_v49  ;;  %v1149_v14 = vfloor.f32 %v1147_v2  ;;  %v1519_v40 = vadd.f32 %v1517_v27, %v4697_v8 }
  0x46   : > { %4196 = vmatpush1.bf16.msra.mxu0 %v4195_v43 }
  0x47   : > { %v4395_v52 = vcvt.f32.s32 %v4394_v51  ;;  %v708_v7 = vsub.f32 1.0, %v684_v0  ;;  %v749_v15 = vrot.slane %v684_v0, %v4717_v19  ;;  %v753_v22 = vrot.slane %v684_v0, %v4714_v16 }
  0x48   : > { %3995 = vmatmul.mubr.msk.f32.gmra.mrb[4].mxu1 %vm520_vm8, %v4765_v56  ;;  %v4400_v23 = vtrunc.f32 %v1149_v14  ;;  %v1151_v42 = vsub.f32 %v1147_v2, %v1149_v14 }
  0x49   : > { %922 = vmatprep.mubr.f32.mxu1 %v5938_v3  ;;  %3969 = vmatmul.mubr.msk.f32.vlgmr.msra.gmra.mrb[0].mxu0 %vm520_vm8, %v4753_v54  ;;  %v724_v63 = vadd.s32 1, %v4395_v52  ;;  %v691_v1 = vrot.slane %v4395_v52, %v4717_v19  ;;  %v695_v10 = vrot.slane %v4395_v52, %v4714_v16  ;;  %v713_v11 = vrot.slane %v708_v7, %v4717_v19 }
  0x4a   : > { %615 = vmatprep.mubr.f32.mxu0 %v5938_v3  ;;  %v717_v21 = vrot.slane %v708_v7, %v4714_v16  ;;  %v4401_v36 = vcvt.f32.s32 %v4400_v23  ;;  %v1521_v52 = vfloor.f32 %v1519_v40 }
  0x4b   : > { %v728_v5 = vrot.slane %v724_v63, %v4717_v19  ;;  %v732_v13 = vrot.slane %v724_v63, %v4714_v16  ;;  %vm696_vm1 = vcmp.eq.s32.totalorder %v4682_v4, %v691_v1  ;;  %vm697_vm3 = vcmp.eq.s32.totalorder %v4682_v4, %v695_v10 }
  0x4c   : > { %3996 = vmatmul.mubr.msk.f32.gmra.mrb[6].mxu1 %vm520_vm8, %v4771_v57  ;;  %vm698_vm4 = vcmp.eq.s32.totalorder %v4720_v20, %v691_v1  ;;  %v3977_v17 = vsel %vm696_vm1, 1.0, %v5938_v3  ;;  %vm699_vm7 = vcmp.eq.s32.totalorder %v4720_v20, %v695_v10  ;;  %v3978_v24 = vsel %vm697_vm3, 1.0, %v5938_v3 }
  0x4d   : > { %928 = vmatprep.mubr.f32.mxu1 %v5938_v3  ;;  %3970 = vmatmul.mubr.msk.f32.gmra.mrb[2].mxu0 %vm520_vm8, %v4759_v55  ;;  %vm733_vm2 = vcmp.eq.s32.totalorder %v4682_v4, %v728_v5  ;;  %vm735_vm5 = vcmp.eq.s32.totalorder %v4720_v20, %v728_v5  ;;  %vm734_vm6 = vcmp.eq.s32.totalorder %v4682_v4, %v732_v13  ;;  %v3979_v25 = vsel %vm698_vm4, 1.0, %v5938_v3 }
  0x4e   : > { %621 = vmatprep.mubr.f32.mxu0 %v5938_v3  ;;  %vm736_vm9 = vcmp.eq.s32.totalorder %v4720_v20, %v732_v13  ;;  %v3981_v18 = vsel %vm733_vm2, 1.0, %v5938_v3  ;;  %v3983_v26 = vsel %vm735_vm5, 1.0, %v5938_v3  ;;  %v3982_v28 = vsel %vm734_vm6, 1.0, %v5938_v3 }
  0x4f   : > { %v3980_v29 = vsel %vm699_vm7, 1.0, %v5938_v3  ;;  %v3984_v30 = vsel %vm736_vm9, 1.0, %v5938_v3  ;;  %v720_v31 = vmul.f32 %v3977_v17, %v713_v11  ;;  %v756_v32 = vmul.f32 %v3981_v18, %v749_v15 }
  0x50   : > { %3997 = vmatmul.mubr.msk.f32.gmra.mrb[8].mxu1 %vm520_vm8, %v4777_v58  ;;  %v721_v33 = vmul.f32 %v3978_v24, %v717_v21  ;;  %v722_v34 = vmul.f32 %v3979_v25, %v713_v11  ;;  %v758_v35 = vmul.f32 %v3983_v26, %v749_v15  ;;  %v757_v37 = vmul.f32 %v3982_v28, %v753_v22 }
  0x51   : > { %934 = vmatprep.mubr.f32.mxu1 %v5938_v3  ;;  %3971 = vmatmul.mubr.msk.f32.gmra.mrb[4].mxu0 %vm520_vm8, %v4765_v56  ;;  %v723_v38 = vmul.f32 %v3980_v29, %v717_v21  ;;  %v759_v39 = vmul.f32 %v3984_v30, %v753_v22  ;;  %v4898_v43 = vadd.f32 %v756_v32, %v720_v31  ;;  %v1266_v48 = vadd.s32 1, %v4401_v36 }
  0x52   : > { %627 = vmatprep.mubr.f32.mxu0 %v5938_v3  ;;  %v4900_v47 = vadd.f32 %v758_v35, %v722_v34  ;;  %v4902_v49 = vadd.f32 %v757_v37, %v721_v33  ;;  %v1237_v9 = vrot.slane %v4401_v36, %v4714_v16  ;;  %v1250_v63 = vsub.f32 1.0, %v1151_v42 }
  0x53   : > { %v4904_v51 = vadd.f32 %v759_v39, %v723_v38  ;;  %v1274_v2 = vrot.slane %v1266_v48, %v4714_v16  ;;  %v4404_v10 = vtrunc.f32 %v1521_v52  ;;  %v1233_v17 = vrot.slane %v4401_v36, %v4717_v19 }
  0x54   : > { %3998 = vmatmul.mubr.msk.f32.gmra.mrb[10].mxu1 %vm520_vm8, %v4783_v59  ;;  %vm1239_vm10 = vcmp.eq.s32.totalorder %v4682_v4, %v1237_v9  ;;  %vm1241_vm11 = vcmp.eq.s32.totalorder %v4720_v20, %v1237_v9  ;;  %v1259_v11 = vrot.slane %v1250_v63, %v4714_v16  ;;  %v1270_v22 = vrot.slane %v1266_v48, %v4717_v19 }
  0x55   : > { %940 = vmatprep.mubr.f32.mxu1 %v5938_v3  ;;  %3972 = vmatmul.mubr.msk.f32.gmra.mrb[6].mxu0 %vm520_vm8, %v4771_v57  ;;  %v4013_v21 = vsel %vm1239_vm10, 1.0, %v5938_v3  ;;  %vm1276_vm12 = vcmp.eq.s32.totalorder %v4682_v4, %v1274_v2  ;;  %vm1278_vm13 = vcmp.eq.s32.totalorder %v4720_v20, %v1274_v2  ;;  %v4405_v23 = vcvt.f32.s32 %v4404_v10 }
  0x56   : > { %633 = vmatprep.mubr.f32.mxu0 %v5938_v3  ;;  %v4015_v24 = vsel %vm1241_vm11, 1.0, %v5938_v3  ;;  %v1295_v25 = vrot.slane %v1151_v42, %v4714_v16  ;;  %v1263_v27 = vmul.f32 %v4013_v21, %v1259_v11  ;;  %v4017_v28 = vsel %vm1276_vm12, 1.0, %v5938_v3 }
  0x57   : > { %v4019_v29 = vsel %vm1278_vm13, 1.0, %v5938_v3  ;;  %vm1238_vm14 = vcmp.eq.s32.totalorder %v4682_v4, %v1233_v17  ;;  %vm1240_vm15 = vcmp.eq.s32.totalorder %v4720_v20, %v1233_v17  ;;  %v1255_v33 = vrot.slane %v1250_v63, %v4717_v19 }
  0x58   : > { %3999 = vmatmul.mubr.msk.f32.gmra.mrb[12].mxu1 %vm520_vm8, %v4789_v60  ;;  %vm1275_vm0 = vcmp.eq.s32.totalorder %v4682_v4, %v1270_v22  ;;  %v1638_v36 = vadd.s32 1, %v4405_v23  ;;  %v1299_v38 = vmul.f32 %v4017_v28, %v1295_v25  ;;  %v4012_v39 = vsel %vm1238_vm14, 1.0, %v5938_v3 }
  0x59   : > { %946 = vmatprep.mubr.f32.mxu1 %v5938_v3  ;;  %3973 = vmatmul.mubr.msk.f32.gmra.mrb[8].mxu0 %vm520_vm8, %v4777_v58  ;;  %v4014_v9 = vsel %vm1240_vm15, 1.0, %v5938_v3  ;;  %v1609_v63 = vrot.slane %v4405_v23, %v4714_v16  ;;  %vm1277_vm1 = vcmp.eq.s32.totalorder %v4720_v20, %v1270_v22  ;;  %v1301_v2 = vmul.f32 %v4019_v29, %v1295_v25 }
  0x5a   : > { %639 = vmatprep.mubr.f32.mxu0 %v5938_v3  ;;  %v1605_v10 = vrot.slane %v4405_v23, %v4717_v19  ;;  %v1642_v21 = vrot.slane %v1638_v36, %v4717_v19  ;;  %vm971_vm11 = vcmask 523264  }
  0x5b   : > { %vm1611_vm2 = vcmp.eq.s32.totalorder %v4682_v4, %v1609_v63  ;;  %vm1613_vm3 = vcmp.eq.s32.totalorder %v4720_v20, %v1609_v63 }
  0x5c   : > { %4000 = vmatmul.mubr.msk.f32.gmra.mrb[14].mxu1 %vm520_vm8, %v4795_v61  ;;  %vm1610_vm6 = vcmp.eq.s32.totalorder %v4682_v4, %v1605_v10  ;;  %v4039_v29 = vsel %vm1611_vm2, 1.0, %v5938_v3  ;;  %vm1612_vm7 = vcmp.eq.s32.totalorder %v4720_v20, %v1605_v10  ;;  %vm1647_vm9 = vcmp.eq.s32.totalorder %v4682_v4, %v1642_v21 }
  0x5d   : > { %1039 = vmatprep.mubr.f32.mxu1 %v5938_v3  ;;  %3974 = vmatmul.mubr.msk.f32.gmra.mrb[10].mxu0 %vm520_vm8, %v4783_v59  ;;  %vm1649_vm10 = vcmp.eq.s32.totalorder %v4720_v20, %v1642_v21 }
  0x5e   : > { %645 = vmatprep.mubr.f32.mxu0 %v5938_v3 }
  0x61   : > { %3975 = vmatmul.mubr.msk.f32.gmra.mrb[12].mxu0 %vm520_vm8, %v4789_v60 }
  0x62   : > { %651 = vmatprep.mubr.f32.mxu0 %v5938_v3 }
  0x65   : > { %3976 = vmatmul.mubr.msk.f32.gmra.mrb[14].mxu0 %vm520_vm8, %v4795_v61 }
  0x66   : > { %1113 = vmatprep.mubr.f32.mxu0 %v5938_v3 }
 0x113   : > { %v906_v41 = vpop.f32.mrb[0].mxu1 }
 0x114   : > { %v908_v45 = vpop.f32.mrb[1].mxu1  ;;  %v953_v0 = vmul.f32 %v906_v41, %v4898_v43  ;;  %v1523_v41 = vsub.f32 %v1519_v40, %v1521_v52  ;;  %v1262_v40 = vmul.f32 %v4012_v39, %v1255_v33  ;;  %v1264_v52 = vmul.f32 %v4014_v9, %v1255_v33 }
 0x115   : > { %v954_v5 = vmul.f32 %v908_v45, %v4902_v49 }
 0x117   : > { %v912_v62 = vpop.f32.mrb[2].mxu1 }
 0x118   : > { %v955_v8 = vmul.f32 %v912_v62, %v4900_v47  ;;  %v914_v1 = vpop.f32.mrb[3].mxu1  ;;  %v1291_v62 = vrot.slane %v1151_v42, %v4717_v19  ;;  %v4940_v42 = vadd.f32 %v1299_v38, %v1263_v27 }
 0x119   : > { %v956_v7 = vmul.f32 %v914_v1, %v4904_v51  ;;  %v1265_v1 = vmul.f32 %v4015_v24, %v1259_v11 }
 0x11a   : > { %v4203_v13 = vpack.c.bf16 %v955_v8, %v953_v0  ;;  %v4016_v8 = vsel %vm1275_vm0, 1.0, %v5938_v3 }
 0x11b   : > { %v4201_v14 = vpack.c.bf16 %v956_v7, %v954_v5  ;;  %v918_v15 = vpop.f32.mrb[4].mxu1  ;;  %v1646_v5 = vrot.slane %v1638_v36, %v4714_v16  ;;  %v1622_v7 = vsub.f32 1.0, %v1523_v41 }
 0x11c   : > { %v920_v18 = vpop.f32.mrb[5].mxu1  ;;  %v957_v30 = vmul.f32 %v918_v15, %v4898_v43  ;;  %v1298_v15 = vmul.f32 %v4016_v8, %v1291_v62  ;;  %v4042_v8 = vsel %vm1647_vm9, 1.0, %v5938_v3 }
 0x11d   : > { %4202 = vmatprep.subr.bf16.mxu1 %v4201_v14  ;;  %v958_v34 = vmul.f32 %v920_v18, %v4902_v49  ;;  %v4018_v14 = vsel %vm1277_vm1, 1.0, %v5938_v3  ;;  %vm1648_vm4 = vcmp.eq.s32.totalorder %v4682_v4, %v1646_v5  ;;  %vm1650_vm5 = vcmp.eq.s32.totalorder %v4720_v20, %v1646_v5 }
 0x11e   : > { %4204 = vmatpush1.bf16.msra.mxu1 %v4203_v13  ;;  %v1631_v25 = vrot.slane %v1622_v7, %v4714_v16  ;;  %v4045_v33 = vsel %vm1650_vm5, 1.0, %v5938_v3  ;;  %v1627_v36 = vrot.slane %v1622_v7, %v4717_v19  ;;  %v1302_v5 = vadd.f32 %v1298_v15, %v1262_v40 }
 0x11f   : > { %v924_v26 = vpop.f32.mrb[6].mxu1 }
 0x120   : > { %v959_v31 = vmul.f32 %v924_v26, %v4900_v47  ;;  %v926_v32 = vpop.f32.mrb[7].mxu1  ;;  %v1667_v26 = vrot.slane %v1523_v41, %v4714_v16  ;;  %v1635_v38 = vmul.f32 %v4039_v29, %v1631_v25 }
 0x121   : > { %v960_v35 = vmul.f32 %v926_v32, %v4904_v51  ;;  %v4043_v32 = vsel %vm1648_vm4, 1.0, %v5938_v3 }
 0x122   : > { %v4207_v37 = vpack.c.bf16 %v959_v31, %v957_v30  ;;  %v4041_v30 = vsel %vm1613_vm3, 1.0, %v5938_v3  ;;  %v1671_v63 = vmul.f32 %v4043_v32, %v1667_v26 }
 0x123   : > { %v4205_v45 = vpack.c.bf16 %v960_v35, %v958_v34  ;;  %v930_v48 = vpop.f32.mrb[8].mxu1  ;;  %v1305_v34 = vadd.f32 %v1301_v2, %v1265_v1  ;;  %v1300_v35 = vmul.f32 %v4018_v14, %v1291_v62  ;;  %v1637_v39 = vmul.f32 %v4041_v30, %v1631_v25 }
 0x124   : > { %v932_v0 = vpop.f32.mrb[9].mxu1  ;;  %v961_v17 = vmul.f32 %v930_v48, %v4898_v43  ;;  %v4040_v48 = vsel %vm1612_vm7, 1.0, %v5938_v3  ;;  %v4044_v62 = vsel %vm1649_vm10, 1.0, %v5938_v3 }
 0x125   : > { %4206 = vmatprep.subr.bf16.mxu1 %v4205_v45  ;;  %v962_v22 = vmul.f32 %v932_v0, %v4902_v49  ;;  %v4038_v45 = vsel %vm1610_vm6, 1.0, %v5938_v3  ;;  %v1673_v0 = vmul.f32 %v4045_v33, %v1667_v26 }
 0x126   : > { %4208 = vmatpush1.bf16.msra.mxu1 %v4207_v37  ;;  %v1663_v37 = vrot.slane %v1523_v41, %v4717_v19  ;;  %v1634_v14 = vmul.f32 %v4038_v45, %v1627_v36 }
 0x127   : > { %v936_v13 = vpop.f32.mrb[10].mxu1  ;;  %v1677_v25 = vadd.f32 %v1673_v0, %v1637_v39 }
 0x128   : > { %v963_v11 = vmul.f32 %v936_v13, %v4900_v47  ;;  %v938_v18 = vpop.f32.mrb[11].mxu1  ;;  %v1304_v13 = vadd.f32 %v1300_v35, %v1264_v52  ;;  %v1672_v21 = vmul.f32 %v4044_v62, %v1663_v37 }
 0x129   : > { %v964_v23 = vmul.f32 %v938_v18, %v4904_v51  ;;  %v1670_v18 = vmul.f32 %v4042_v8, %v1663_v37 }
 0x12a   : > { %v4211_v24 = vpack.c.bf16 %v963_v11, %v961_v17  ;;  %v1636_v11 = vmul.f32 %v4040_v48, %v1627_v36 }
 0x12b   : > { %v4209_v27 = vpack.c.bf16 %v964_v23, %v962_v22  ;;  %v942_v28 = vpop.f32.mrb[12].mxu1  ;;  %v4233_v23 = vpack.c.bf16 %v1305_v34, %v4940_v42  ;;  %v350_v42 = vadd.f32 %v4852_v44, %v4859_v46 }
 0x12c   : > { %v944_v31 = vpop.f32.mrb[13].mxu1  ;;  %v965_v1 = vmul.f32 %v942_v28, %v4898_v43  ;;  %v4001_v43 = vld [vmem:[%s5934_s2 + $0x4] sm:$0xf] }
 0x12d   : > { %4210 = vmatprep.subr.bf16.mxu1 %v4209_v27  ;;  %v966_v7 = vmul.f32 %v944_v31, %v4902_v49  ;;  %v1674_v49 = vadd.f32 %v1670_v18, %v1634_v14  ;;  %v362_v15 = vfloor.f32 %v350_v42 }
 0x12e   : > { %4212 = vmatpush1.bf16.msra.mxu1 %v4211_v24  ;;  %v1675_v24 = vadd.f32 %v1671_v63, %v1635_v38 }
 0x12f   : > { %v948_v9 = vpop.f32.mrb[14].mxu1  ;;  %v4390_v26 = vtrunc.f32 %v362_v15  ;;  %v364_v28 = vsub.f32 %v350_v42, %v362_v15 }
 0x130   : > { %v967_v41 = vmul.f32 %v948_v9, %v4900_v47  ;;  %v950_v2 = vpop.f32.mrb[15].mxu1  ;;  %v4235_v47 = vpack.c.bf16 %v1304_v13, %v1302_v5  ;;  %v4253_v40 = vpack.c.bf16 %v1677_v25, %v1675_v24 }
 0x131   : > { %v968_v10 = vmul.f32 %v950_v2, %v4904_v51  ;;  %v1676_v51 = vadd.f32 %v1672_v21, %v1636_v11  ;;  %v4391_v27 = vcvt.f32.s32 %v4390_v26  ;;  %v388_v33 = vsub.f32 1.0, %v364_v28 }
 0x132   : > { %v4215_v17 = vpack.c.bf16 %v967_v41, %v965_v1  ;;  %v429_v34 = vrot.slane %v364_v28, %v4717_v19  ;;  %v433_v35 = vrot.slane %v364_v28, %v4714_v16 }
 0x133   : > { %v4213_v22 = vpack.c.bf16 %v968_v10, %v966_v7  ;;  %v4255_v52 = vpack.c.bf16 %v1676_v51, %v1674_v49  ;;  %v404_v44 = vadd.s32 1, %v4391_v27  ;;  %v371_v29 = vrot.slane %v4391_v27, %v4717_v19 }
 0x134   : > { %v375_v31 = vrot.slane %v4391_v27, %v4714_v16  ;;  %v393_v36 = vrot.slane %v388_v33, %v4717_v19  ;;  %v397_v37 = vrot.slane %v388_v33, %v4714_v16 }
 0x135   : > { %4214 = vmatprep.subr.bf16.mxu1 %v4213_v22  ;;  %v408_v30 = vrot.slane %v404_v44, %v4717_v19  ;;  %v412_v32 = vrot.slane %v404_v44, %v4714_v16  ;;  %vm376_vm12 = vcmp.eq.s32.totalorder %v4682_v4, %v371_v29  ;;  %vm378_vm0 = vcmp.eq.s32.totalorder %v4720_v20, %v371_v29 }
 0x136   : > { %4216 = vmatpush1.bf16.msra.mxu1 %v4215_v17  ;;  %vm377_vm14 = vcmp.eq.s32.totalorder %v4682_v4, %v375_v31  ;;  %v3953_v38 = vsel %vm376_vm12, 1.0, %v5938_v3  ;;  %vm379_vm2 = vcmp.eq.s32.totalorder %v4720_v20, %v375_v31  ;;  %v3955_v9 = vsel %vm378_vm0, 1.0, %v5938_v3  ;;  %v611_v17 = vpop.f32.mrb[0].mxu0 }
 0x137   : > { %4234 = vmatprep.subr.bf16.mxu1 %v4233_v23  ;;  %vm413_vm13 = vcmp.eq.s32.totalorder %v4682_v4, %v408_v30  ;;  %vm414_vm15 = vcmp.eq.s32.totalorder %v4682_v4, %v412_v32  ;;  %vm415_vm1 = vcmp.eq.s32.totalorder %v4720_v20, %v408_v30  ;;  %vm416_vm3 = vcmp.eq.s32.totalorder %v4720_v20, %v412_v32  ;;  %v613_v18 = vpop.f32.mrb[1].mxu0 }
 0x138   : > { %v3957_v39 = vsel %vm413_vm13, 1.0, %v5938_v3  ;;  %v3954_v45 = vsel %vm377_vm14, 1.0, %v5938_v3  ;;  %v3958_v48 = vsel %vm414_vm15, 1.0, %v5938_v3  ;;  %v3959_v63 = vsel %vm415_vm1, 1.0, %v5938_v3  ;;  %v617_v25 = vpop.f32.mrb[2].mxu0 }
 0x139   : > { %4002 = vmatmul.mubr.msk.f32.vlgmr.msra.gmra.mrb[16].mxu1 %vm971_vm11, %v4001_v43  ;;  %v400_v0 = vmul.f32 %v3953_v38, %v393_v36  ;;  %v436_v8 = vmul.f32 %v3957_v39, %v429_v34  ;;  %v3956_v62 = vsel %vm379_vm2, 1.0, %v5938_v3  ;;  %v3960_v1 = vsel %vm416_vm3, 1.0, %v5938_v3 }
 0x13a   : > { %4236 = vmatpush1.bf16.msra.mxu1 %v4235_v47  ;;  %1370 = vmatprep.mubr.f32.mxu1 %v5938_v3  ;;  %v401_v41 = vmul.f32 %v3954_v45, %v397_v37  ;;  %v437_v2 = vmul.f32 %v3958_v48, %v433_v35  ;;  %v402_v5 = vmul.f32 %v3955_v9, %v393_v36  ;;  %v619_v47 = vpop.f32.mrb[3].mxu0 }
 0x13b   : > { %4254 = vmatprep.subr.bf16.mxu1 %v4253_v40  ;;  %v438_v7 = vmul.f32 %v3959_v63, %v429_v34  ;;  %v403_v10 = vmul.f32 %v3956_v62, %v397_v37  ;;  %v439_v13 = vmul.f32 %v3960_v1, %v433_v35  ;;  %v440_v14 = vadd.f32 %v436_v8, %v400_v0 }
 0x13c   : > { %v441_v11 = vadd.f32 %v437_v2, %v401_v41 }
 0x13d   : > { %4020 = vmatmul.mubr.msk.f32.vlgmr.msra.gmra.mrb[18].mxu1 %vm520_vm8, %v4753_v54  ;;  %v442_v21 = vadd.f32 %v438_v7, %v402_v5  ;;  %v443_v22 = vadd.f32 %v439_v13, %v403_v10  ;;  %v658_v23 = vmul.f32 %v611_v17, %v440_v14  ;;  %v674_v10 = vld [vmem:[%s5934_s2] sm:$0xf]  ;;  %v4486_v13 = vld [vmem:[%s4691_s11 + $0x10] ss:$8 sps:$4 sm:$0xff]  }
 0x13e   : > { %1376 = vmatprep.mubr.f32.mxu1 %v5938_v3  ;;  %4256 = vmatpush1.bf16.msra.mxu1 %v4255_v52  ;;  %v659_v24 = vmul.f32 %v613_v18, %v441_v11  ;;  %v623_v52 = vpop.f32.mrb[4].mxu0 }
 0x13f   : > { %v660_v43 = vmul.f32 %v617_v25, %v442_v21  ;;  %v661_v49 = vmul.f32 %v619_v47, %v443_v22  ;;  %v625_v42 = vpop.f32.mrb[5].mxu0  ;;  %v662_v15 = vmul.f32 %v623_v52, %v440_v14 }
 0x140   : > { %v663_v26 = vmul.f32 %v625_v42, %v441_v11  ;;  %v629_v27 = vpop.f32.mrb[6].mxu0 }
 0x141   : > { %4021 = vmatmul.mubr.msk.f32.gmra.mrb[20].mxu1 %vm520_vm8, %v4759_v55  ;;  %v4219_v51 = vpack.c.bf16 %v660_v43, %v658_v23  ;;  %v4217_v40 = vpack.c.bf16 %v661_v49, %v659_v24  ;;  %v664_v44 = vmul.f32 %v629_v27, %v442_v21  ;;  %v631_v28 = vpop.f32.mrb[7].mxu0 }
 0x142   : > { %1382 = vmatprep.mubr.f32.mxu1 %v5938_v3  ;;  %v665_v29 = vmul.f32 %v631_v28, %v443_v22  ;;  %v635_v32 = vpop.f32.mrb[8].mxu0 }
 0x143   : > { %4218 = vmatprep.subr.bf16.mxu0 %v4217_v40  ;;  %v4223_v30 = vpack.c.bf16 %v664_v44, %v662_v15  ;;  %v637_v33 = vpop.f32.mrb[9].mxu0  ;;  %v666_v34 = vmul.f32 %v635_v32, %v440_v14 }
 0x144   : > { %4220 = vmatpush1.bf16.msra.mxu0 %v4219_v51  ;;  %v4221_v31 = vpack.c.bf16 %v665_v29, %v663_v26  ;;  %v667_v35 = vmul.f32 %v637_v33, %v441_v11  ;;  %v641_v36 = vpop.f32.mrb[10].mxu0 }
 0x145   : > { %4022 = vmatmul.mubr.msk.f32.gmra.mrb[22].mxu1 %vm520_vm8, %v4765_v56  ;;  %v668_v37 = vmul.f32 %v641_v36, %v442_v21  ;;  %v643_v38 = vpop.f32.mrb[11].mxu0 }
 0x146   : > { %1388 = vmatprep.mubr.f32.mxu1 %v5938_v3  ;;  %4222 = vmatprep.subr.bf16.mxu0 %v4221_v31  ;;  %v669_v39 = vmul.f32 %v643_v38, %v443_v22  ;;  %v647_v9 = vpop.f32.mrb[12].mxu0 }
 0x147   : > { %v4227_v45 = vpack.c.bf16 %v668_v37, %v666_v34  ;;  %v649_v63 = vpop.f32.mrb[13].mxu0  ;;  %v670_v0 = vmul.f32 %v647_v9, %v440_v14  ;;  %v5063_v14 = vrot.slane %v4486_v13, %v4686_v6  ;;  %v4490_v13 = vld [vmem:[%s5936_s4] sm:$0x3] }
 0x148   : > { %4224 = vmatpush1.bf16.msra.mxu0 %v4223_v30  ;;  %v4225_v48 = vpack.c.bf16 %v669_v39, %v667_v35  ;;  %v671_v8 = vmul.f32 %v649_v63, %v441_v11  ;;  %v653_v62 = vpop.f32.mrb[14].mxu0 }
 0x149   : > { %4023 = vmatmul.mubr.msk.f32.gmra.mrb[24].mxu1 %vm520_vm8, %v4771_v57  ;;  %v672_v1 = vmul.f32 %v653_v62, %v442_v21  ;;  %v655_v41 = vpop.f32.mrb[15].mxu0  ;;  %v1904_v17 = vcombine.high %v5063_v14, %v5063_v14 }
 0x14a   : > { %1394 = vmatprep.mubr.f32.mxu1 %v5938_v3  ;;  %4226 = vmatprep.subr.bf16.mxu0 %v4225_v48  ;;  %v673_v2 = vmul.f32 %v655_v41, %v443_v22 }
 0x14b   : > { %v4231_v5 = vpack.c.bf16 %v672_v1, %v670_v0  ;;  %v5068_v11 = vrot.slane %v1904_v17, %v4686_v6 }
 0x14c   : > { %4228 = vmatpush1.bf16.msra.mxu0 %v4227_v45  ;;  %v4229_v7 = vpack.c.bf16 %v673_v2, %v671_v8  ;;  %v4488_v2 = vld [vmem:[%s4691_s11 + $0x14] ss:$8 sps:$4 sm:$0xff]  }
 0x14d   : > { %4024 = vmatmul.mubr.msk.f32.gmra.mrb[26].mxu1 %vm520_vm8, %v4777_v58  ;;  %v2282_v18 = vcombine.high %v5068_v11, %v5068_v11 }
 0x14e   : > { %1400 = vmatprep.mubr.f32.mxu1 %v5938_v3  ;;  %4230 = vmatprep.subr.bf16.mxu0 %v4229_v7 }
 0x14f   : > { %v2284_v21 = vadd.f32 %v2282_v18, %v4869_v53 }
 0x150   : > { %4232 = vmatpush1.bf16.msra.mxu0 %v4231_v5  ;;  %v5099_v5 = vrot.slane %v4488_v2, %v4686_v6 }
 0x151   : > { %4025 = vmatmul.mubr.msk.f32.gmra.mrb[28].mxu1 %vm520_vm8, %v4783_v59  ;;  %v2286_v22 = vfloor.f32 %v2284_v21 }
 0x152   : > { %1406 = vmatprep.mubr.f32.mxu1 %v5938_v3  ;;  %v2668_v7 = vcombine.high %v5099_v5, %v5099_v5 }
 0x153   : > { %4003 = vmatmul.mubr.msk.f32.vlgmr.msra.gmra.mrb[16].mxu0 %vm971_vm11, %v674_v10  ;;  %v2288_v23 = vsub.f32 %v2284_v21, %v2286_v22  ;;  %v4412_v24 = vtrunc.f32 %v2286_v22 }
 0x154   : > { %1504 = vmatprep.mubr.f32.mxu0 %v5938_v3  ;;  %v5107_v10 = vrot.slane %v2668_v7, %v4686_v6 }
 0x155   : > { %4026 = vmatmul.mubr.msk.f32.gmra.mrb[30].mxu1 %vm520_vm8, %v4789_v60  ;;  %v4413_v25 = vcvt.f32.s32 %v4412_v24  ;;  %v2387_v43 = vsub.f32 1.0, %v2288_v23  ;;  %v2432_v52 = vrot.slane %v2288_v23, %v4714_v16  ;;  %v2428_v36 = vrot.slane %v2288_v23, %v4717_v19 }
 0x156   : > { %1412 = vmatprep.mubr.f32.mxu1 %v5938_v3  ;;  %v2677_v17 = vadd.f32 %v4490_v13, %v5107_v10 }
 0x157   : > { %v2374_v47 = vrot.slane %v4413_v25, %v4714_v16  ;;  %v2396_v49 = vrot.slane %v2387_v43, %v4714_v16  ;;  %v2403_v51 = vadd.s32 1, %v4413_v25  ;;  %v2370_v40 = vrot.slane %v4413_v25, %v4717_v19 }
 0x158   : > { %v2392_v42 = vrot.slane %v2387_v43, %v4717_v19 }
 0x159   : > { %4027 = vmatmul.mubr.msk.f32.gmra.mrb[32].mxu1 %vm520_vm8, %v4795_v61  ;;  %vm2376_vm4 = vcmp.eq.s32.totalorder %v4682_v4, %v2374_v47  ;;  %vm2378_vm5 = vcmp.eq.s32.totalorder %v4720_v20, %v2374_v47  ;;  %v2411_v15 = vrot.slane %v2403_v51, %v4714_v16  ;;  %vm2375_vm6 = vcmp.eq.s32.totalorder %v4682_v4, %v2370_v40 }
 0x15a   : > { %1742 = vmatprep.mubr.f32.mxu1 %v5938_v3  ;;  %v4091_v26 = vsel %vm2376_vm4, 1.0, %v5938_v3  ;;  %v4093_v27 = vsel %vm2378_vm5, 1.0, %v5938_v3  ;;  %vm2377_vm7 = vcmp.eq.s32.totalorder %v4720_v20, %v2370_v40  ;;  %v4090_v44 = vsel %vm2375_vm6, 1.0, %v5938_v3 }
 0x15b   : > { %v2400_v28 = vmul.f32 %v4091_v26, %v2396_v49  ;;  %v2402_v29 = vmul.f32 %v4093_v27, %v2396_v49  ;;  %vm2413_vm9 = vcmp.eq.s32.totalorder %v4682_v4, %v2411_v15  ;;  %vm2415_vm10 = vcmp.eq.s32.totalorder %v4720_v20, %v2411_v15 }
 0x15c   : > { %v4095_v30 = vsel %vm2413_vm9, 1.0, %v5938_v3  ;;  %v4097_v31 = vsel %vm2415_vm10, 1.0, %v5938_v3  ;;  %v4092_v32 = vsel %vm2377_vm7, 1.0, %v5938_v3  ;;  %v2407_v35 = vrot.slane %v2403_v51, %v4717_v19 }
 0x15d   : > { %4046 = vmatmul.mubr.msk.f32.vlgmr.msra.gmra.mrb[34].mxu1 %vm520_vm8, %v4753_v54  ;;  %v2436_v33 = vmul.f32 %v4095_v30, %v2432_v52  ;;  %v2438_v34 = vmul.f32 %v4097_v31, %v2432_v52  ;;  %v2399_v37 = vmul.f32 %v4090_v44, %v2392_v42  ;;  %v2401_v38 = vmul.f32 %v4092_v32, %v2392_v42 }
 0x15e   : > { %1748 = vmatprep.mubr.f32.mxu1 %v5938_v3  ;;  %vm2412_vm12 = vcmp.eq.s32.totalorder %v4682_v4, %v2407_v35  ;;  %vm2414_vm13 = vcmp.eq.s32.totalorder %v4720_v20, %v2407_v35  ;;  %v5142_v15 = vrot.slane %v4864_v50, %v4686_v6 }
 0x15f   : > { %v2440_v39 = vadd.f32 %v2436_v33, %v2400_v28  ;;  %v2442_v45 = vadd.f32 %v2438_v34, %v2402_v29  ;;  %v4094_v48 = vsel %vm2412_vm12, 1.0, %v5938_v3  ;;  %v4096_v9 = vsel %vm2414_vm13, 1.0, %v5938_v3 }
 0x160   : > { %v2435_v0 = vmul.f32 %v4094_v48, %v2428_v36  ;;  %v2437_v8 = vmul.f32 %v4096_v9, %v2428_v36  ;;  %v1136_v34 = vadd.f32 %v5142_v15, %v4859_v46 }
 0x161   : > { %4047 = vmatmul.mubr.msk.f32.gmra.mrb[36].mxu1 %vm520_vm8, %v4759_v55  ;;  %v4293_v63 = vpack.c.bf16 %v2442_v45, %v2440_v39 }
 0x162   : > { %1754 = vmatprep.mubr.f32.mxu1 %v5938_v3  ;;  %v2439_v62 = vadd.f32 %v2435_v0, %v2399_v37  ;;  %v2441_v1 = vadd.f32 %v2437_v8, %v2401_v38  ;;  %v1148_v48 = vfloor.f32 %v1136_v34  ;;  %v5165_v0 = vld [vmem:[%s4750_s17] sm:$0xff]  ;;  %v5171_v8 = vld [vmem:[%s4750_s17 + $0x8] sm:$0xff] }
 0x163   : > { %4294 = vmatprep.subr.bf16.mxu1 %v4293_v63 }
 0x164   : > { %v4295_v41 = vpack.c.bf16 %v2441_v1, %v2439_v62  ;;  %v4398_v63 = vtrunc.f32 %v1148_v48  ;;  %v5177_v62 = vld [vmem:[%s4750_s17 + $0x10] sm:$0xff]  ;;  %v1150_v1 = vsub.f32 %v1136_v34, %v1148_v48  ;;  %v5257_v48 = vld [vmem:[%s4750_s17 + $0x38] sm:$0xff] }
 0x165   : > { %4048 = vmatmul.mubr.msk.f32.gmra.mrb[38].mxu1 %vm520_vm8, %v4765_v56  ;;  %v5243_v34 = vld [vmem:[%s4750_s17 + $0x30] sm:$0xff] }
 0x166   : > { %1760 = vmatprep.mubr.f32.mxu1 %v5938_v3  ;;  %4296 = vmatpush1.bf16.msra.mxu1 %v4295_v41 }
 0x169   : > { %4049 = vmatmul.mubr.msk.f32.gmra.mrb[40].mxu1 %vm520_vm8, %v4771_v57 }
 0x16a   : > { %1766 = vmatprep.mubr.f32.mxu1 %v5938_v3 }
 0x16d   : > { %4050 = vmatmul.mubr.msk.f32.gmra.mrb[42].mxu1 %vm520_vm8, %v4777_v58 }
 0x16e   : > { %1772 = vmatprep.mubr.f32.mxu1 %v5938_v3 }
 0x171   : > { %4051 = vmatmul.mubr.msk.f32.gmra.mrb[44].mxu1 %vm520_vm8, %v4783_v59 }
 0x172   : > { %1778 = vmatprep.mubr.f32.mxu1 %v5938_v3 }
 0x175   : > { %4052 = vmatmul.mubr.msk.f32.gmra.mrb[46].mxu1 %vm520_vm8, %v4789_v60 }
 0x176   : > { %1784 = vmatprep.mubr.f32.mxu1 %v5938_v3 }
 0x179   : > { %4053 = vmatmul.mubr.msk.f32.gmra.mrb[48].mxu1 %vm520_vm8, %v4795_v61 }
 0x17a   : > { %2507 = vmatprep.mubr.f32.mxu1 %v5938_v3 }
 0x17d   : > { %4098 = vmatmul.mubr.msk.f32.vlgmr.msra.gmra.mrb[50].mxu1 %vm520_vm8, %v4753_v54  ;;  %v2679_v54 = vfloor.f32 %v2677_v17 }
 0x17e   : > { %2513 = vmatprep.mubr.f32.mxu1 %v5938_v3 }
 0x17f   : > { %v2681_v18 = vsub.f32 %v2677_v17, %v2679_v54  ;;  %v4416_v21 = vtrunc.f32 %v2679_v54  ;;  %v5187_v17 = vld [vmem:[%s4750_s17 + $0x18] sm:$0xff]  ;;  %v1174_v54 = vsub.f32 1.0, %v1150_v1 }
 0x181   : > { %4099 = vmatmul.mubr.msk.f32.gmra.mrb[52].mxu1 %vm520_vm8, %v4759_v55  ;;  %v4417_v22 = vcvt.f32.s32 %v4416_v21  ;;  %v2780_v23 = vsub.f32 1.0, %v2681_v18  ;;  %v2821_v30 = vrot.slane %v2681_v18, %v4717_v19  ;;  %v1514_v21 = vcombine.high %v5142_v15, %v5142_v15  ;;  %v5235_v15 = vld [vmem:[%s4750_s17 + $0x28] sm:$0xff] }
 0x182   : > { %2519 = vmatprep.mubr.f32.mxu1 %v5938_v3 }
 0x183   : > { %v2767_v55 = vrot.slane %v4417_v22, %v4714_v16  ;;  %v2789_v24 = vrot.slane %v2780_v23, %v4714_v16  ;;  %v2796_v25 = vadd.s32 1, %v4417_v22  ;;  %v2763_v43 = vrot.slane %v4417_v22, %v4717_v19  ;;  %v5206_v22 = vld [vmem:[%s4750_s17 + $0x20] sm:$0xff] }
 0x184   : > { %v2785_v47 = vrot.slane %v2780_v23, %v4717_v19 }
 0x185   : > { %4100 = vmatmul.mubr.msk.f32.gmra.mrb[54].mxu1 %vm520_vm8, %v4765_v56  ;;  %v2825_v56 = vrot.slane %v2681_v18, %v4714_v16  ;;  %vm2769_vm14 = vcmp.eq.s32.totalorder %v4682_v4, %v2767_v55  ;;  %vm2771_vm15 = vcmp.eq.s32.totalorder %v4720_v20, %v2767_v55  ;;  %v2804_v49 = vrot.slane %v2796_v25, %v4714_v16 }
 0x186   : > { %2525 = vmatprep.mubr.f32.mxu1 %v5938_v3  ;;  %vm2768_vm0 = vcmp.eq.s32.totalorder %v4682_v4, %v2763_v43  ;;  %v4119_v51 = vsel %vm2771_vm15, 1.0, %v5938_v3  ;;  %vm2770_vm1 = vcmp.eq.s32.totalorder %v4720_v20, %v2763_v43  ;;  %v2800_v29 = vrot.slane %v2796_v25, %v4717_v19 }
 0x187   : > { %v4116_v40 = vsel %vm2768_vm0, 1.0, %v5938_v3  ;;  %v2795_v42 = vmul.f32 %v4119_v51, %v2789_v24  ;;  %vm2806_vm2 = vcmp.eq.s32.totalorder %v4682_v4, %v2804_v49  ;;  %vm2808_vm3 = vcmp.eq.s32.totalorder %v4720_v20, %v2804_v49 }
 0x188   : > { %v4121_v26 = vsel %vm2806_vm2, 1.0, %v5938_v3  ;;  %v4123_v27 = vsel %vm2808_vm3, 1.0, %v5938_v3  ;;  %v4118_v44 = vsel %vm2770_vm1, 1.0, %v5938_v3  ;;  %v2792_v31 = vmul.f32 %v4116_v40, %v2785_v47 }
 0x189   : > { %4101 = vmatmul.mubr.msk.f32.gmra.mrb[56].mxu1 %vm520_vm8, %v4771_v57  ;;  %v4117_v57 = vsel %vm2769_vm14, 1.0, %v5938_v3  ;;  %v2829_v28 = vmul.f32 %v4121_v26, %v2825_v56  ;;  %v2794_v32 = vmul.f32 %v4118_v44, %v2785_v47  ;;  %vm2805_vm4 = vcmp.eq.s32.totalorder %v4682_v4, %v2800_v29 }
 0x18a   : > { %2531 = vmatprep.mubr.f32.mxu1 %v5938_v3  ;;  %v2793_v52 = vmul.f32 %v4117_v57, %v2789_v24  ;;  %vm2807_vm5 = vcmp.eq.s32.totalorder %v4720_v20, %v2800_v29  ;;  %v4120_v35 = vsel %vm2805_vm4, 1.0, %v5938_v3  ;;  %v5201_v18 = vadd.f32 1.0, %v4859_v46 }
 0x18b   : > { %v4122_v36 = vsel %vm2807_vm5, 1.0, %v5938_v3  ;;  %v2828_v38 = vmul.f32 %v4120_v35, %v2821_v30  ;;  %v1179_v55 = vrot.slane %v1174_v54, %v4717_v19  ;;  %v1215_v25 = vrot.slane %v1150_v1, %v4717_v19 }
 0x18c   : > { %v2833_v33 = vadd.f32 %v2829_v28, %v2793_v52  ;;  %v2830_v39 = vmul.f32 %v4122_v36, %v2821_v30  ;;  %v1183_v46 = vrot.slane %v1174_v54, %v4714_v16  ;;  %v1219_v43 = vrot.slane %v1150_v1, %v4714_v16 }
 0x18d   : > { %4102 = vmatmul.mubr.msk.f32.gmra.mrb[58].mxu1 %vm520_vm8, %v4777_v58  ;;  %v2831_v58 = vmul.f32 %v4123_v27, %v2825_v56 }
 0x18e   : > { %2537 = vmatprep.mubr.f32.mxu1 %v5938_v3  ;;  %v2834_v45 = vadd.f32 %v2830_v39, %v2794_v32 }
 0x18f   : > { %v2835_v50 = vadd.f32 %v2831_v58, %v2795_v42  ;;  %v1516_v42 = vadd.f32 %v1514_v21, %v5201_v18 }
 0x191   : > { %4103 = vmatmul.mubr.msk.f32.gmra.mrb[60].mxu1 %vm520_vm8, %v4783_v59  ;;  %v4313_v37 = vpack.c.bf16 %v2835_v50, %v2833_v33  ;;  %v2832_v59 = vadd.f32 %v2828_v38, %v2792_v31  ;;  %v1520_v50 = vfloor.f32 %v1516_v42 }
 0x192   : > { %2543 = vmatprep.mubr.f32.mxu1 %v5938_v3 }
 0x193   : > { %4314 = vmatprep.subr.bf16.mxu1 %v4313_v37  ;;  %v4315_v9 = vpack.c.bf16 %v2834_v45, %v2832_v59  ;;  %v4402_v45 = vtrunc.f32 %v1520_v50 }
 0x195   : > { %4104 = vmatmul.mubr.msk.f32.gmra.mrb[62].mxu1 %vm520_vm8, %v4789_v60  ;;  %v4399_v60 = vcvt.f32.s32 %v4398_v63 }
 0x196   : > { %2549 = vmatprep.mubr.f32.mxu1 %v5938_v3  ;;  %4316 = vmatpush1.bf16.msra.mxu1 %v4315_v9 }
 0x197   : > { %v1157_v41 = vrot.slane %v4399_v60, %v4717_v19  ;;  %v1161_v7 = vrot.slane %v4399_v60, %v4714_v16 }
 0x199   : > { %4105 = vmatmul.mubr.msk.f32.gmra.mrb[64].mxu1 %vm520_vm8, %v4795_v61  ;;  %v1190_v61 = vadd.s32 1, %v4399_v60  ;;  %vm1162_vm6 = vcmp.eq.s32.totalorder %v4682_v4, %v1157_v41  ;;  %vm1163_vm9 = vcmp.eq.s32.totalorder %v4682_v4, %v1161_v7  ;;  %vm1164_vm12 = vcmp.eq.s32.totalorder %v4720_v20, %v1157_v41 }
 0x19a   : > { %2900 = vmatprep.mubr.f32.mxu1 %v5938_v3  ;;  %vm1165_vm14 = vcmp.eq.s32.totalorder %v4720_v20, %v1161_v7  ;;  %v4004_v23 = vsel %vm1162_vm6, 1.0, %v5938_v3  ;;  %v4006_v56 = vsel %vm1164_vm12, 1.0, %v5938_v3  ;;  %v4005_v49 = vsel %vm1163_vm9, 1.0, %v5938_v3 }
 0x19b   : > { %v1194_v2 = vrot.slane %v1190_v61, %v4717_v19  ;;  %v1198_v13 = vrot.slane %v1190_v61, %v4714_v16  ;;  %v4007_v51 = vsel %vm1165_vm14, 1.0, %v5938_v3  ;;  %v1186_v27 = vmul.f32 %v4004_v23, %v1179_v55 }
 0x19c   : > { %v1188_v28 = vmul.f32 %v4006_v56, %v1179_v55  ;;  %v1187_v29 = vmul.f32 %v4005_v49, %v1183_v46  ;;  %v1189_v31 = vmul.f32 %v4007_v51, %v1183_v46  ;;  %v1522_v23 = vsub.f32 %v1516_v42, %v1520_v50 }
 0x19d   : > { %4124 = vmatmul.mubr.msk.f32.vlgmr.msra.gmra.mrb[66].mxu1 %vm520_vm8, %v5165_v0  ;;  %vm1199_vm7 = vcmp.eq.s32.totalorder %v4682_v4, %v1194_v2  ;;  %vm1200_vm10 = vcmp.eq.s32.totalorder %v4682_v4, %v1198_v13  ;;  %vm1201_vm13 = vcmp.eq.s32.totalorder %v4720_v20, %v1194_v2  ;;  %vm1202_vm15 = vcmp.eq.s32.totalorder %v4720_v20, %v1198_v13 }
 0x19e   : > { %2906 = vmatprep.mubr.f32.mxu1 %v5938_v3  ;;  %v4008_v24 = vsel %vm1199_vm7, 1.0, %v5938_v3  ;;  %v4010_v47 = vsel %vm1201_vm13, 1.0, %v5938_v3  ;;  %v4009_v57 = vsel %vm1200_vm10, 1.0, %v5938_v3  ;;  %v4011_v40 = vsel %vm1202_vm15, 1.0, %v5938_v3 }
 0x19f   : > { %v1222_v44 = vmul.f32 %v4008_v24, %v1215_v25  ;;  %v1224_v58 = vmul.f32 %v4010_v47, %v1215_v25  ;;  %v1223_v30 = vmul.f32 %v4009_v57, %v1219_v43  ;;  %v1225_v32 = vmul.f32 %v4011_v40, %v1219_v43 }
 0x1a0   : > { %v4403_v13 = vcvt.f32.s32 %v4402_v45  ;;  %v1546_v40 = vsub.f32 1.0, %v1522_v23 }
 0x1a1   : > { %4125 = vmatmul.mubr.msk.f32.gmra.mrb[68].mxu1 %vm520_vm8, %v5171_v8  ;;  %v5247_v35 = vadd.f32 %v1222_v44, %v1186_v27  ;;  %v5249_v37 = vadd.f32 %v1224_v58, %v1188_v28  ;;  %v5252_v38 = vadd.f32 %v1223_v30, %v1187_v29  ;;  %v5254_v39 = vadd.f32 %v1225_v32, %v1189_v31 }
 0x1a2   : > { %2912 = vmatprep.mubr.f32.mxu1 %v5938_v3  ;;  %v1562_v55 = vadd.s32 1, %v4403_v13  ;;  %v1529_v47 = vrot.slane %v4403_v13, %v4717_v19  ;;  %v1533_v42 = vrot.slane %v4403_v13, %v4714_v16  ;;  %v1551_v29 = vrot.slane %v1546_v40, %v4717_v19 }
 0x1a3   : > { %v1587_v30 = vrot.slane %v1522_v23, %v4717_v19 }
 0x1a4   : > { %v1566_v27 = vrot.slane %v1562_v55, %v4717_v19  ;;  %vm1534_vm0 = vcmp.eq.s32.totalorder %v4682_v4, %v1529_v47  ;;  %v1570_v28 = vrot.slane %v1562_v55, %v4714_v16  ;;  %vm1535_vm2 = vcmp.eq.s32.totalorder %v4682_v4, %v1533_v42 }
 0x1a5   : > { %4126 = vmatmul.mubr.msk.f32.gmra.mrb[70].mxu1 %vm520_vm8, %v5177_v62  ;;  %v4030_v50 = vsel %vm1534_vm0, 1.0, %v5938_v3  ;;  %vm1536_vm4 = vcmp.eq.s32.totalorder %v4720_v20, %v1529_v47  ;;  %vm1537_vm6 = vcmp.eq.s32.totalorder %v4720_v20, %v1533_v42 }
 0x1a6   : > { %2918 = vmatprep.mubr.f32.mxu1 %v5938_v3  ;;  %vm1571_vm1 = vcmp.eq.s32.totalorder %v4682_v4, %v1566_v27  ;;  %vm1572_vm3 = vcmp.eq.s32.totalorder %v4682_v4, %v1570_v28  ;;  %vm1573_vm5 = vcmp.eq.s32.totalorder %v4720_v20, %v1566_v27  ;;  %vm1574_vm7 = vcmp.eq.s32.totalorder %v4720_v20, %v1570_v28 }
 0x1a7   : > { %v4032_v13 = vsel %vm1536_vm4, 1.0, %v5938_v3  ;;  %v1558_v55 = vmul.f32 %v4030_v50, %v1551_v29 }
 0x1a8   : > { %v1560_v47 = vmul.f32 %v4032_v13, %v1551_v29 }
 0x1a9   : > { %4127 = vmatmul.mubr.msk.f32.gmra.mrb[72].mxu1 %vm520_vm8, %v5187_v17 }
 0x1aa   : > { %2924 = vmatprep.mubr.f32.mxu1 %v5938_v3 }
 0x1ad   : > { %4128 = vmatmul.mubr.msk.f32.gmra.mrb[74].mxu1 %vm520_vm8, %v5206_v22 }
 0x1ae   : > { %2930 = vmatprep.mubr.f32.mxu1 %v5938_v3 }
 0x1b1   : > { %4129 = vmatmul.mubr.msk.f32.gmra.mrb[76].mxu1 %vm520_vm8, %v5235_v15 }
 0x1b2   : > { %2936 = vmatprep.mubr.f32.mxu1 %v5938_v3 }
 0x1b5   : > { %4130 = vmatmul.mubr.msk.f32.gmra.mrb[78].mxu1 %vm520_vm8, %v5243_v34 }
 0x1b6   : > { %2942 = vmatprep.mubr.f32.mxu1 %v5938_v3 }
 0x1b9   : > { %4131 = vmatmul.mubr.msk.f32.gmra.mrb[80].mxu1 %vm520_vm8, %v5257_v48 }
 0x1ba   : > { %3665 = vmatprep.mubr.f32.mxu1 %v5938_v3 }
 0x20c   : > { %v5231_v52 = vpop.f32.mrb[16].mxu1 }
 0x20d   : > { %5955 = vst [vmem:[#allocation6_spill] sm:$0xff] %v5231_v52  ;;  %v5239_v26 = vpop.f32.mrb[17].mxu1 }
 0x20e   : > { %5956 = vst [vmem:[#allocation7_spill] sm:$0xff] %v5239_v26 }
 0x210   : > { %v1372_v33 = vpop.f32.mrb[18].mxu1 }
 0x211   : > { %v1374_v36 = vpop.f32.mrb[19].mxu1  ;;  %v1419_v9 = vmul.f32 %v1372_v33, %v5247_v35 }
 0x212   : > { %v1420_v61 = vmul.f32 %v1374_v36, %v5252_v38 }
 0x214   : > { %v1378_v59 = vpop.f32.mrb[20].mxu1 }
 0x215   : > { %v1421_v63 = vmul.f32 %v1378_v59, %v5249_v37  ;;  %v1380_v60 = vpop.f32.mrb[21].mxu1 }
 0x216   : > { %v1422_v1 = vmul.f32 %v1380_v60, %v5254_v39 }
 0x217   : > { %v4239_v41 = vpack.c.bf16 %v1421_v63, %v1419_v9  ;;  %v4034_v9 = vsel %vm1571_vm1, 1.0, %v5938_v3  ;;  %v1555_v63 = vrot.slane %v1546_v40, %v4714_v16 }
 0x218   : > { %v4237_v2 = vpack.c.bf16 %v1422_v1, %v1420_v61  ;;  %v1384_v7 = vpop.f32.mrb[22].mxu1  ;;  %v1591_v1 = vrot.slane %v1522_v23, %v4714_v16  ;;  %v4033_v23 = vsel %vm1537_vm6, 1.0, %v5938_v3 }
 0x219   : > { %v1386_v54 = vpop.f32.mrb[23].mxu1  ;;  %v1423_v24 = vmul.f32 %v1384_v7, %v5247_v35  ;;  %v4035_v7 = vsel %vm1572_vm3, 1.0, %v5938_v3  ;;  %v1561_v42 = vmul.f32 %v4033_v23, %v1555_v63 }
 0x21a   : > { %4238 = vmatprep.subr.bf16.mxu0 %v4237_v2  ;;  %v1424_v43 = vmul.f32 %v1386_v54, %v5252_v38  ;;  %v4031_v2 = vsel %vm1535_vm2, 1.0, %v5938_v3  ;;  %v1913_v54 = vadd.f32 %v5068_v11, %v4708_v12 }
 0x21b   : > { %4240 = vmatpush1.bf16.msra.mxu0 %v4239_v41 }
 0x21c   : > { %v1390_v21 = vpop.f32.mrb[24].mxu1  ;;  %v1915_v40 = vfloor.f32 %v1913_v54 }
 0x21d   : > { %v1425_v25 = vmul.f32 %v1390_v21, %v5249_v37  ;;  %v1392_v46 = vpop.f32.mrb[25].mxu1  ;;  %v4036_v21 = vsel %vm1573_vm5, 1.0, %v5938_v3 }
 0x21e   : > { %v1426_v56 = vmul.f32 %v1392_v46, %v5254_v39  ;;  %v1594_v46 = vmul.f32 %v4034_v9, %v1587_v30  ;;  %v1596_v11 = vmul.f32 %v4036_v21, %v1587_v30 }
 0x21f   : > { %v4243_v49 = vpack.c.bf16 %v1425_v25, %v1423_v24  ;;  %v4037_v24 = vsel %vm1574_vm7, 1.0, %v5938_v3 }
 0x220   : > { %v4241_v57 = vpack.c.bf16 %v1426_v56, %v1424_v43  ;;  %v1396_v51 = vpop.f32.mrb[26].mxu1  ;;  %v1559_v43 = vmul.f32 %v4031_v2, %v1555_v63  ;;  %v1595_v56 = vmul.f32 %v4035_v7, %v1591_v1  ;;  %v1597_v28 = vmul.f32 %v4037_v24, %v1591_v1 }
 0x221   : > { %v1398_v44 = vpop.f32.mrb[27].mxu1  ;;  %v1427_v31 = vmul.f32 %v1396_v51, %v5247_v35  ;;  %v5306_v29 = vadd.f32 %v1596_v11, %v1560_v47  ;;  %v1917_v1 = vsub.f32 %v1913_v54, %v1915_v40 }
 0x222   : > { %4242 = vmatprep.subr.bf16.mxu0 %v4241_v57  ;;  %v1428_v36 = vmul.f32 %v1398_v44, %v5252_v38 }
 0x223   : > { %4244 = vmatpush1.bf16.msra.mxu0 %v4243_v49 }
 0x224   : > { %v1402_v58 = vpop.f32.mrb[28].mxu1 }
 0x225   : > { %v1429_v32 = vmul.f32 %v1402_v58, %v5249_v37  ;;  %v1404_v33 = vpop.f32.mrb[29].mxu1 }
 0x226   : > { %v1430_v59 = vmul.f32 %v1404_v33, %v5254_v39  ;;  %v5304_v33 = vadd.f32 %v1594_v46, %v1558_v55  ;;  %v2016_v55 = vsub.f32 1.0, %v1917_v1 }
 0x227   : > { %v4247_v45 = vpack.c.bf16 %v1429_v32, %v1427_v31 }
 0x228   : > { %v4245_v60 = vpack.c.bf16 %v1430_v59, %v1428_v36  ;;  %v1408_v61 = vpop.f32.mrb[30].mxu1  ;;  %v5308_v36 = vadd.f32 %v1595_v56, %v1559_v43 }
 0x229   : > { %v1410_v41 = vpop.f32.mrb[31].mxu1  ;;  %v1431_v49 = vmul.f32 %v1408_v61, %v5247_v35  ;;  %v4408_v35 = vtrunc.f32 %v1915_v40 }
 0x22a   : > { %4246 = vmatprep.subr.bf16.mxu0 %v4245_v60  ;;  %v1432_v27 = vmul.f32 %v1410_v41, %v5252_v38  ;;  %v4028_v38 = vld [vmem:[%s5934_s2 + $0x8] sm:$0xf] }
 0x22b   : > { %4248 = vmatpush1.bf16.msra.mxu0 %v4247_v45  ;;  %v4409_v9 = vcvt.f32.s32 %v4408_v35 }
 0x22c   : > { %v1414_v25 = vpop.f32.mrb[32].mxu1 }
 0x22d   : > { %v1433_v57 = vmul.f32 %v1414_v25, %v5249_v37  ;;  %v1416_v51 = vpop.f32.mrb[33].mxu1  ;;  %v5310_v37 = vadd.f32 %v1597_v28, %v1561_v42  ;;  %v2003_v7 = vrot.slane %v4409_v9, %v4714_v16  ;;  %v2032_v21 = vadd.s32 1, %v4409_v9 }
 0x22e   : > { %v1434_v44 = vmul.f32 %v1416_v51, %v5254_v39 }
 0x22f   : > { %v4251_v58 = vpack.c.bf16 %v1433_v57, %v1431_v49  ;;  %vm2005_vm9 = vcmp.eq.s32.totalorder %v4682_v4, %v2003_v7  ;;  %vm2007_vm10 = vcmp.eq.s32.totalorder %v4720_v20, %v2003_v7  ;;  %v2040_v54 = vrot.slane %v2032_v21, %v4714_v16 }
 0x230   : > { %v4249_v31 = vpack.c.bf16 %v1434_v44, %v1432_v27  ;;  %v1744_v32 = vpop.f32.mrb[34].mxu1  ;;  %v2025_v49 = vrot.slane %v2016_v55, %v4714_v16  ;;  %v4065_v11 = vsel %vm2005_vm9, 1.0, %v5938_v3  ;;  %v4067_v40 = vsel %vm2007_vm10, 1.0, %v5938_v3 }
 0x231   : > { %v1746_v50 = vpop.f32.mrb[35].mxu1  ;;  %v1791_v30 = vmul.f32 %v1744_v32, %v5304_v33  ;;  %v1999_v27 = vrot.slane %v4409_v9, %v4717_v19  ;;  %vm2042_vm12 = vcmp.eq.s32.totalorder %v4682_v4, %v2040_v54  ;;  %vm2044_vm13 = vcmp.eq.s32.totalorder %v4720_v20, %v2040_v54 }
 0x232   : > { %4250 = vmatprep.subr.bf16.mxu0 %v4249_v31  ;;  %v1792_v63 = vmul.f32 %v1746_v50, %v5308_v36  ;;  %v2036_v42 = vrot.slane %v2032_v21, %v4717_v19  ;;  %v2029_v28 = vmul.f32 %v4065_v11, %v2025_v49  ;;  %v2061_v31 = vrot.slane %v1917_v1, %v4714_v16 }
 0x233   : > { %4252 = vmatpush1.bf16.msra.mxu0 %v4251_v58  ;;  %v2031_v58 = vmul.f32 %v4067_v40, %v2025_v49  ;;  %v4069_v50 = vsel %vm2042_vm12, 1.0, %v5938_v3  ;;  %v4071_v35 = vsel %vm2044_vm13, 1.0, %v5938_v3  ;;  %vm2004_vm14 = vcmp.eq.s32.totalorder %v4682_v4, %v1999_v27 }
 0x234   : > { %v1750_v39 = vpop.f32.mrb[36].mxu1  ;;  %vm2006_vm15 = vcmp.eq.s32.totalorder %v4720_v20, %v1999_v27  ;;  %vm2041_vm0 = vcmp.eq.s32.totalorder %v4682_v4, %v2036_v42  ;;  %vm2043_vm1 = vcmp.eq.s32.totalorder %v4720_v20, %v2036_v42  ;;  %v2021_v9 = vrot.slane %v2016_v55, %v4717_v19 }
 0x235   : > { %v1793_v59 = vmul.f32 %v1750_v39, %v5306_v29  ;;  %v1752_v45 = vpop.f32.mrb[37].mxu1  ;;  %v2067_v21 = vmul.f32 %v4071_v35, %v2061_v31 }
 0x236   : > { %v1794_v60 = vmul.f32 %v1752_v45, %v5310_v37  ;;  %4029 = vmatmul.mubr.msk.f32.vlgmr.msra.gmra.mrb[16].mxu0 %vm971_vm11, %v4028_v38 }
 0x237   : > { %v4259_v61 = vpack.c.bf16 %v1793_v59, %v1791_v30  ;;  %1876 = vmatprep.mubr.f32.mxu0 %v5938_v3 }
 0x238   : > { %v4257_v41 = vpack.c.bf16 %v1794_v60, %v1792_v63  ;;  %v1756_v2 = vpop.f32.mrb[38].mxu1  ;;  %v2057_v63 = vrot.slane %v1917_v1, %v4717_v19 }
 0x239   : > { %v1758_v13 = vpop.f32.mrb[39].mxu1  ;;  %v1795_v24 = vmul.f32 %v1756_v2, %v5304_v33  ;;  %v4066_v2 = vsel %vm2006_vm15, 1.0, %v5938_v3 }
 0x23a   : > { %4258 = vmatprep.subr.bf16.mxu0 %v4257_v41  ;;  %v1796_v43 = vmul.f32 %v1758_v13, %v5308_v36  ;;  %v4064_v41 = vsel %vm2004_vm14, 1.0, %v5938_v3  ;;  %v2030_v55 = vmul.f32 %v4066_v2, %v2021_v9 }
 0x23b   : > { %4260 = vmatpush1.bf16.msra.mxu0 %v4259_v61  ;;  %v2065_v61 = vmul.f32 %v4069_v50, %v2061_v31 }
 0x23c   : > { %v1762_v23 = vpop.f32.mrb[40].mxu1 }
 0x23d   : > { %v1797_v25 = vmul.f32 %v1762_v23, %v5306_v29  ;;  %v1764_v46 = vpop.f32.mrb[41].mxu1  ;;  %v4068_v23 = vsel %vm2041_vm0, 1.0, %v5938_v3 }
 0x23e   : > { %v1798_v56 = vmul.f32 %v1764_v46, %v5310_v37  ;;  %v2028_v46 = vmul.f32 %v4064_v41, %v2021_v9  ;;  %v2064_v54 = vmul.f32 %v4068_v23, %v2057_v63 }
 0x23f   : > { %v4263_v47 = vpack.c.bf16 %v1797_v25, %v1795_v24  ;;  %v4070_v24 = vsel %vm2043_vm1, 1.0, %v5938_v3 }
 0x240   : > { %v4261_v57 = vpack.c.bf16 %v1798_v56, %v1796_v43  ;;  %v1768_v51 = vpop.f32.mrb[42].mxu1  ;;  %v2066_v1 = vmul.f32 %v4070_v24, %v2057_v63  ;;  %v2069_v56 = vadd.f32 %v2065_v61, %v2029_v28  ;;  %v4054_v28 = vld [vmem:[%s5934_s2 + $0xc] sm:$0xf] }
 0x241   : > { %v1770_v44 = vpop.f32.mrb[43].mxu1  ;;  %v1799_v38 = vmul.f32 %v1768_v51, %v5304_v33 }
 0x242   : > { %4262 = vmatprep.subr.bf16.mxu0 %v4261_v57  ;;  %v1800_v59 = vmul.f32 %v1770_v44, %v5308_v36  ;;  %v2068_v44 = vadd.f32 %v2064_v54, %v2028_v46  ;;  %v2070_v42 = vadd.f32 %v2066_v1, %v2030_v55 }
 0x243   : > { %4264 = vmatpush1.bf16.msra.mxu0 %v4263_v47  ;;  %v2071_v47 = vadd.f32 %v2067_v21, %v2031_v58 }
 0x244   : > { %v1774_v32 = vpop.f32.mrb[44].mxu1  ;;  %v4275_v58 = vpack.c.bf16 %v2070_v42, %v2068_v44 }
 0x245   : > { %v1801_v39 = vmul.f32 %v1774_v32, %v5306_v29  ;;  %v1776_v30 = vpop.f32.mrb[45].mxu1  ;;  %v4273_v32 = vpack.c.bf16 %v2071_v47, %v2069_v56 }
 0x246   : > { %v1802_v45 = vmul.f32 %v1776_v30, %v5310_v37 }
 0x247   : > { %v4267_v60 = vpack.c.bf16 %v1801_v39, %v1799_v38 }
 0x248   : > { %v4265_v7 = vpack.c.bf16 %v1802_v45, %v1800_v59  ;;  %v1780_v13 = vpop.f32.mrb[46].mxu1 }
 0x249   : > { %v1782_v25 = vpop.f32.mrb[47].mxu1  ;;  %v1803_v49 = vmul.f32 %v1780_v13, %v5304_v33  ;;  %v5388_v33 = vrot.slane %v5063_v14, %v4686_v6 }
 0x24a   : > { %4266 = vmatprep.subr.bf16.mxu0 %v4265_v7  ;;  %v1804_v11 = vmul.f32 %v1782_v25, %v5308_v36 }
 0x24b   : > { %4268 = vmatpush1.bf16.msra.mxu0 %v4267_v60 }
 0x24c   : > { %v1786_v43 = vpop.f32.mrb[48].mxu1 }
 0x24d   : > { %v1805_v57 = vmul.f32 %v1786_v43, %v5306_v29  ;;  %v1788_v51 = vpop.f32.mrb[49].mxu1  ;;  %v2279_v29 = vcombine.high %v5388_v33, %v5388_v33 }
 0x24e   : > { %v1806_v40 = vmul.f32 %v1788_v51, %v5310_v37 }
 0x24f   : > { %v4271_v27 = vpack.c.bf16 %v1805_v57, %v1803_v49  ;;  %v2281_v36 = vadd.f32 %v2279_v29, %v5201_v18 }
 0x250   : > { %v4269_v31 = vpack.c.bf16 %v1806_v40, %v1804_v11  ;;  %v2509_v49 = vpop.f32.mrb[50].mxu1 }
 0x251   : > { %v2285_v37 = vfloor.f32 %v2281_v36  ;;  %v2511_v11 = vpop.f32.mrb[51].mxu1 }
 0x252   : > { %4270 = vmatprep.subr.bf16.mxu0 %v4269_v31 }
 0x253   : > { %4272 = vmatpush1.bf16.msra.mxu0 %v4271_v27  ;;  %v4410_v50 = vtrunc.f32 %v2285_v37  ;;  %v2287_v39 = vsub.f32 %v2281_v36, %v2285_v37 }
 0x254   : > { %4274 = vmatprep.subr.bf16.mxu0 %v4273_v32  ;;  %v2515_v32 = vpop.f32.mrb[52].mxu1 }
 0x255   : > { %v4411_v35 = vcvt.f32.s32 %v4410_v50  ;;  %v2311_v14 = vsub.f32 1.0, %v2287_v39  ;;  %v2352_v60 = vrot.slane %v2287_v39, %v4717_v19  ;;  %v2356_v7 = vrot.slane %v2287_v39, %v4714_v16  ;;  %v2517_v29 = vpop.f32.mrb[53].mxu1 }
 0x256   : > { %4055 = vmatmul.mubr.msk.f32.vlgmr.msra.gmra.mrb[16].mxu0 %vm971_vm11, %v4054_v28 }
 0x257   : > { %4276 = vmatpush1.bf16.msra.mxu0 %v4275_v58  ;;  %2136 = vmatprep.mubr.f32.mxu0 %v5938_v3  ;;  %v2327_v38 = vadd.s32 1, %v4411_v35  ;;  %v2294_v30 = vrot.slane %v4411_v35, %v4717_v19  ;;  %v2298_v45 = vrot.slane %v4411_v35, %v4714_v16  ;;  %v2316_v63 = vrot.slane %v2311_v14, %v4717_v19 }
 0x258   : > { %v2320_v2 = vrot.slane %v2311_v14, %v4714_v16  ;;  %v2521_v35 = vpop.f32.mrb[54].mxu1 }
 0x259   : > { %v2331_v59 = vrot.slane %v2327_v38, %v4717_v19  ;;  %v2335_v9 = vrot.slane %v2327_v38, %v4714_v16  ;;  %vm2299_vm2 = vcmp.eq.s32.totalorder %v4682_v4, %v2294_v30  ;;  %vm2300_vm4 = vcmp.eq.s32.totalorder %v4682_v4, %v2298_v45  ;;  %v2523_v38 = vpop.f32.mrb[55].mxu1 }
 0x25a   : > { %4072 = vmatmul.mubr.msk.f32.vlgmr.msra.gmra.mrb[18].mxu0 %vm520_vm8, %v5165_v0  ;;  %v4082_v61 = vsel %vm2299_vm2, 1.0, %v5938_v3  ;;  %v4083_v13 = vsel %vm2300_vm4, 1.0, %v5938_v3  ;;  %vm2301_vm6 = vcmp.eq.s32.totalorder %v4720_v20, %v2294_v30  ;;  %vm2302_vm9 = vcmp.eq.s32.totalorder %v4720_v20, %v2298_v45 }
 0x25b   : > { %2142 = vmatprep.mubr.f32.mxu0 %v5938_v3  ;;  %vm2336_vm3 = vcmp.eq.s32.totalorder %v4682_v4, %v2331_v59  ;;  %vm2337_vm5 = vcmp.eq.s32.totalorder %v4682_v4, %v2335_v9  ;;  %v2323_v23 = vmul.f32 %v4082_v61, %v2316_v63  ;;  %v2324_v25 = vmul.f32 %v4083_v13, %v2320_v2 }
 0x25c   : > { %v4086_v41 = vsel %vm2336_vm3, 1.0, %v5938_v3  ;;  %v4087_v21 = vsel %vm2337_vm5, 1.0, %v5938_v3  ;;  %vm2338_vm7 = vcmp.eq.s32.totalorder %v4720_v20, %v2331_v59  ;;  %v4084_v1 = vsel %vm2301_vm6, 1.0, %v5938_v3  ;;  %v2527_v59 = vpop.f32.mrb[56].mxu1 }
 0x25d   : > { %v2359_v24 = vmul.f32 %v4086_v41, %v2352_v60  ;;  %v2360_v46 = vmul.f32 %v4087_v21, %v2356_v7  ;;  %v4088_v43 = vsel %vm2338_vm7, 1.0, %v5938_v3  ;;  %vm2339_vm10 = vcmp.eq.s32.totalorder %v4720_v20, %v2335_v9  ;;  %v2529_v9 = vpop.f32.mrb[57].mxu1 }
 0x25e   : > { %4073 = vmatmul.mubr.msk.f32.gmra.mrb[20].mxu0 %vm520_vm8, %v5171_v8  ;;  %v2325_v56 = vmul.f32 %v4084_v1, %v2316_v63  ;;  %v2361_v47 = vmul.f32 %v4088_v43, %v2352_v60  ;;  %v4085_v57 = vsel %vm2302_vm9, 1.0, %v5938_v3  ;;  %v4089_v44 = vsel %vm2339_vm10, 1.0, %v5938_v3  ;;  %v4499_v60 = vld [vmem:[%s5935_s3] sm:$0x3] }
 0x25f   : > { %2148 = vmatprep.mubr.f32.mxu0 %v5938_v3  ;;  %v2363_v55 = vadd.f32 %v2359_v24, %v2323_v23  ;;  %v2364_v54 = vadd.f32 %v2360_v46, %v2324_v25  ;;  %v2326_v27 = vmul.f32 %v4085_v57, %v2320_v2  ;;  %v2362_v31 = vmul.f32 %v4089_v44, %v2356_v7 }
 0x260   : > { %v2365_v40 = vadd.f32 %v2361_v47, %v2325_v56  ;;  %v5442_v61 = vadd.f32 2.0, %v4499_v60  ;;  %v5446_v41 = vrot.slane %v5099_v5, %v4686_v6  ;;  %v2533_v7 = vpop.f32.mrb[58].mxu1 }
 0x261   : > { %v5416_v51 = vmul.f32 %v2509_v49, %v2363_v55  ;;  %v5419_v42 = vmul.f32 %v2511_v11, %v2364_v54  ;;  %v2366_v28 = vadd.f32 %v2362_v31, %v2326_v27  ;;  %v5429_v39 = vmul.f32 %v2521_v35, %v2363_v55  ;;  %v2535_v13 = vpop.f32.mrb[59].mxu1 }
 0x262   : > { %4074 = vmatmul.mubr.msk.f32.gmra.mrb[22].mxu0 %vm520_vm8, %v5177_v62  ;;  %v5421_v58 = vmul.f32 %v2515_v32, %v2365_v40  ;;  %v5431_v30 = vmul.f32 %v2523_v38, %v2364_v54  ;;  %v5433_v45 = vmul.f32 %v2527_v59, %v2365_v40  ;;  %5957 = vst [vmem:[#allocation8_spill] sm:$0xff] %v5442_v61  ;;  %5958 = vst [vmem:[#allocation9_spill] sm:$0xff] %v5446_v41 }
 0x263   : > { %2154 = vmatprep.mubr.f32.mxu0 %v5938_v3  ;;  %v5423_v36 = vmul.f32 %v2517_v29, %v2366_v28  ;;  %v5435_v14 = vmul.f32 %v2529_v9, %v2366_v28  ;;  %v2667_v21 = vadd.f32 %v5446_v41, %v5442_v61  ;;  %v5452_v23 = vmul.f32 %v2533_v7, %v2363_v55 }
 0x264   : > { %v5454_v24 = vmul.f32 %v2535_v13, %v2364_v54  ;;  %v2539_v46 = vpop.f32.mrb[60].mxu1 }
 0x265   : > { %v2678_v25 = vfloor.f32 %v2667_v21  ;;  %v5456_v1 = vmul.f32 %v2539_v46, %v2365_v40  ;;  %v2541_v43 = vpop.f32.mrb[61].mxu1 }
 0x266   : > { %4075 = vmatmul.mubr.msk.f32.gmra.mrb[24].mxu0 %vm520_vm8, %v5187_v17  ;;  %v5458_v5 = vmul.f32 %v2541_v43, %v2366_v28 }
 0x267   : > { %2160 = vmatprep.mubr.f32.mxu0 %v5938_v3  ;;  %v4414_v56 = vtrunc.f32 %v2678_v25  ;;  %v2680_v44 = vsub.f32 %v2667_v21, %v2678_v25 }
 0x268   : > { %v2545_v11 = vpop.f32.mrb[62].mxu1 }
 0x269   : > { %v4415_v49 = vcvt.f32.s32 %v4414_v56  ;;  %v2547_v27 = vpop.f32.mrb[63].mxu1  ;;  %v5464_v32 = vmul.f32 %v2545_v11, %v2363_v55  ;;  %v2704_v38 = vsub.f32 1.0, %v2680_v44  ;;  %v2745_v43 = vrot.slane %v2680_v44, %v4717_v19 }
 0x26a   : > { %4076 = vmatmul.mubr.msk.f32.gmra.mrb[26].mxu0 %vm520_vm8, %v5206_v22  ;;  %v5466_v29 = vmul.f32 %v2547_v27, %v2364_v54  ;;  %v2749_v47 = vrot.slane %v2680_v44, %v4714_v16 }
 0x26b   : > { %2166 = vmatprep.mubr.f32.mxu0 %v5938_v3  ;;  %v2720_v31 = vadd.s32 1, %v4415_v49  ;;  %v2687_v35 = vrot.slane %v4415_v49, %v4717_v19  ;;  %v2691_v9 = vrot.slane %v4415_v49, %v4714_v16  ;;  %v2709_v55 = vrot.slane %v2704_v38, %v4717_v19 }
 0x26c   : > { %v2551_v60 = vpop.f32.mrb[64].mxu1  ;;  %v2713_v49 = vrot.slane %v2704_v38, %v4714_v16 }
 0x26d   : > { %v2724_v59 = vrot.slane %v2720_v31, %v4717_v19  ;;  %v2728_v7 = vrot.slane %v2720_v31, %v4714_v16  ;;  %v5472_v13 = vmul.f32 %v2551_v60, %v2365_v40  ;;  %v2553_v46 = vpop.f32.mrb[65].mxu1  ;;  %vm2692_vm12 = vcmp.eq.s32.totalorder %v4682_v4, %v2687_v35 }
 0x26e   : > { %4077 = vmatmul.mubr.msk.f32.gmra.mrb[28].mxu0 %vm520_vm8, %v5235_v15  ;;  %v5477_v54 = vmul.f32 %v2553_v46, %v2366_v28  ;;  %v4108_v21 = vsel %vm2692_vm12, 1.0, %v5938_v3  ;;  %vm2693_vm14 = vcmp.eq.s32.totalorder %v4682_v4, %v2691_v9  ;;  %vm2694_vm0 = vcmp.eq.s32.totalorder %v4720_v20, %v2687_v35 }
 0x26f   : > { %2172 = vmatprep.mubr.f32.mxu0 %v5938_v3  ;;  %vm2729_vm13 = vcmp.eq.s32.totalorder %v4682_v4, %v2724_v59  ;;  %v2716_v40 = vmul.f32 %v4108_v21, %v2709_v55  ;;  %v4109_v31 = vsel %vm2693_vm14, 1.0, %v5938_v3  ;;  %vm2730_vm15 = vcmp.eq.s32.totalorder %v4682_v4, %v2728_v7 }
 0x270   : > { %v4112_v25 = vsel %vm2729_vm13, 1.0, %v5938_v3  ;;  %v2902_v28 = vpop.f32.mrb[66].mxu1  ;;  %v2717_v60 = vmul.f32 %v4109_v31, %v2713_v49  ;;  %v4113_v46 = vsel %vm2730_vm15, 1.0, %v5938_v3  ;;  %v4110_v38 = vsel %vm2694_vm0, 1.0, %v5938_v3 }
 0x271   : > { %v2752_v27 = vmul.f32 %v4112_v25, %v2745_v43  ;;  %v2904_v56 = vpop.f32.mrb[67].mxu1  ;;  %vm2731_vm1 = vcmp.eq.s32.totalorder %v4720_v20, %v2724_v59  ;;  %vm2695_vm2 = vcmp.eq.s32.totalorder %v4720_v20, %v2691_v9  ;;  %v2753_v25 = vmul.f32 %v4113_v46, %v2749_v47 }
 0x272   : > { %4078 = vmatmul.mubr.msk.f32.gmra.mrb[30].mxu0 %vm520_vm8, %v5243_v34  ;;  %v2718_v11 = vmul.f32 %v4110_v38, %v2709_v55  ;;  %v4114_v57 = vsel %vm2731_vm1, 1.0, %v5938_v3  ;;  %v4111_v31 = vsel %vm2695_vm2, 1.0, %v5938_v3  ;;  %vm2732_vm3 = vcmp.eq.s32.totalorder %v4720_v20, %v2728_v7 }
 0x273   : > { %2178 = vmatprep.mubr.f32.mxu0 %v5938_v3  ;;  %v2756_v21 = vadd.f32 %v2752_v27, %v2716_v40  ;;  %v2754_v63 = vmul.f32 %v4114_v57, %v2745_v43  ;;  %v2719_v37 = vmul.f32 %v4111_v31, %v2713_v49  ;;  %v2757_v44 = vadd.f32 %v2753_v25, %v2717_v60 }
 0x274   : > { %v2908_v2 = vpop.f32.mrb[68].mxu1  ;;  %v4115_v35 = vsel %vm2732_vm3, 1.0, %v5938_v3 }
 0x275   : > { %v2910_v40 = vpop.f32.mrb[69].mxu1  ;;  %v5500_v27 = vmul.f32 %v2902_v28, %v2756_v21  ;;  %v2758_v59 = vadd.f32 %v2754_v63, %v2718_v11  ;;  %v2755_v50 = vmul.f32 %v4115_v35, %v2749_v47  ;;  %v5502_v9 = vmul.f32 %v2904_v56, %v2757_v44 }
 0x276   : > { %4079 = vmatmul.mubr.msk.f32.gmra.mrb[32].mxu0 %vm520_vm8, %v5257_v48 }
 0x277   : > { %2270 = vmatprep.mubr.f32.mxu0 %v5938_v3  ;;  %v5504_v55 = vmul.f32 %v2908_v2, %v2758_v59  ;;  %v2759_v46 = vadd.f32 %v2755_v50, %v2719_v37 }
 0x278   : > { %v2914_v38 = vpop.f32.mrb[70].mxu1 }
 0x279   : > { %v2916_v26 = vpop.f32.mrb[71].mxu1  ;;  %v5508_v43 = vmul.f32 %v2910_v40, %v2759_v46  ;;  %v5510_v7 = vmul.f32 %v2914_v38, %v2756_v21 }
 0x27a   : > { %v5514_v28 = vmul.f32 %v2916_v26, %v2757_v44 }
 0x27c   : > { %v2920_v63 = vpop.f32.mrb[72].mxu1 }
 0x27d   : > { %v5516_v47 = vmul.f32 %v2920_v63, %v2758_v59  ;;  %v2922_v2 = vpop.f32.mrb[73].mxu1 }
 0x27e   : > { %v5518_v37 = vmul.f32 %v2922_v2, %v2759_v46  ;;  %v4489_v2 = vld [vmem:[%s4691_s11 + $0x20] ss:$8 sps:$4 sm:$0x33]  }
 0x280   : > { %v2926_v11 = vpop.f32.mrb[74].mxu1 }
 0x281   : > { %v2928_v60 = vpop.f32.mrb[75].mxu1  ;;  %v5524_v25 = vmul.f32 %v2926_v11, %v2756_v21  ;;  %v5538_v11 = vrot.slane %v4489_v2, %v4686_v6 }
 0x282   : > { %v5526_v31 = vmul.f32 %v2928_v60, %v2757_v44 }
 0x283   : > { %5959 = vst [vmem:[#allocation10_spill] sm:$0xff] %v5524_v25  ;;  %5962 = vst [vmem:[#allocation13_spill] sm:$0xff] %v5538_v11 }
 0x284   : > { %5960 = vst [vmem:[#allocation11_spill] sm:$0xff] %v5526_v31  ;;  %v2932_v26 = vpop.f32.mrb[76].mxu1 }
 0x285   : > { %v5528_v35 = vmul.f32 %v2932_v26, %v2758_v59  ;;  %v2934_v40 = vpop.f32.mrb[77].mxu1  ;;  %v3433_v26 = vcombine.high %v5538_v11, %v5538_v11 }
 0x286   : > { %v5530_v38 = vmul.f32 %v2934_v40, %v2759_v46 }
 0x287   : > { %5961 = vst [vmem:[#allocation12_spill] sm:$0xff] %v5528_v35  ;;  %v3440_v52 = vrot.slane %v3433_v26, %v4686_v6 }
 0x288   : > { %v2938_v56 = vpop.f32.mrb[78].mxu1 }
 0x289   : > { %v2940_v57 = vpop.f32.mrb[79].mxu1  ;;  %v5540_v60 = vmul.f32 %v2938_v56, %v2756_v21  ;;  %v3442_v2 = vadd.f32 %v3440_v52, %v4869_v53  ;;  %v5967_v52 = vmov 0.0  }
 0x28a   : > { %v5544_v49 = vmul.f32 %v2940_v57, %v2757_v44 }
 0x28b   : > { %5963 = vst [vmem:[#allocation14_spill] sm:$0xff] %v5540_v60  ;;  %v3444_v56 = vfloor.f32 %v3442_v2 }
 0x28c   : > { %5964 = vst [vmem:[#allocation15_spill] sm:$0xff] %v5544_v49  ;;  %v2944_v40 = vpop.f32.mrb[80].mxu1 }
 0x28d   : > { %v5546_v3 = vmul.f32 %v2944_v40, %v2758_v59  ;;  %v2946_v63 = vpop.f32.mrb[81].mxu1  ;;  %v3446_v61 = vsub.f32 %v3442_v2, %v3444_v56  ;;  %v4424_v44 = vtrunc.f32 %v3444_v56 }
 0x28e   : > { %v5549_v41 = vmul.f32 %v2946_v63, %v2759_v46 }
 0x28f   : > { %5965 = vst [vmem:[#allocation16_spill] sm:$0xff] %v5546_v3  ;;  %v4425_v57 = vcvt.f32.s32 %v4424_v44  ;;  %v3545_v11 = vsub.f32 1.0, %v3446_v61  ;;  %v3590_v63 = vrot.slane %v3446_v61, %v4714_v16 }
 0x290   : > { %5966 = vst [vmem:[#allocation17_spill] sm:$0xff] %v5549_v41 }
 0x291   : > { %v3532_v59 = vrot.slane %v4425_v57, %v4714_v16  ;;  %v3554_v40 = vrot.slane %v3545_v11, %v4714_v16  ;;  %v3561_v26 = vadd.s32 1, %v4425_v57  ;;  %v3528_v46 = vrot.slane %v4425_v57, %v4717_v19 }
 0x292   : > { %v3550_v50 = vrot.slane %v3545_v11, %v4717_v19 }
 0x293   : > { %vm3534_vm4 = vcmp.eq.s32.totalorder %v4682_v4, %v3532_v59  ;;  %vm3536_vm5 = vcmp.eq.s32.totalorder %v4720_v20, %v3532_v59  ;;  %v3569_v53 = vrot.slane %v3561_v26, %v4714_v16  ;;  %vm3533_vm6 = vcmp.eq.s32.totalorder %v4682_v4, %v3528_v46 }
 0x294   : > { %v4169_v2 = vsel %vm3534_vm4, 1.0, %v5967_v52  ;;  %v4171_v56 = vsel %vm3536_vm5, 1.0, %v5967_v52  ;;  %vm3535_vm7 = vcmp.eq.s32.totalorder %v4720_v20, %v3528_v46  ;;  %v4168_v44 = vsel %vm3533_vm6, 1.0, %v5967_v52 }
 0x295   : > { %v3558_v57 = vmul.f32 %v4169_v2, %v3554_v40  ;;  %v3560_v21 = vmul.f32 %v4171_v56, %v3554_v40  ;;  %vm3571_vm9 = vcmp.eq.s32.totalorder %v4682_v4, %v3569_v53  ;;  %vm3573_vm10 = vcmp.eq.s32.totalorder %v4720_v20, %v3569_v53 }
 0x296   : > { %v4173_v11 = vsel %vm3571_vm9, 1.0, %v5967_v52  ;;  %v4175_v59 = vsel %vm3573_vm10, 1.0, %v5967_v52  ;;  %v4170_v6 = vsel %vm3535_vm7, 1.0, %v5967_v52  ;;  %v3565_v49 = vrot.slane %v3561_v26, %v4717_v19 }
 0x297   : > { %v3594_v60 = vmul.f32 %v4173_v11, %v3590_v63  ;;  %v3596_v3 = vmul.f32 %v4175_v59, %v3590_v63  ;;  %v3586_v46 = vrot.slane %v3446_v61, %v4717_v19  ;;  %v3557_v41 = vmul.f32 %v4168_v44, %v3550_v50 }
 0x298   : > { %v3559_v25 = vmul.f32 %v4170_v6, %v3550_v50  ;;  %vm3570_vm12 = vcmp.eq.s32.totalorder %v4682_v4, %v3565_v49  ;;  %vm3572_vm13 = vcmp.eq.s32.totalorder %v4720_v20, %v3565_v49 }
 0x299   : > { %v3598_v2 = vadd.f32 %v3594_v60, %v3558_v57  ;;  %v3600_v40 = vadd.f32 %v3596_v3, %v3560_v21  ;;  %v4172_v53 = vsel %vm3570_vm12, 1.0, %v5967_v52  ;;  %v4174_v56 = vsel %vm3572_vm13, 1.0, %v5967_v52 }
 0x29a   : > { %v3593_v31 = vmul.f32 %v4172_v53, %v3586_v46  ;;  %v3595_v11 = vmul.f32 %v4174_v56, %v3586_v46  ;;  %v1903_v3 = vadd.f32 %v5388_v33, %v5201_v18 }
 0x29b   : > { %v4353_v35 = vpack.c.bf16 %v3600_v40, %v3598_v2 }
 0x29c   : > { %v3597_v63 = vadd.f32 %v3593_v31, %v3557_v41  ;;  %v3599_v26 = vadd.f32 %v3595_v11, %v3559_v25  ;;  %v1914_v6 = vfloor.f32 %v1903_v3 }
 0x29d   : > { %4354 = vmatprep.subr.bf16.mxu1 %v4353_v35 }
 0x29e   : > { %v4355_v59 = vpack.c.bf16 %v3599_v26, %v3597_v63  ;;  %v4406_v61 = vtrunc.f32 %v1914_v6  ;;  %v1916_v18 = vsub.f32 %v1903_v3, %v1914_v6 }
 0x2a0   : > { %4356 = vmatpush1.bf16.msra.mxu1 %v4355_v59  ;;  %v1981_v49 = vrot.slane %v1916_v18, %v4717_v19  ;;  %v1985_v31 = vrot.slane %v1916_v18, %v4714_v16 }
 0x2a3   : > { %4176 = vmatmul.mubr.msk.f32.vlgmr.msra.gmra.mrb[82].mxu1 %vm520_vm8, %v5165_v0  ;;  %v4407_v0 = vcvt.f32.s32 %v4406_v61 }
 0x2a4   : > { %3671 = vmatprep.mubr.f32.mxu1 %v5967_v52 }
 0x2a7   : > { %4177 = vmatmul.mubr.msk.f32.gmra.mrb[84].mxu1 %vm520_vm8, %v5171_v8  ;;  %v1956_v8 = vadd.s32 1, %v4407_v0 }
 0x2a8   : > { %3677 = vmatprep.mubr.f32.mxu1 %v5967_v52 }
 0x2a9   : > { %v1960_v33 = vrot.slane %v1956_v8, %v4717_v19  ;;  %v1964_v41 = vrot.slane %v1956_v8, %v4714_v16 }
 0x2ab   : > { %4178 = vmatmul.mubr.msk.f32.gmra.mrb[86].mxu1 %vm520_vm8, %v5177_v62  ;;  %v1923_v62 = vrot.slane %v4407_v0, %v4717_v19  ;;  %vm1965_vm15 = vcmp.eq.s32.totalorder %v4682_v4, %v1960_v33  ;;  %vm1966_vm1 = vcmp.eq.s32.totalorder %v4682_v4, %v1964_v41  ;;  %vm1967_vm3 = vcmp.eq.s32.totalorder %v4720_v20, %v1960_v33 }
 0x2ac   : > { %3683 = vmatprep.mubr.f32.mxu1 %v5967_v52  ;;  %v4060_v50 = vsel %vm1965_vm15, 1.0, %v5967_v52  ;;  %v4061_v60 = vsel %vm1966_vm1, 1.0, %v5967_v52  ;;  %vm1968_vm5 = vcmp.eq.s32.totalorder %v4720_v20, %v1964_v41  ;;  %v4062_v2 = vsel %vm1967_vm3, 1.0, %v5967_v52 }
 0x2ad   : > { %vm1928_vm14 = vcmp.eq.s32.totalorder %v4682_v4, %v1923_v62  ;;  %vm1930_vm2 = vcmp.eq.s32.totalorder %v4720_v20, %v1923_v62  ;;  %v1988_v21 = vmul.f32 %v4060_v50, %v1981_v49  ;;  %v1989_v57 = vmul.f32 %v4061_v60, %v1985_v31 }
 0x2ae   : > { %v4058_v46 = vsel %vm1930_vm2, 1.0, %v5967_v52  ;;  %v4063_v53 = vsel %vm1968_vm5, 1.0, %v5967_v52  ;;  %v1990_v63 = vmul.f32 %v4062_v2, %v1981_v49 }
 0x2af   : > { %4179 = vmatmul.mubr.msk.f32.gmra.mrb[88].mxu1 %vm520_vm8, %v5187_v17  ;;  %v1927_v17 = vrot.slane %v4407_v0, %v4714_v16  ;;  %v1991_v3 = vmul.f32 %v4063_v53, %v1985_v31 }
 0x2b0   : > { %3689 = vmatprep.mubr.f32.mxu1 %v5967_v52 }
 0x2b1   : > { %vm1929_vm0 = vcmp.eq.s32.totalorder %v4682_v4, %v1927_v17  ;;  %vm1931_vm4 = vcmp.eq.s32.totalorder %v4720_v20, %v1927_v17 }
 0x2b2   : > { %v4057_v35 = vsel %vm1929_vm0, 1.0, %v5967_v52  ;;  %v4059_v40 = vsel %vm1931_vm4, 1.0, %v5967_v52 }
 0x2b3   : > { %4180 = vmatmul.mubr.msk.f32.gmra.mrb[90].mxu1 %vm520_vm8, %v5206_v22  ;;  %v1940_v22 = vsub.f32 1.0, %v1916_v18 }
 0x2b4   : > { %3695 = vmatprep.mubr.f32.mxu1 %v5967_v52 }
 0x2b5   : > { %v1949_v25 = vrot.slane %v1940_v22, %v4714_v16 }
 0x2b7   : > { %4181 = vmatmul.mubr.msk.f32.gmra.mrb[92].mxu1 %vm520_vm8, %v5235_v15  ;;  %v1945_v15 = vrot.slane %v1940_v22, %v4717_v19  ;;  %v1953_v44 = vmul.f32 %v4057_v35, %v1949_v25  ;;  %v1955_v59 = vmul.f32 %v4059_v40, %v1949_v25 }
 0x2b8   : > { %3701 = vmatprep.mubr.f32.mxu1 %v5967_v52 }
 0x2b9   : > { %v1954_v11 = vmul.f32 %v4058_v46, %v1945_v15  ;;  %v1993_v26 = vadd.f32 %v1989_v57, %v1953_v44  ;;  %v1995_v62 = vadd.f32 %v1991_v3, %v1955_v59  ;;  %v3046_v3 = vcombine.high %v5107_v10, %v5107_v10  ;;  %v4080_v10 = vld [vmem:[%s5934_s2 + $0x10] sm:$0xf] }
 0x2bb   : > { %4182 = vmatmul.mubr.msk.f32.gmra.mrb[94].mxu1 %vm520_vm8, %v5243_v34  ;;  %v4056_v34 = vsel %vm1928_vm14, 1.0, %v5967_v52  ;;  %v1994_v8 = vadd.f32 %v1990_v63, %v1954_v11 }
 0x2bc   : > { %3707 = vmatprep.mubr.f32.mxu1 %v5967_v52 }
 0x2bf   : > { %4183 = vmatmul.mubr.msk.f32.gmra.mrb[96].mxu1 %vm520_vm8, %v5257_v48  ;;  %v1952_v48 = vmul.f32 %v4056_v34, %v1945_v15 }
 0x2c1   : > { %v1992_v56 = vadd.f32 %v1988_v21, %v1952_v48 }
 0x32d   : > { %v2138_v6 = vpop.f32.mrb[18].mxu0 }
 0x32e   : > { %v2185_v61 = vmul.f32 %v2138_v6, %v1992_v56  ;;  %v2140_v0 = vpop.f32.mrb[19].mxu0 }
 0x32f   : > { %v2186_v18 = vmul.f32 %v2140_v0, %v1993_v26 }
 0x331   : > { %v2144_v33 = vpop.f32.mrb[20].mxu0 }
 0x332   : > { %v2187_v17 = vmul.f32 %v2144_v33, %v1994_v8  ;;  %v2146_v41 = vpop.f32.mrb[21].mxu0 }
 0x333   : > { %v2188_v22 = vmul.f32 %v2146_v41, %v1995_v62  ;;  %v3048_v41 = vadd.f32 %v3046_v3, %v4708_v12  ;;  %v5968_v12 = vpack.c.bf16 %v5423_v36, %v5419_v42  ;;  %v5972_v42 = vpack.c.bf16 %v5458_v5, %v5454_v24  ;;  %v4106_v24 = vld [vmem:[%s5934_s2 + $0x14] sm:$0xf] }
 0x334   : > { %v4279_v34 = vpack.c.bf16 %v2187_v17, %v2185_v61 }
 0x335   : > { %v4277_v50 = vpack.c.bf16 %v2188_v22, %v2186_v18  ;;  %v2150_v35 = vpop.f32.mrb[22].mxu0 }
 0x336   : > { %v2189_v60 = vmul.f32 %v2150_v35, %v1992_v56  ;;  %v2152_v48 = vpop.f32.mrb[23].mxu0 }
 0x337   : > { %v2190_v15 = vmul.f32 %v2152_v48, %v1993_v26  ;;  %4278 = vmatprep.subr.bf16.mxu0 %v4277_v50 }
 0x338   : > { %4280 = vmatpush1.bf16.msra.mxu0 %v4279_v34 }
 0x339   : > { %v2156_v49 = vpop.f32.mrb[24].mxu0 }
 0x33a   : > { %v2191_v25 = vmul.f32 %v2156_v49, %v1994_v8  ;;  %v2158_v31 = vpop.f32.mrb[25].mxu0 }
 0x33b   : > { %v2192_v21 = vmul.f32 %v2158_v31, %v1995_v62 }
 0x33c   : > { %v4283_v44 = vpack.c.bf16 %v2191_v25, %v2189_v60  ;;  %v3050_v60 = vfloor.f32 %v3048_v41 }
 0x33d   : > { %v4281_v57 = vpack.c.bf16 %v2192_v21, %v2190_v15  ;;  %v2162_v46 = vpop.f32.mrb[26].mxu0  ;;  %v5971_v21 = vpack.c.bf16 %v5433_v45, %v5429_v39 }
 0x33e   : > { %v2193_v2 = vmul.f32 %v2162_v46, %v1992_v56  ;;  %v2164_v40 = vpop.f32.mrb[27].mxu0  ;;  %v4420_v25 = vtrunc.f32 %v3050_v60  ;;  %v3052_v31 = vsub.f32 %v3048_v41, %v3050_v60  ;;  %v5982_v41 = vld [vmem:[#allocation12_spill] sm:$0xff] }
 0x33f   : > { %v2194_v53 = vmul.f32 %v2164_v40, %v1993_v26  ;;  %4282 = vmatprep.subr.bf16.mxu0 %v4281_v57 }
 0x340   : > { %4284 = vmatpush1.bf16.msra.mxu0 %v4283_v44  ;;  %v5973_v44 = vpack.c.bf16 %v5456_v1, %v5452_v23  ;;  %v5975_v23 = vpack.c.bf16 %v5472_v13, %v5464_v32 }
 0x341   : > { %v2168_v11 = vpop.f32.mrb[28].mxu0 }
 0x342   : > { %v2195_v63 = vmul.f32 %v2168_v11, %v1994_v8  ;;  %v2170_v59 = vpop.f32.mrb[29].mxu0  ;;  %v5978_v11 = vpack.c.bf16 %v5518_v37, %v5514_v28 }
 0x343   : > { %v2196_v6 = vmul.f32 %v2170_v59, %v1995_v62 }
 0x344   : > { %v4287_v61 = vpack.c.bf16 %v2195_v63, %v2193_v2 }
 0x345   : > { %v4285_v0 = vpack.c.bf16 %v2196_v6, %v2194_v53  ;;  %v2174_v18 = vpop.f32.mrb[30].mxu0  ;;  %v3192_v53 = vrot.slane %v3052_v31, %v4717_v19 }
 0x346   : > { %v2197_v33 = vmul.f32 %v2174_v18, %v1992_v56  ;;  %v2176_v17 = vpop.f32.mrb[31].mxu0  ;;  %v4421_v56 = vcvt.f32.s32 %v4420_v25  ;;  %v4132_v25 = vld [vmem:[%s5934_s2 + $0x18] sm:$0xf] }
 0x347   : > { %v2198_v22 = vmul.f32 %v2176_v17, %v1993_v26  ;;  %4286 = vmatprep.subr.bf16.mxu0 %v4285_v0  ;;  %v5969_v26 = vpack.c.bf16 %v5421_v58, %v5416_v51  ;;  %v3151_v58 = vsub.f32 1.0, %v3052_v31 }
 0x348   : > { %4288 = vmatpush1.bf16.msra.mxu0 %v4287_v61  ;;  %v3138_v36 = vrot.slane %v4421_v56, %v4714_v16  ;;  %v3134_v39 = vrot.slane %v4421_v56, %v4717_v19 }
 0x349   : > { %v2180_v34 = vpop.f32.mrb[32].mxu0  ;;  %v3156_v2 = vrot.slane %v3151_v58, %v4717_v19 }
 0x34a   : > { %v2199_v50 = vmul.f32 %v2180_v34, %v1994_v8  ;;  %v2182_v35 = vpop.f32.mrb[33].mxu0  ;;  %v5970_v8 = vpack.c.bf16 %v5435_v14, %v5431_v30  ;;  %v5974_v30 = vpack.c.bf16 %v5477_v54, %v5466_v29  ;;  %vm3140_vm6 = vcmp.eq.s32.totalorder %v4682_v4, %v3138_v36 }
 0x34b   : > { %v2200_v48 = vmul.f32 %v2182_v35, %v1995_v62  ;;  %v3167_v62 = vadd.s32 1, %v4421_v56  ;;  %vm3142_vm7 = vcmp.eq.s32.totalorder %v4720_v20, %v3138_v36  ;;  %v3160_v14 = vrot.slane %v3151_v58, %v4714_v16  ;;  %v4501_v56 = vld [vmem:[%s4750_s17 + $0x8] sm:$0xff]  ;;  %v5991_v36 = vld [vmem:[#allocation5_spill] sm:$0xff] }
 0x34c   : > { %v4291_v15 = vpack.c.bf16 %v2199_v50, %v2197_v33  ;;  %v4143_v1 = vsel %vm3140_vm6, 1.0, %v5967_v52  ;;  %v4145_v5 = vsel %vm3142_vm7, 1.0, %v5967_v52  ;;  %v3196_v29 = vrot.slane %v3052_v31, %v4714_v16  ;;  %v5980_v33 = vld [vmem:[#allocation11_spill] sm:$0xff]  ;;  %v4505_v31 = vld [vmem:[%s4750_s17 + $0x28] sm:$0xff] }
 0x34d   : > { %v4289_v49 = vpack.c.bf16 %v2200_v48, %v2198_v22  ;;  %v3175_v51 = vrot.slane %v3167_v62, %v4714_v16  ;;  %v3171_v45 = vrot.slane %v3167_v62, %v4717_v19  ;;  %v5976_v54 = vpack.c.bf16 %v5508_v43, %v5502_v9  ;;  %v5983_v22 = vld [vmem:[#allocation10_spill] sm:$0xff]  ;;  %v4504_v62 = vld [vmem:[%s4750_s17 + $0x20] sm:$0xff] }
 0x34e   : > { %vm3139_vm12 = vcmp.eq.s32.totalorder %v4682_v4, %v3134_v39  ;;  %vm3141_vm13 = vcmp.eq.s32.totalorder %v4720_v20, %v3134_v39  ;;  %v3164_v32 = vmul.f32 %v4143_v1, %v3160_v14  ;;  %v3166_v13 = vmul.f32 %v4145_v5, %v3160_v14 }
 0x34f   : > { %4290 = vmatprep.subr.bf16.mxu0 %v4289_v49  ;;  %vm3177_vm9 = vcmp.eq.s32.totalorder %v4682_v4, %v3175_v51  ;;  %vm3179_vm10 = vcmp.eq.s32.totalorder %v4720_v20, %v3175_v51  ;;  %vm3176_vm14 = vcmp.eq.s32.totalorder %v4682_v4, %v3171_v45  ;;  %vm3178_vm15 = vcmp.eq.s32.totalorder %v4720_v20, %v3171_v45  ;;  %v5989_v49 = vld [vmem:[#allocation14_spill] sm:$0xff]  ;;  %v5992_v51 = vld [vmem:[#allocation13_spill] sm:$0xff] }
 0x350   : > { %4292 = vmatpush1.bf16.msra.mxu0 %v4291_v15  ;;  %v4147_v57 = vsel %vm3177_vm9, 1.0, %v5967_v52  ;;  %v4149_v46 = vsel %vm3179_vm10, 1.0, %v5967_v52  ;;  %v5977_v9 = vpack.c.bf16 %v5504_v55, %v5500_v27  ;;  %v4142_v63 = vsel %vm3139_vm12, 1.0, %v5967_v52  ;;  %v5988_v15 = vld [vmem:[#allocation16_spill] sm:$0xff] }
 0x351   : > { %4298 = vmatprep.subr.bf16.mxu0 %v5968_v12  ;;  %v3200_v43 = vmul.f32 %v4147_v57, %v3196_v29  ;;  %v3202_v40 = vmul.f32 %v4149_v46, %v3196_v29  ;;  %v4144_v59 = vsel %vm3141_vm13, 1.0, %v5967_v52  ;;  %v4146_v3 = vsel %vm3176_vm14, 1.0, %v5967_v52  ;;  %v4500_v12 = vld [vmem:[%s4750_s17] sm:$0xff] }
 0x352   : > { %v4148_v6 = vsel %vm3178_vm15, 1.0, %v5967_v52  ;;  %v5979_v27 = vpack.c.bf16 %v5516_v47, %v5510_v7  ;;  %v3163_v55 = vmul.f32 %v4142_v63, %v3156_v2  ;;  %v3165_v61 = vmul.f32 %v4144_v59, %v3156_v2  ;;  %v5985_v7 = vld [vmem:[#allocation17_spill] sm:$0xff]  ;;  %v5986_v47 = vld [vmem:[#allocation15_spill] sm:$0xff] }
 0x353   : > { %4081 = vmatmul.mubr.msk.f32.vlgmr.msra.gmra.mrb[16].mxu0 %vm971_vm11, %v4080_v10  ;;  %v3199_v0 = vmul.f32 %v4146_v3, %v3192_v53  ;;  %v3201_v18 = vmul.f32 %v4148_v6, %v3192_v53  ;;  %v5981_v28 = vpack.c.bf16 %v5530_v38, %v5980_v33  ;;  %v3204_v37 = vadd.f32 %v3200_v43, %v3164_v32 }
 0x354   : > { %4300 = vmatpush1.bf16.msra.mxu0 %v5969_v26  ;;  %2641 = vmatprep.mubr.f32.mxu0 %v5967_v52  ;;  %v3206_v17 = vadd.f32 %v3202_v40, %v3166_v13  ;;  %v5984_v34 = vpack.c.bf16 %v5982_v41, %v5983_v22  ;;  %v5987_v60 = vpack.c.bf16 %v5985_v7, %v5986_v47  ;;  %v4502_v26 = vld [vmem:[%s4750_s17 + $0x10] sm:$0xff] }
 0x355   : > { %4302 = vmatprep.subr.bf16.mxu0 %v5970_v8  ;;  %v3203_v50 = vadd.f32 %v3199_v0, %v3163_v55  ;;  %v3205_v35 = vadd.f32 %v3201_v18, %v3165_v61  ;;  %v5990_v38 = vpack.c.bf16 %v5988_v15, %v5989_v49  ;;  %v4503_v8 = vld [vmem:[%s4750_s17 + $0x18] sm:$0xff]  ;;  %v3430_v58 = vrot.slane %v5992_v51, %v5991_v36 }
 0x356   : > { %v4333_v48 = vpack.c.bf16 %v3206_v17, %v3204_v37 }
 0x357   : > { %v4335_v10 = vpack.c.bf16 %v3205_v35, %v3203_v50 }
 0x358   : > { %4304 = vmatpush1.bf16.msra.mxu0 %v5971_v21  ;;  %v4506_v21 = vld [vmem:[%s4750_s17 + $0x30] sm:$0xff] }
 0x359   : > { %4306 = vmatprep.subr.bf16.mxu0 %v5972_v42  ;;  %v4507_v42 = vld [vmem:[%s4750_s17 + $0x38] sm:$0xff]  ;;  %s4514_s17 = scalar_lea.vmem %s4513_s8, 256 }
 0x35a   : > { %p4516_p2 = scmp.lt.s32.totalorder %s4514_s17, %s4508_s7 }
 0x35c   : > { %4308 = vmatpush1.bf16.msra.mxu0 %v5973_v44  ;;  %v5993_v44 = vld [vmem:[#allocation8_spill] sm:$0xff]  ;;  %p4517_p3 = por %p4516_p2, %p4515_p1 }
 0x35d   : > { %4310 = vmatprep.subr.bf16.mxu0 %v5974_v30  ;;  %v3432_v30 = vadd.f32 %v3430_v58, %v5993_v44 }
 0x35e   : > { %p4518_p5 = pnand %p4517_p3, %p4511_p0 }
 0x35f   : > { %v3443_v39 = vfloor.f32 %v3432_v30 }
 0x360   : > { %4312 = vmatpush1.bf16.msra.mxu0 %v5975_v23 }
 0x361   : > { %4318 = vmatprep.subr.bf16.mxu0 %v5976_v54  ;;  %v4422_v45 = vtrunc.f32 %v3443_v39  ;;  %v3445_v23 = vsub.f32 %v3432_v30, %v3443_v39 }
 0x363   : > { %4107 = vmatmul.mubr.msk.f32.vlgmr.msra.gmra.mrb[16].mxu0 %vm971_vm11, %v4106_v24  ;;  %v4423_v14 = vcvt.f32.s32 %v4422_v45  ;;  %v3469_v5 = vsub.f32 1.0, %v3445_v23  ;;  %v3510_v32 = vrot.slane %v3445_v23, %v4717_v19  ;;  %v3514_v53 = vrot.slane %v3445_v23, %v4714_v16 }
 0x364   : > { %4320 = vmatpush1.bf16.msra.mxu0 %v5977_v9  ;;  %3034 = vmatprep.mubr.f32.mxu0 %v5967_v52 }
 0x365   : > { %4322 = vmatprep.subr.bf16.mxu0 %v5978_v11  ;;  %v3485_v24 = vadd.s32 1, %v4423_v14  ;;  %v3452_v1 = vrot.slane %v4423_v14, %v4717_v19  ;;  %v3456_v29 = vrot.slane %v4423_v14, %v4714_v16  ;;  %v3474_v46 = vrot.slane %v3469_v5, %v4717_v19 }
 0x366   : > { %v3478_v9 = vrot.slane %v3469_v5, %v4714_v16 }
 0x367   : > { %v3489_v54 = vrot.slane %v3485_v24, %v4717_v19  ;;  %v3493_v57 = vrot.slane %v3485_v24, %v4714_v16  ;;  %vm3458_vm0 = vcmp.eq.s32.totalorder %v4682_v4, %v3456_v29  ;;  %vm3459_vm3 = vcmp.eq.s32.totalorder %v4720_v20, %v3452_v1 }
 0x368   : > { %4324 = vmatpush1.bf16.msra.mxu0 %v5979_v27  ;;  %v4161_v2 = vsel %vm3458_vm0, 1.0, %v5967_v52  ;;  %v4162_v55 = vsel %vm3459_vm3, 1.0, %v5967_v52  ;;  %vm3460_vm5 = vcmp.eq.s32.totalorder %v4720_v20, %v3456_v29 }
 0x369   : > { %4326 = vmatprep.subr.bf16.mxu0 %v5981_v28  ;;  %vm3494_vm1 = vcmp.eq.s32.totalorder %v4682_v4, %v3489_v54  ;;  %vm3495_vm2 = vcmp.eq.s32.totalorder %v4682_v4, %v3493_v57  ;;  %v3482_v59 = vmul.f32 %v4161_v2, %v3478_v9  ;;  %vm3496_vm4 = vcmp.eq.s32.totalorder %v4720_v20, %v3489_v54 }
 0x36a   : > { %v4164_v40 = vsel %vm3494_vm1, 1.0, %v5967_v52  ;;  %v4165_v3 = vsel %vm3495_vm2, 1.0, %v5967_v52  ;;  %v3483_v0 = vmul.f32 %v4162_v55, %v3474_v46  ;;  %v4166_v18 = vsel %vm3496_vm4, 1.0, %v5967_v52 }
 0x36b   : > { %v3517_v11 = vmul.f32 %v4164_v40, %v3510_v32  ;;  %v3518_v6 = vmul.f32 %v4165_v3, %v3514_v53  ;;  %v4163_v33 = vsel %vm3460_vm5, 1.0, %v5967_v52  ;;  %v3519_v37 = vmul.f32 %v4166_v18, %v3510_v32  ;;  %v5994_v40 = vld [vmem:[#allocation9_spill] sm:$0xff] }
 0x36c   : > { %4328 = vmatpush1.bf16.msra.mxu0 %v5984_v34  ;;  %v3484_v17 = vmul.f32 %v4163_v33, %v3478_v9  ;;  %vm3497_vm6 = vcmp.eq.s32.totalorder %v4720_v20, %v3493_v57 }
 0x36d   : > { %4330 = vmatprep.subr.bf16.mxu0 %v5987_v60  ;;  %v3522_v28 = vadd.f32 %v3518_v6, %v3482_v59  ;;  %v4167_v22 = vsel %vm3497_vm6, 1.0, %v5967_v52  ;;  %v3523_v50 = vadd.f32 %v3519_v37, %v3483_v0 }
 0x36e   : > { %v3520_v35 = vmul.f32 %v4167_v22, %v3514_v53  ;;  %v3043_v53 = vcombine.high %v5994_v40, %v5994_v40 }
 0x370   : > { %4332 = vmatpush1.bf16.msra.mxu0 %v5990_v38 }
 0x371   : > { %4334 = vmatprep.subr.bf16.mxu0 %v4333_v48  ;;  %v3524_v48 = vadd.f32 %v3520_v35, %v3484_v17 }
 0x373   : > { %4133 = vmatmul.mubr.msk.f32.vlgmr.msra.gmra.mrb[16].mxu0 %vm971_vm11, %v4132_v25 }
 0x374   : > { %4336 = vmatpush1.bf16.msra.mxu0 %v4335_v10  ;;  %3271 = vmatprep.mubr.f32.mxu0 %v5967_v52 }
 0x376   : > { %v3667_v63 = vpop.f32.mrb[82].mxu1 }
 0x377   : > { %4150 = vmatmul.mubr.msk.f32.vlgmr.msra.gmra.mrb[34].mxu0 %vm520_vm8, %v4500_v12  ;;  %v3669_v27 = vpop.f32.mrb[83].mxu1 }
 0x378   : > { %3277 = vmatprep.mubr.f32.mxu0 %v5967_v52  ;;  %v5772_v47 = vmul.f32 %v3669_v27, %v3522_v28 }
 0x37a   : > { %v3673_v41 = vpop.f32.mrb[84].mxu1 }
 0x37b   : > { %4151 = vmatmul.mubr.msk.f32.gmra.mrb[36].mxu0 %vm520_vm8, %v4501_v56  ;;  %v3675_v7 = vpop.f32.mrb[85].mxu1  ;;  %v5774_v60 = vmul.f32 %v3673_v41, %v3523_v50 }
 0x37c   : > { %3283 = vmatprep.mubr.f32.mxu0 %v5967_v52  ;;  %v5778_v38 = vmul.f32 %v3675_v7, %v3524_v48 }
 0x37e   : > { %v3679_v15 = vpop.f32.mrb[86].mxu1  ;;  %v4357_v10 = vpack.c.bf16 %v5778_v38, %v5772_v47  ;;  %v5995_v47 = vld [vmem:[#allocation6_spill] sm:$0xff]  ;;  %v5996_v38 = vld [vmem:[#allocation7_spill] sm:$0xff] }
 0x37f   : > { %4152 = vmatmul.mubr.msk.f32.gmra.mrb[38].mxu0 %vm520_vm8, %v4502_v26  ;;  %v3681_v25 = vpop.f32.mrb[87].mxu1 }
 0x380   : > { %3289 = vmatprep.mubr.f32.mxu0 %v5967_v52  ;;  %v5784_v56 = vmul.f32 %v3681_v25, %v3522_v28 }
 0x382   : > { %v3685_v26 = vpop.f32.mrb[88].mxu1 }
 0x383   : > { %4153 = vmatmul.mubr.msk.f32.gmra.mrb[40].mxu0 %vm520_vm8, %v4503_v8  ;;  %v5786_v8 = vmul.f32 %v3685_v26, %v3523_v50 }
 0x384   : > { %3295 = vmatprep.mubr.f32.mxu0 %v5967_v52 }
 0x387   : > { %4154 = vmatmul.mubr.msk.f32.gmra.mrb[42].mxu0 %vm520_vm8, %v4504_v62  ;;  %v3687_v62 = vpop.f32.mrb[89].mxu1 }
 0x388   : > { %3301 = vmatprep.mubr.f32.mxu0 %v5967_v52  ;;  %v3691_v36 = vpop.f32.mrb[90].mxu1 }
 0x389   : > { %v3693_v51 = vpop.f32.mrb[91].mxu1 }
 0x38a   : > { %v5796_v30 = vmul.f32 %v3693_v51, %v3522_v28  ;;  %v3697_v39 = vpop.f32.mrb[92].mxu1 }
 0x38b   : > { %4155 = vmatmul.mubr.msk.f32.gmra.mrb[44].mxu0 %vm520_vm8, %v4505_v31  ;;  %v5788_v31 = vmul.f32 %v3687_v62, %v3524_v48  ;;  %v5798_v45 = vmul.f32 %v3697_v39, %v3523_v50  ;;  %v3699_v14 = vpop.f32.mrb[93].mxu1 }
 0x38c   : > { %3307 = vmatprep.mubr.f32.mxu0 %v5967_v52  ;;  %v5800_v23 = vmul.f32 %v3699_v14, %v3524_v48 }
 0x38e   : > { %v3703_v5 = vpop.f32.mrb[94].mxu1 }
 0x38f   : > { %4156 = vmatmul.mubr.msk.f32.gmra.mrb[46].mxu0 %vm520_vm8, %v4506_v21  ;;  %v3705_v29 = vpop.f32.mrb[95].mxu1 }
 0x390   : > { %3313 = vmatprep.mubr.f32.mxu0 %v5967_v52  ;;  %v5808_v57 = vmul.f32 %v3705_v29, %v3522_v28 }
 0x393   : > { %4157 = vmatmul.mubr.msk.f32.gmra.mrb[48].mxu0 %vm520_vm8, %v4507_v42  ;;  %vm3457_vm8 = vcmp.eq.s32.totalorder %v4682_v4, %v3452_v1  ;;  %v4361_v42 = vpack.c.bf16 %v5788_v31, %v5784_v56  ;;  %v4365_v1 = vpack.c.bf16 %v5800_v23, %v5796_v30 }
 0x394   : > { %3405 = vmatprep.mubr.f32.mxu0 %v5967_v52  ;;  %v4160_v13 = vsel %vm3457_vm8, 1.0, %v5967_v52 }
 0x395   : > { %v3481_v43 = vmul.f32 %v4160_v13, %v3474_v46  ;;  %v3709_v46 = vpop.f32.mrb[96].mxu1 }
 0x396   : > { %v5810_v32 = vmul.f32 %v3709_v46, %v3523_v50  ;;  %v3711_v13 = vpop.f32.mrb[97].mxu1 }
 0x397   : > { %v3521_v61 = vadd.f32 %v3517_v11, %v3481_v43  ;;  %v5812_v2 = vmul.f32 %v3711_v13, %v3524_v48  ;;  %v3045_v11 = vadd.f32 %v3043_v53, %v5993_v44 }
 0x399   : > { %v5770_v34 = vmul.f32 %v3667_v63, %v3521_v61  ;;  %v5782_v12 = vmul.f32 %v3679_v15, %v3521_v61  ;;  %v5794_v58 = vmul.f32 %v3691_v36, %v3521_v61  ;;  %v5806_v54 = vmul.f32 %v3703_v5, %v3521_v61 }
 0x39a   : > { %v4369_v43 = vpack.c.bf16 %v5812_v2, %v5808_v57  ;;  %v3049_v63 = vfloor.f32 %v3045_v11 }
 0x39b   : > { %v4359_v49 = vpack.c.bf16 %v5774_v60, %v5770_v34  ;;  %v4363_v21 = vpack.c.bf16 %v5786_v8, %v5782_v12  ;;  %v4367_v24 = vpack.c.bf16 %v5798_v45, %v5794_v58  ;;  %v4371_v9 = vpack.c.bf16 %v5810_v32, %v5806_v54 }
 0x39c   : > { %v4418_v59 = vtrunc.f32 %v3049_v63  ;;  %v3051_v27 = vsub.f32 %v3045_v11, %v3049_v63 }
 0x39e   : > { %v4419_v3 = vcvt.f32.s32 %v4418_v59  ;;  %v3075_v33 = vsub.f32 1.0, %v3051_v27  ;;  %v3116_v17 = vrot.slane %v3051_v27, %v4717_v19  ;;  %v3120_v22 = vrot.slane %v3051_v27, %v4714_v16 }
 0x3a0   : > { %v3091_v6 = vadd.s32 1, %v4419_v3  ;;  %v3058_v55 = vrot.slane %v4419_v3, %v4717_v19  ;;  %v3062_v0 = vrot.slane %v4419_v3, %v4714_v16  ;;  %v3080_v28 = vrot.slane %v3075_v33, %v4717_v19 }
 0x3a1   : > { %v3084_v41 = vrot.slane %v3075_v33, %v4714_v16 }
 0x3a2   : > { %v3095_v61 = vrot.slane %v3091_v6, %v4717_v19  ;;  %v3099_v18 = vrot.slane %v3091_v6, %v4714_v16  ;;  %vm3063_vm7 = vcmp.eq.s32.totalorder %v4682_v4, %v3058_v55  ;;  %vm3065_vm10 = vcmp.eq.s32.totalorder %v4720_v20, %v3058_v55 }
 0x3a3   : > { %vm3064_vm13 = vcmp.eq.s32.totalorder %v4682_v4, %v3062_v0  ;;  %vm3066_vm15 = vcmp.eq.s32.totalorder %v4720_v20, %v3062_v0  ;;  %v4134_v44 = vsel %vm3063_vm7, 1.0, %v5967_v52  ;;  %v4136_v50 = vsel %vm3065_vm10, 1.0, %v5967_v52 }
 0x3a4   : > { %vm3100_vm9 = vcmp.eq.s32.totalorder %v4682_v4, %v3095_v61  ;;  %vm3102_vm12 = vcmp.eq.s32.totalorder %v4720_v20, %v3095_v61  ;;  %vm3101_vm14 = vcmp.eq.s32.totalorder %v4682_v4, %v3099_v18  ;;  %vm3103_vm8 = vcmp.eq.s32.totalorder %v4720_v20, %v3099_v18 }
 0x3a5   : > { %v4138_v37 = vsel %vm3100_vm9, 1.0, %v5967_v52  ;;  %v4140_v4 = vsel %vm3102_vm12, 1.0, %v5967_v52  ;;  %v4135_v35 = vsel %vm3064_vm13, 1.0, %v5967_v52  ;;  %v4139_v20 = vsel %vm3101_vm14, 1.0, %v5967_v52 }
 0x3a6   : > { %v4137_v7 = vsel %vm3066_vm15, 1.0, %v5967_v52  ;;  %v4141_v48 = vsel %vm3103_vm8, 1.0, %v5967_v52  ;;  %v3087_v15 = vmul.f32 %v4134_v44, %v3080_v28  ;;  %v3123_v25 = vmul.f32 %v4138_v37, %v3116_v17 }
 0x3a7   : > { %v3089_v26 = vmul.f32 %v4136_v50, %v3080_v28  ;;  %v3125_v19 = vmul.f32 %v4140_v4, %v3116_v17  ;;  %v3088_v62 = vmul.f32 %v4135_v35, %v3084_v41  ;;  %v3124_v36 = vmul.f32 %v4139_v20, %v3120_v22 }
 0x3a8   : > { %v3090_v51 = vmul.f32 %v4137_v7, %v3084_v41  ;;  %v3126_v16 = vmul.f32 %v4141_v48, %v3120_v22  ;;  %v3127_v14 = vadd.f32 %v3123_v25, %v3087_v15 }
 0x3a9   : > { %v3129_v29 = vadd.f32 %v3125_v19, %v3089_v26  ;;  %v3128_v46 = vadd.f32 %v3124_v36, %v3088_v62 }
 0x3aa   : > { %v3130_v13 = vadd.f32 %v3126_v16, %v3090_v51 }
 0x44a   : > { %v3273_v39 = vpop.f32.mrb[34].mxu0 }
 0x44b   : > { %v3275_v5 = vpop.f32.mrb[35].mxu0  ;;  %v3320_v53 = vmul.f32 %v3273_v39, %v3127_v14 }
 0x44c   : > { %v3321_v59 = vmul.f32 %v3275_v5, %v3128_v46 }
 0x44e   : > { %v3279_v40 = vpop.f32.mrb[36].mxu0 }
 0x44f   : > { %v3322_v11 = vmul.f32 %v3279_v40, %v3129_v29  ;;  %v3281_v63 = vpop.f32.mrb[37].mxu0 }
 0x450   : > { %v3323_v3 = vmul.f32 %v3281_v63, %v3130_v13  ;;  %v4158_v63 = vld [vmem:[%s5934_s2 + $0x1c] sm:$0xf] }
 0x451   : > { %v4339_v6 = vpack.c.bf16 %v3322_v11, %v3320_v53 }
 0x452   : > { %v4337_v27 = vpack.c.bf16 %v3323_v3, %v3321_v59  ;;  %v3285_v55 = vpop.f32.mrb[38].mxu0 }
 0x453   : > { %v3287_v61 = vpop.f32.mrb[39].mxu0  ;;  %v3324_v18 = vmul.f32 %v3285_v55, %v3127_v14 }
 0x454   : > { %4338 = vmatprep.subr.bf16.mxu0 %v4337_v27  ;;  %v3325_v28 = vmul.f32 %v3287_v61, %v3128_v46 }
 0x455   : > { %4340 = vmatpush1.bf16.msra.mxu0 %v4339_v6 }
 0x456   : > { %v3291_v0 = vpop.f32.mrb[40].mxu0 }
 0x457   : > { %v3326_v33 = vmul.f32 %v3291_v0, %v3129_v29  ;;  %v3293_v44 = vpop.f32.mrb[41].mxu0 }
 0x458   : > { %v3327_v37 = vmul.f32 %v3293_v44, %v3130_v13 }
 0x459   : > { %v4343_v17 = vpack.c.bf16 %v3326_v33, %v3324_v18 }
 0x45a   : > { %v4341_v41 = vpack.c.bf16 %v3327_v37, %v3325_v28  ;;  %v3297_v22 = vpop.f32.mrb[42].mxu0 }
 0x45b   : > { %v3299_v50 = vpop.f32.mrb[43].mxu0  ;;  %v3328_v35 = vmul.f32 %v3297_v22, %v3127_v14 }
 0x45c   : > { %4342 = vmatprep.subr.bf16.mxu0 %v4341_v41  ;;  %v3329_v48 = vmul.f32 %v3299_v50, %v3128_v46 }
 0x45d   : > { %4344 = vmatpush1.bf16.msra.mxu0 %v4343_v17 }
 0x45e   : > { %v3303_v4 = vpop.f32.mrb[44].mxu0 }
 0x45f   : > { %v3330_v20 = vmul.f32 %v3303_v4, %v3129_v29  ;;  %v3305_v7 = vpop.f32.mrb[45].mxu0 }
 0x460   : > { %v3331_v15 = vmul.f32 %v3305_v7, %v3130_v13 }
 0x461   : > { %v4347_v25 = vpack.c.bf16 %v3330_v20, %v3328_v35 }
 0x462   : > { %v4345_v26 = vpack.c.bf16 %v3331_v15, %v3329_v48  ;;  %v3309_v19 = vpop.f32.mrb[46].mxu0 }
 0x463   : > { %v3311_v62 = vpop.f32.mrb[47].mxu0  ;;  %v3332_v51 = vmul.f32 %v3309_v19, %v3127_v14 }
 0x464   : > { %4346 = vmatprep.subr.bf16.mxu0 %v4345_v26  ;;  %v3333_v5 = vmul.f32 %v3311_v62, %v3128_v46 }
 0x465   : > { %4348 = vmatpush1.bf16.msra.mxu0 %v4347_v25 }
 0x466   : > { %v3315_v36 = vpop.f32.mrb[48].mxu0 }
 0x467   : > { %v3334_v16 = vmul.f32 %v3315_v36, %v3129_v29  ;;  %v3317_v39 = vpop.f32.mrb[49].mxu0 }
 0x468   : > { %v3335_v40 = vmul.f32 %v3317_v39, %v3130_v13 }
 0x469   : > { %v4351_v53 = vpack.c.bf16 %v3334_v16, %v3332_v51 }
 0x46a   : > { %v4349_v11 = vpack.c.bf16 %v3335_v40, %v3333_v5 }
 0x46c   : > { %4350 = vmatprep.subr.bf16.mxu0 %v4349_v11 }
 0x46d   : > { %4352 = vmatpush1.bf16.msra.mxu0 %v4351_v53 }
 0x46e   : > { %4358 = vmatprep.subr.bf16.mxu0 %v4357_v10 }
 0x470   : > { %4159 = vmatmul.mubr.msk.f32.vlgmr.msra.gmra.mrb[16].mxu0 %vm971_vm11, %v4158_v63 }
 0x471   : > { %4360 = vmatpush1.bf16.msra.mxu0 %v4359_v49  ;;  %3799 = vmatprep.mubr.f32.mxu0 %v5967_v52  ;;  %v4184_v52 = vld [vmem:[%s5934_s2 + $0x20] sm:$0xf] }
 0x472   : > { %4362 = vmatprep.subr.bf16.mxu0 %v4361_v42 }
 0x475   : > { %4364 = vmatpush1.bf16.msra.mxu0 %v4363_v21 }
 0x476   : > { %4366 = vmatprep.subr.bf16.mxu0 %v4365_v1 }
 0x479   : > { %4368 = vmatpush1.bf16.msra.mxu0 %v4367_v24 }
 0x47a   : > { %4370 = vmatprep.subr.bf16.mxu0 %v4369_v43 }
 0x47d   : > { %4372 = vmatpush1.bf16.msra.mxu0 %v4371_v9 }
 0x480   : > { %4185 = vmatmul.mubr.msk.f32.vlgmr.msra.gmra.mrb[16].mxu0 %vm971_vm11, %v4184_v52 }
 0x553   : > { %v3801_v34 = vpop.f32.mrb[16].mxu0 }
 0x554   : > { %v4373_v60 = vadd.f32 %v3801_v34, %v5995_v47  ;;  %v3803_v49 = vpop.f32.mrb[17].mxu0 }
 0x555   : > { %v4374_v10 = vadd.f32 %v3803_v49, %v5996_v38 }
 0x557   : > { %v3810_v12 = vcombine.low %v4373_v60, %v4374_v10 }
 0x559   : > { %3812 = vst [vmem:[%s285_s16] sm:$0xff] %v3810_v12 }
 0x55a   : > { %4521 = shalt.err (!%p4518_p5)
}
 0x55b   : > { %s4522_s9 = scalar_lea.hbm %s5885_s27, 128  ;;  %s4526_s13 = scalar_lea.hbm %s5937_s5, 256 }
 0x55c   : > { %p4523_p6 = scmp.ne.s32.totalorder %s5885_s27, %s4522_s9  ;;  %p4527_p10 = scmp.lt.u32.totalorder %s5885_s27, %s5937_s5 }
 0x55d   : > { %p4528_p11 = scmp.lt.u32.totalorder %s4526_s13, %s4522_s9  ;;  %p4530_p13 = scmp.lt.u32.totalorder %s4522_s9, %s5885_s27 }
 0x55e   : > { %p4524_p7 = pnand %p4523_p6, %p4661_p4 }
 0x55f   : > { %p4529_p12 = por %p4528_p11, %p4527_p10 }
 0x560   : > { %p4525_p9 = pneg %p4524_p7 }
 0x561   : > { %p4531_p0 = por %p4530_p13, %p4529_p12 }
 0x563   : > { %p4532_p1 = pnand %p4531_p0, %p4525_p9 }
 0x565   : > { %4535 = shalt.err (!%p4532_p1)
}
 0x566   : > { %4426 = dma.vmem_to_hbm [thread:$0]  (%p4661_p4), %s5887_s24, 128, %s5885_s27, %s3814_s29  }
 0x567 PF: > { %p4432_p2 = scmp.ge.s32.totalorder %s4586_s23, 2  ;;  %s3842_s16 = sand.u32 1, %s4566_s18  }
 0x568   : > { %s3843_s11 = scalar_lea.sflag [#allocation3], %s3842_s16 }
 0x569   : > { %p4429_p3 = pnand %p4432_p2, %p4668_p8 }
 0x56b   : > { %4561 = dma.done.wait (!%p4429_p3), %s3843_s11, 128  }
 0x56c   : > { %4563 = vsyncadd (!%p4429_p3), %s3843_s11, 4294967168  ;;  %s18_s23 = sadd.s32 1, %s4586_s23   ;;  %s5997_s18 = smov %s4570_s19 }
 0x56d   : > { %p15_p5 = scmp.ge.s32.totalorder %s18_s23, 4   ;;  %s5998_s19 = smov %s4574_s20 }
 0x56e   : > { %s5999_s20 = smov %s4674_s6  ;;  %s6000_s21 = smov %s4582_s22 }
 0x56f   : > { %s6001_s22 = smov %s6003_s26  ;;  %17 = sbr.rel (!%p15_p5) target bundleno = 4 (0x4), region = 92 }
 0x576   :  { %3848 = vsyncpa [#allocation3], 1 }
 0x577   :  { %3850 = vsyncpa [#allocation3 + $0x1], 1 }

</bundles_post_ra>
